<compile_context>
chip_gen: v6e
topology: v6e:2x2x1
jax: 0.10.0
libtpu: 0.0.40
codegen_flags: <defaults>
</compile_context>

<pallas_src>
import jax
import jax.numpy as jnp
from jax.experimental import pallas as pl
from jax.experimental.pallas import tpu as pltpu

_EMB = 384        # embedding size
_MEL = 80         # mel input channels
_LANE = 128       # TPU lane width: channel dims padded to a multiple of this
_HALO = 8         # sublane-aligned zero halo rows used for "same" conv padding

# (in_ch, out_ch, kernel) — matches the PyTorch constructor
_UNCOND_CFG = [(80, 48, 3), (48, 96, 5), (96, 384, 5), (384, 96, 5), (96, 1, 3)]
_COND_CFG = [(384, 96, 5), (96, 1, 3)]


def _pad_to_lane(c):
    return ((c + _LANE - 1) // _LANE) * _LANE


# ----------------------------------------------------------------------------
# Fused kernel: one invocation = full JCU forward for one batch element.
#   x_ref : (Tx, 128)   mel input, NLC, channels zero-padded 80->128
#   e_ref : (Te, 384)   conditioning embedding
#   w_*   : (K*Cin_p, Cout_p) bf16 matmul weights ; b_* : (1, Cout_p) f32
#   f*_ref: fmap outputs in NLC, channel dims padded to 128 (lane-dense stores)
#   pad_ref: (Tc + 2*_HALO, 384) f32 VMEM scratch — conv input slab with halos
# ----------------------------------------------------------------------------
def _jcu_kernel(x_ref, e_ref,
                w_u0, b_u0, w_u1, b_u1, w_u2, b_u2,
                w_fc, b_fc,
                w_c0, b_c0, w_c1, b_c1,
                w_u3, b_u3, w_u4, b_u4,
                f1_ref, f2_ref, f3_ref, f4_ref, f5_ref, f6_ref, f7_ref,
                pad_ref):
    Tx = x_ref.shape[0]
    Te = e_ref.shape[0]
    Tc = Tx + Te
    emb = e_ref.shape[1]

    def zero_rows(r0, n):
        pad_ref[r0:r0 + n, :] = jnp.zeros((n, emb), pad_ref.dtype)

    # Halo-only zeroing (replaces 8 full-slab clears).  Interior rows are always
    # fully overwritten by fill()/the concat in the real channel columns before
    # they are read, and stale data in *padded* channel columns is harmless
    # because the corresponding weight rows are zero.
    zero_rows(0, _HALO)                 # top halo (never re-dirtied)
    zero_rows(_HALO + Tx, _HALO)        # 8 rows just below the Tx window
    zero_rows(_HALO + Tc, _HALO)        # 8 rows just below the Tc window

    def fill(h):
        T, C = h.shape
        pad_ref[_HALO:_HALO + T, :C] = h.astype(pad_ref.dtype)

    def conv(T, Cp, w_ref, b_ref):
        # K accumulating MXU matmuls over shifted slab views; no im2col slab.
        K = w_ref.shape[0] // Cp
        p = (K - 1) // 2
        base = _HALO - p
        acc = jnp.dot(pad_ref[base:base + T, :Cp].astype(jnp.bfloat16),
                      w_ref[0:Cp, :], preferred_element_type=jnp.float32)
        for k in range(1, K):
            acc = acc + jnp.dot(
                pad_ref[base + k:base + k + T, :Cp].astype(jnp.bfloat16),
                w_ref[k * Cp:(k + 1) * Cp, :],
                preferred_element_type=jnp.float32)
        acc = acc + b_ref[...]
        return jnp.maximum(acc, 0.2 * acc)          # LeakyReLU(0.2), f32

    # ---- unconditional convs 0..2 (fmaps are post-activation: inplace LReLU) ----
    fill(x_ref[...])
    a1 = conv(Tx, 128, w_u0, b_u0)                  # (Tx,128), 48 real
    f1_ref[...] = a1.astype(f1_ref.dtype)           # full-lane store
    fill(a1)
    a2 = conv(Tx, 128, w_u1, b_u1)                  # (Tx,128), 96 real
    f2_ref[...] = a2.astype(f2_ref.dtype)
    fill(a2)
    a3 = conv(Tx, 128, w_u2, b_u2)                  # (Tx,384)
    f3_ref[...] = a3.astype(f3_ref.dtype)

    # ---- fc on the embedding, then time-axis concat built inside the slab ----
    cond = jnp.dot(e_ref[...].astype(jnp.bfloat16), w_fc[...],
                   preferred_element_type=jnp.float32) + b_fc[...]
    cond = jnp.maximum(cond, 0.2 * cond)            # (Te, 384)

    if Tx % _HALO == 0:
        # aligned stores: a3 then cond stacked along time in the slab
        pad_ref[_HALO:_HALO + Tx, :] = a3.astype(pad_ref.dtype)
        pad_ref[_HALO + Tx:_HALO + Tc, :] = cond.astype(pad_ref.dtype)
    else:  # rare unaligned-Tx fallback (f32 slab: masked stores are safe)
        fill(jnp.concatenate([a3, cond], axis=0))
    ac0 = conv(Tc, emb, w_c0, b_c0)                 # (Tc,128), 96 real
    f4_ref[...] = ac0.astype(f4_ref.dtype)
    fill(ac0)
    ac1 = conv(Tc, 128, w_c1, b_c1)                 # (Tc,128), col 0 real
    f5_ref[...] = ac1.astype(f5_ref.dtype)          # conditional out (lane 0)

    # rows below the Tx window now hold cond data — re-zero before u3/u4
    zero_rows(_HALO + Tx, _HALO)

    # ---- unconditional convs 3..4 ----
    fill(a3)
    a4 = conv(Tx, emb, w_u3, b_u3)                  # (Tx,128), 96 real
    f6_ref[...] = a4.astype(f6_ref.dtype)
    fill(a4)
    a5 = conv(Tx, 128, w_u4, b_u4)                  # (Tx,128), col 0 real
    f7_ref[...] = a5.astype(f7_ref.dtype)           # unconditional out (lane 0)


# ----------------------------------------------------------------------------
# Parameter construction: weight_norm reparam + conversion to kernel layout
# (transpose/pad/reshape hoisted here, once, instead of per forward call).
# ----------------------------------------------------------------------------
def _weight_norm_conv(key, cout, cin, k):
    kv, kg, kb = jax.random.split(key, 3)
    v = jax.random.normal(kv, (cout, cin, k), jnp.float32) * 0.05
    g = jax.random.uniform(kg, (cout,), jnp.float32, 0.5, 1.5)
    norm = jnp.sqrt(jnp.sum(v * v, axis=(1, 2), keepdims=True)) + 1e-12
    w = g[:, None, None] * v / norm                    # (Cout, Cin, K)
    b = jax.random.normal(kb, (cout,), jnp.float32) * 0.05
    return w, b


def _prep_conv(w, b):
    """(Cout, Cin, K) conv weight -> ((K*Cin_p, Cout_p) bf16, (1, Cout_p) f32)."""
    cout, cin, k = w.shape
    cin_p, cout_p = _pad_to_lane(cin), _pad_to_lane(cout)
    wk = jnp.transpose(w, (2, 1, 0))                   # (K, Cin, Cout)
    wk = jnp.pad(wk, ((0, 0), (0, cin_p - cin), (0, cout_p - cout)))
    w2d = wk.reshape(k * cin_p, cout_p).astype(jnp.bfloat16)
    b2 = jnp.pad(b, (0, cout_p - cout)).reshape(1, cout_p).astype(jnp.float32)
    return w2d, b2


def make_params(seed=0):
    key = jax.random.PRNGKey(seed)
    uncond, cond = [], []
    for (ci, co, k) in _UNCOND_CFG:
        key, sub = jax.random.split(key)
        uncond.append(_prep_conv(*_weight_norm_conv(sub, co, ci, k)))
    for (ci, co, k) in _COND_CFG:
        key, sub = jax.random.split(key)
        cond.append(_prep_conv(*_weight_norm_conv(sub, co, ci, k)))
    key, kw, kb = jax.random.split(key, 3)
    fc_w = jax.random.normal(kw, (_EMB, _EMB), jnp.float32) * 0.05   # (out, in)
    fc_b = jax.random.normal(kb, (_EMB,), jnp.float32) * 0.05
    fc = (jnp.transpose(fc_w).astype(jnp.bfloat16),                  # (in, out)
          fc_b.reshape(1, _EMB).astype(jnp.float32))
    # kernel argument order: uncond 0..2, fc, cond 0..1, uncond 3..4
    layers = uncond[:3] + [fc] + cond + uncond[3:]
    return {"layers": layers}


# ----------------------------------------------------------------------------
# Full JCU forward.
#   x         : (B, 80, Tx)   PyTorch NCL
#   embedding : (B, Te, 384)
# Returns (unconditional_out (B, Tx), conditional_out (B, Tx+Te),
#          fmaps: 7 NCL arrays) — identical shapes to the PyTorch module.
# ----------------------------------------------------------------------------
def jcu_forward(params, x, embedding):
    B, cin, Tx = x.shape
    _, Te, emb = embedding.shape
    Tc = Tx + Te
    cin_p = _pad_to_lane(cin)

    # one-time boundary transform: NCL -> NLC + zero-pad channels to lane width
    x_nlc = jnp.transpose(x, (0, 2, 1))
    x_nlc = jnp.pad(x_nlc, ((0, 0), (0, 0), (0, cin_p - cin)))

    layers = params["layers"]                 # 8 (w, b) pairs, kernel order
    flat = [t for wb in layers for t in wb]

    # lane-dense fmap outputs: channel dims padded to 128; sliced back below
    real_ch = (48, 96, 384, 96, 1, 96, 1)
    fmap_T = (Tx, Tx, Tx, Tc, Tc, Tx, Tx)
    padded_shapes = [(B, t, _pad_to_lane(c)) for t, c in zip(fmap_T, real_ch)]
    out_shape = tuple(jax.ShapeDtypeStruct(s, jnp.float32) for s in padded_shapes)

    def batch_spec(shape):
        return pl.BlockSpec((None,) + tuple(shape[1:]), lambda b: (b, 0, 0))

    def rep_spec(arr):
        return pl.BlockSpec(arr.shape, lambda b: (0, 0))

    in_specs = [batch_spec(x_nlc.shape), batch_spec(embedding.shape)]
    in_specs += [rep_spec(a) for a in flat]
    out_specs = tuple(batch_spec(s) for s in padded_shapes)

    # advisory cost estimate for XLA scheduling around the fused call
    t_per_layer = (Tx, Tx, Tx, Te, Tc, Tc, Tx, Tx)
    flops = int(B * sum(2 * t * w.shape[0] * w.shape[1]
                        for (w, _), t in zip(layers, t_per_layer)))
    weight_bytes = int(sum(w.size * 2 + b.size * 4 for (w, b) in layers))
    bytes_accessed = int(x_nlc.size * 4 + embedding.size * 4 + weight_bytes
                         + sum(4 * s[0] * s[1] * s[2] for s in padded_shapes))

    # explicit VMEM budget (matters on v7x: 64 MiB physical, 32 MiB scoped default)
    slab_bytes = (Tc + 2 * _HALO) * emb * 4
    io_tile_bytes = 4 * ((Tx * cin_p + Te * emb)
                         + sum(s[1] * s[2] for s in padded_shapes))
    vmem_need = slab_bytes + 2 * weight_bytes + 2 * io_tile_bytes + (4 << 20)
    vmem_limit = int(min(vmem_need, 128 << 20)) if vmem_need > (32 << 20) else None

    outs = pl.pallas_call(
        _jcu_kernel,
        out_shape=out_shape,
        grid=(B,),
        in_specs=in_specs,
        out_specs=out_specs,
        scratch_shapes=[pltpu.VMEM((Tc + 2 * _HALO, emb), jnp.float32)],
        compiler_params=pltpu.CompilerParams(
            dimension_semantics=("parallel",),   # 2 TCs on v7x; cheap loop elsewhere
            vmem_limit_bytes=vmem_limit),
        cost_estimate=pl.CostEstimate(flops=flops, transcendentals=0,
                                      bytes_accessed=bytes_accessed),
    )(x_nlc, embedding, *flat)

    # slice back to real channels (fuses into the NLC -> NCL transpose)
    fmaps = [jnp.transpose(f[:, :, :c], (0, 2, 1)) for f, c in zip(outs, real_ch)]
    unconditional_out = outs[6][:, :, 0]   # squeeze(channel=1) of final uncond conv
    conditional_out = outs[4][:, :, 0]     # squeeze(channel=1) of final cond conv
    return unconditional_out, conditional_out, fmaps


if __name__ == "__main__":
    key = jax.random.PRNGKey(0)
    kx, ke = jax.random.split(key)
    B, T_x, T_e = 2, 16, 8
    x = jax.random.normal(kx, (B, _MEL, T_x), jnp.float32)           # mel input (NCL)
    embedding = jax.random.normal(ke, (B, T_e, _EMB), jnp.float32)   # conditioning

    params = make_params(seed=0)
    fwd = jax.jit(jcu_forward)
    uncond_out, cond_out, fmaps = fwd(params, x, embedding)
    jax.block_until_ready((uncond_out, cond_out, fmaps))

    assert uncond_out.shape == (B, T_x)
    assert cond_out.shape == (B, T_x + T_e)
    expected = [(B, 48, T_x), (B, 96, T_x), (B, 384, T_x),
                (B, 96, T_x + T_e), (B, 1, T_x + T_e),
                (B, 96, T_x), (B, 1, T_x)]
    assert len(fmaps) == len(expected)
    for f, s in zip(fmaps, expected):
        assert f.shape == s, (f.shape, s)
    print("KERNEL_OK")
</pallas_src>

<mosaic_0001>
module attributes {stable_mosaic.version = 11 : i64} {
  func.func @_jcu_kernel(%arg0: i32, %arg1: memref<1x16x128xf32, #tpu.memory_space<vmem>>, %arg2: memref<1x8x384xf32, #tpu.memory_space<vmem>>, %arg3: memref<384x128xbf16, #tpu.memory_space<vmem>>, %arg4: memref<1x128xf32, #tpu.memory_space<vmem>>, %arg5: memref<640x128xbf16, #tpu.memory_space<vmem>>, %arg6: memref<1x128xf32, #tpu.memory_space<vmem>>, %arg7: memref<640x384xbf16, #tpu.memory_space<vmem>>, %arg8: memref<1x384xf32, #tpu.memory_space<vmem>>, %arg9: memref<384x384xbf16, #tpu.memory_space<vmem>>, %arg10: memref<1x384xf32, #tpu.memory_space<vmem>>, %arg11: memref<1920x128xbf16, #tpu.memory_space<vmem>>, %arg12: memref<1x128xf32, #tpu.memory_space<vmem>>, %arg13: memref<384x128xbf16, #tpu.memory_space<vmem>>, %arg14: memref<1x128xf32, #tpu.memory_space<vmem>>, %arg15: memref<1920x128xbf16, #tpu.memory_space<vmem>>, %arg16: memref<1x128xf32, #tpu.memory_space<vmem>>, %arg17: memref<384x128xbf16, #tpu.memory_space<vmem>>, %arg18: memref<1x128xf32, #tpu.memory_space<vmem>>, %arg19: memref<1x16x128xf32, #tpu.memory_space<vmem>>, %arg20: memref<1x16x128xf32, #tpu.memory_space<vmem>>, %arg21: memref<1x16x384xf32, #tpu.memory_space<vmem>>, %arg22: memref<1x24x128xf32, #tpu.memory_space<vmem>>, %arg23: memref<1x24x128xf32, #tpu.memory_space<vmem>>, %arg24: memref<1x16x128xf32, #tpu.memory_space<vmem>>, %arg25: memref<1x16x128xf32, #tpu.memory_space<vmem>>, %arg26: memref<40x384xf32, #tpu.memory_space<vmem>>) attributes {dimension_semantics = [#tpu.dimension_semantics<parallel>], iteration_bounds = array<i64: 2>, scalar_prefetch = 0 : i64, scratch_operands = 1 : i64, tpu.core_type = #tpu.core_type<tc>, window_params = [{transform_indices = @transform_0, window_bounds = array<i64: 1, 16, 128>}, {transform_indices = @transform_1, window_bounds = array<i64: 1, 8, 384>}, {pipeline_mode = #tpu.pipeline_mode<synchronous>, transform_indices = @transform_2, window_bounds = array<i64: 384, 128>}, {pipeline_mode = #tpu.pipeline_mode<synchronous>, transform_indices = @transform_3, window_bounds = array<i64: 1, 128>}, {pipeline_mode = #tpu.pipeline_mode<synchronous>, transform_indices = @transform_4, window_bounds = array<i64: 640, 128>}, {pipeline_mode = #tpu.pipeline_mode<synchronous>, transform_indices = @transform_5, window_bounds = array<i64: 1, 128>}, {pipeline_mode = #tpu.pipeline_mode<synchronous>, transform_indices = @transform_6, window_bounds = array<i64: 640, 384>}, {pipeline_mode = #tpu.pipeline_mode<synchronous>, transform_indices = @transform_7, window_bounds = array<i64: 1, 384>}, {pipeline_mode = #tpu.pipeline_mode<synchronous>, transform_indices = @transform_8, window_bounds = array<i64: 384, 384>}, {pipeline_mode = #tpu.pipeline_mode<synchronous>, transform_indices = @transform_9, window_bounds = array<i64: 1, 384>}, {pipeline_mode = #tpu.pipeline_mode<synchronous>, transform_indices = @transform_10, window_bounds = array<i64: 1920, 128>}, {pipeline_mode = #tpu.pipeline_mode<synchronous>, transform_indices = @transform_11, window_bounds = array<i64: 1, 128>}, {pipeline_mode = #tpu.pipeline_mode<synchronous>, transform_indices = @transform_12, window_bounds = array<i64: 384, 128>}, {pipeline_mode = #tpu.pipeline_mode<synchronous>, transform_indices = @transform_13, window_bounds = array<i64: 1, 128>}, {pipeline_mode = #tpu.pipeline_mode<synchronous>, transform_indices = @transform_14, window_bounds = array<i64: 1920, 128>}, {pipeline_mode = #tpu.pipeline_mode<synchronous>, transform_indices = @transform_15, window_bounds = array<i64: 1, 128>}, {pipeline_mode = #tpu.pipeline_mode<synchronous>, transform_indices = @transform_16, window_bounds = array<i64: 384, 128>}, {pipeline_mode = #tpu.pipeline_mode<synchronous>, transform_indices = @transform_17, window_bounds = array<i64: 1, 128>}, {transform_indices = @transform_18, window_bounds = array<i64: 1, 16, 128>}, {transform_indices = @transform_19, window_bounds = array<i64: 1, 16, 128>}, {transform_indices = @transform_20, window_bounds = array<i64: 1, 16, 384>}, {transform_indices = @transform_21, window_bounds = array<i64: 1, 24, 128>}, {transform_indices = @transform_22, window_bounds = array<i64: 1, 24, 128>}, {transform_indices = @transform_23, window_bounds = array<i64: 1, 16, 128>}, {transform_indices = @transform_24, window_bounds = array<i64: 1, 16, 128>}]} {
    %cst = arith.constant 0.000000e+00 : f32
    %0 = vector.broadcast %cst : f32 to vector<8x384xf32>
    %c0 = arith.constant 0 : index
    %c0_0 = arith.constant 0 : index
    %1 = vector.load %arg26[%c0, %c0_0] : memref<40x384xf32, #tpu.memory_space<vmem>>, vector<8x384xf32>
    tpu.vector_store %arg26[%c0, %c0_0], %0 {strides = array<i32>} : memref<40x384xf32, #tpu.memory_space<vmem>>, vector<8x384xf32>,
    %cst_1 = arith.constant 0.000000e+00 : f32
    %2 = vector.broadcast %cst_1 : f32 to vector<8x384xf32>
    %c24 = arith.constant 24 : index
    %c0_2 = arith.constant 0 : index
    %3 = vector.load %arg26[%c24, %c0_2] : memref<40x384xf32, #tpu.memory_space<vmem>>, vector<8x384xf32>
    tpu.vector_store %arg26[%c24, %c0_2], %2 {strides = array<i32>} : memref<40x384xf32, #tpu.memory_space<vmem>>, vector<8x384xf32>,
    %cst_3 = arith.constant 0.000000e+00 : f32
    %4 = vector.broadcast %cst_3 : f32 to vector<8x384xf32>
    %c32 = arith.constant 32 : index
    %c0_4 = arith.constant 0 : index
    %5 = vector.load %arg26[%c32, %c0_4] : memref<40x384xf32, #tpu.memory_space<vmem>>, vector<8x384xf32>
    tpu.vector_store %arg26[%c32, %c0_4], %4 {strides = array<i32>} : memref<40x384xf32, #tpu.memory_space<vmem>>, vector<8x384xf32>,
    %c0_5 = arith.constant 0 : index
    %c0_6 = arith.constant 0 : index
    %c0_7 = arith.constant 0 : index
    %6 = vector.load %arg1[%c0_5, %c0_6, %c0_7] : memref<1x16x128xf32, #tpu.memory_space<vmem>>, vector<1x16x128xf32>
    %7 = vector.shape_cast %6 : vector<1x16x128xf32> to vector<16x128xf32>
    %c8 = arith.constant 8 : index
    %c0_8 = arith.constant 0 : index
    %8 = vector.load %arg26[%c8, %c0_8] : memref<40x384xf32, #tpu.memory_space<vmem>>, vector<16x128xf32>
    tpu.vector_store %arg26[%c8, %c0_8], %7 {strides = array<i32>} : memref<40x384xf32, #tpu.memory_space<vmem>>, vector<16x128xf32>,
    %c7 = arith.constant 7 : index
    %c0_9 = arith.constant 0 : index
    %9 = vector.load %arg26[%c7, %c0_9] : memref<40x384xf32, #tpu.memory_space<vmem>>, vector<16x128xf32>
    %10 = arith.truncf %9 : vector<16x128xf32> to vector<16x128xbf16>
    %c0_10 = arith.constant 0 : index
    %c0_11 = arith.constant 0 : index
    %11 = vector.load %arg3[%c0_10, %c0_11] : memref<384x128xbf16, #tpu.memory_space<vmem>>, vector<128x128xbf16>
    %cst_12 = arith.constant dense<0.000000e+00> : vector<16x128xf32>
    %12 = tpu.matmul %10, %11, %cst_12 {dimension_numbers = #tpu.dot_dimension_numbers<[1], [0], [0], [1], [0, 0, 1, 1], [], []>} : vector<16x128xbf16>, vector<128x128xbf16>, vector<16x128xf32> -> vector<16x128xf32>
    %c8_13 = arith.constant 8 : index
    %c0_14 = arith.constant 0 : index
    %13 = vector.load %arg26[%c8_13, %c0_14] : memref<40x384xf32, #tpu.memory_space<vmem>>, vector<16x128xf32>
    %14 = arith.truncf %13 : vector<16x128xf32> to vector<16x128xbf16>
    %c128 = arith.constant 128 : index
    %c0_15 = arith.constant 0 : index
    %15 = vector.load %arg3[%c128, %c0_15] : memref<384x128xbf16, #tpu.memory_space<vmem>>, vector<128x128xbf16>
    %cst_16 = arith.constant dense<0.000000e+00> : vector<16x128xf32>
    %16 = tpu.matmul %14, %15, %cst_16 {dimension_numbers = #tpu.dot_dimension_numbers<[1], [0], [0], [1], [0, 0, 1, 1], [], []>} : vector<16x128xbf16>, vector<128x128xbf16>, vector<16x128xf32> -> vector<16x128xf32>
    %17 = arith.addf %12, %16 : vector<16x128xf32>
    %c9 = arith.constant 9 : index
    %c0_17 = arith.constant 0 : index
    %18 = vector.load %arg26[%c9, %c0_17] : memref<40x384xf32, #tpu.memory_space<vmem>>, vector<16x128xf32>
    %19 = arith.truncf %18 : vector<16x128xf32> to vector<16x128xbf16>
    %c256 = arith.constant 256 : index
    %c0_18 = arith.constant 0 : index
    %20 = vector.load %arg3[%c256, %c0_18] : memref<384x128xbf16, #tpu.memory_space<vmem>>, vector<128x128xbf16>
    %cst_19 = arith.constant dense<0.000000e+00> : vector<16x128xf32>
    %21 = tpu.matmul %19, %20, %cst_19 {dimension_numbers = #tpu.dot_dimension_numbers<[1], [0], [0], [1], [0, 0, 1, 1], [], []>} : vector<16x128xbf16>, vector<128x128xbf16>, vector<16x128xf32> -> vector<16x128xf32>
    %22 = arith.addf %17, %21 : vector<16x128xf32>
    %c0_20 = arith.constant 0 : index
    %c0_21 = arith.constant 0 : index
    %23 = vector.load %arg4[%c0_20, %c0_21] : memref<1x128xf32, #tpu.memory_space<vmem>>, vector<1x128xf32>
    %24 = vector.broadcast %23 : vector<1x128xf32> to vector<16x128xf32>
    %25 = arith.addf %22, %24 : vector<16x128xf32>
    %cst_22 = arith.constant 2.000000e-01 : f32
    %26 = vector.broadcast %cst_22 : f32 to vector<16x128xf32>
    %27 = arith.mulf %26, %25 : vector<16x128xf32>
    %28 = arith.maximumf %25, %27 : vector<16x128xf32>
    %c0_23 = arith.constant 0 : index
    %c0_24 = arith.constant 0 : index
    %c0_25 = arith.constant 0 : index
    %29 = vector.load %arg19[%c0_23, %c0_24, %c0_25] : memref<1x16x128xf32, #tpu.memory_space<vmem>>, vector<1x16x128xf32>
    %30 = vector.shape_cast %29 : vector<1x16x128xf32> to vector<16x128xf32>
    %31 = vector.shape_cast %28 : vector<16x128xf32> to vector<1x16x128xf32>
    tpu.vector_store %arg19[%c0_23, %c0_24, %c0_25], %31 {strides = array<i32>} : memref<1x16x128xf32, #tpu.memory_space<vmem>>, vector<1x16x128xf32>,
    %c8_26 = arith.constant 8 : index
    %c0_27 = arith.constant 0 : index
    %32 = vector.load %arg26[%c8_26, %c0_27] : memref<40x384xf32, #tpu.memory_space<vmem>>, vector<16x128xf32>
    tpu.vector_store %arg26[%c8_26, %c0_27], %28 {strides = array<i32>} : memref<40x384xf32, #tpu.memory_space<vmem>>, vector<16x128xf32>,
    %c6 = arith.constant 6 : index
    %c0_28 = arith.constant 0 : index
    %33 = vector.load %arg26[%c6, %c0_28] : memref<40x384xf32, #tpu.memory_space<vmem>>, vector<16x128xf32>
    %34 = arith.truncf %33 : vector<16x128xf32> to vector<16x128xbf16>
    %c0_29 = arith.constant 0 : index
    %c0_30 = arith.constant 0 : index
    %35 = vector.load %arg5[%c0_29, %c0_30] : memref<640x128xbf16, #tpu.memory_space<vmem>>, vector<128x128xbf16>
    %cst_31 = arith.constant dense<0.000000e+00> : vector<16x128xf32>
    %36 = tpu.matmul %34, %35, %cst_31 {dimension_numbers = #tpu.dot_dimension_numbers<[1], [0], [0], [1], [0, 0, 1, 1], [], []>} : vector<16x128xbf16>, vector<128x128xbf16>, vector<16x128xf32> -> vector<16x128xf32>
    %c7_32 = arith.constant 7 : index
    %c0_33 = arith.constant 0 : index
    %37 = vector.load %arg26[%c7_32, %c0_33] : memref<40x384xf32, #tpu.memory_space<vmem>>, vector<16x128xf32>
    %38 = arith.truncf %37 : vector<16x128xf32> to vector<16x128xbf16>
    %c128_34 = arith.constant 128 : index
    %c0_35 = arith.constant 0 : index
    %39 = vector.load %arg5[%c128_34, %c0_35] : memref<640x128xbf16, #tpu.memory_space<vmem>>, vector<128x128xbf16>
    %cst_36 = arith.constant dense<0.000000e+00> : vector<16x128xf32>
    %40 = tpu.matmul %38, %39, %cst_36 {dimension_numbers = #tpu.dot_dimension_numbers<[1], [0], [0], [1], [0, 0, 1, 1], [], []>} : vector<16x128xbf16>, vector<128x128xbf16>, vector<16x128xf32> -> vector<16x128xf32>
    %41 = arith.addf %36, %40 : vector<16x128xf32>
    %c8_37 = arith.constant 8 : index
    %c0_38 = arith.constant 0 : index
    %42 = vector.load %arg26[%c8_37, %c0_38] : memref<40x384xf32, #tpu.memory_space<vmem>>, vector<16x128xf32>
    %43 = arith.truncf %42 : vector<16x128xf32> to vector<16x128xbf16>
    %c256_39 = arith.constant 256 : index
    %c0_40 = arith.constant 0 : index
    %44 = vector.load %arg5[%c256_39, %c0_40] : memref<640x128xbf16, #tpu.memory_space<vmem>>, vector<128x128xbf16>
    %cst_41 = arith.constant dense<0.000000e+00> : vector<16x128xf32>
    %45 = tpu.matmul %43, %44, %cst_41 {dimension_numbers = #tpu.dot_dimension_numbers<[1], [0], [0], [1], [0, 0, 1, 1], [], []>} : vector<16x128xbf16>, vector<128x128xbf16>, vector<16x128xf32> -> vector<16x128xf32>
    %46 = arith.addf %41, %45 : vector<16x128xf32>
    %c9_42 = arith.constant 9 : index
    %c0_43 = arith.constant 0 : index
    %47 = vector.load %arg26[%c9_42, %c0_43] : memref<40x384xf32, #tpu.memory_space<vmem>>, vector<16x128xf32>
    %48 = arith.truncf %47 : vector<16x128xf32> to vector<16x128xbf16>
    %c384 = arith.constant 384 : index
    %c0_44 = arith.constant 0 : index
    %49 = vector.load %arg5[%c384, %c0_44] : memref<640x128xbf16, #tpu.memory_space<vmem>>, vector<128x128xbf16>
    %cst_45 = arith.constant dense<0.000000e+00> : vector<16x128xf32>
    %50 = tpu.matmul %48, %49, %cst_45 {dimension_numbers = #tpu.dot_dimension_numbers<[1], [0], [0], [1], [0, 0, 1, 1], [], []>} : vector<16x128xbf16>, vector<128x128xbf16>, vector<16x128xf32> -> vector<16x128xf32>
    %51 = arith.addf %46, %50 : vector<16x128xf32>
    %c10 = arith.constant 10 : index
    %c0_46 = arith.constant 0 : index
    %52 = vector.load %arg26[%c10, %c0_46] : memref<40x384xf32, #tpu.memory_space<vmem>>, vector<16x128xf32>
    %53 = arith.truncf %52 : vector<16x128xf32> to vector<16x128xbf16>
    %c512 = arith.constant 512 : index
    %c0_47 = arith.constant 0 : index
    %54 = vector.load %arg5[%c512, %c0_47] : memref<640x128xbf16, #tpu.memory_space<vmem>>, vector<128x128xbf16>
    %cst_48 = arith.constant dense<0.000000e+00> : vector<16x128xf32>
    %55 = tpu.matmul %53, %54, %cst_48 {dimension_numbers = #tpu.dot_dimension_numbers<[1], [0], [0], [1], [0, 0, 1, 1], [], []>} : vector<16x128xbf16>, vector<128x128xbf16>, vector<16x128xf32> -> vector<16x128xf32>
    %56 = arith.addf %51, %55 : vector<16x128xf32>
    %c0_49 = arith.constant 0 : index
    %c0_50 = arith.constant 0 : index
    %57 = vector.load %arg6[%c0_49, %c0_50] : memref<1x128xf32, #tpu.memory_space<vmem>>, vector<1x128xf32>
    %58 = vector.broadcast %57 : vector<1x128xf32> to vector<16x128xf32>
    %59 = arith.addf %56, %58 : vector<16x128xf32>
    %cst_51 = arith.constant 2.000000e-01 : f32
    %60 = vector.broadcast %cst_51 : f32 to vector<16x128xf32>
    %61 = arith.mulf %60, %59 : vector<16x128xf32>
    %62 = arith.maximumf %59, %61 : vector<16x128xf32>
    %c0_52 = arith.constant 0 : index
    %c0_53 = arith.constant 0 : index
    %c0_54 = arith.constant 0 : index
    %63 = vector.load %arg20[%c0_52, %c0_53, %c0_54] : memref<1x16x128xf32, #tpu.memory_space<vmem>>, vector<1x16x128xf32>
    %64 = vector.shape_cast %63 : vector<1x16x128xf32> to vector<16x128xf32>
    %65 = vector.shape_cast %62 : vector<16x128xf32> to vector<1x16x128xf32>
    tpu.vector_store %arg20[%c0_52, %c0_53, %c0_54], %65 {strides = array<i32>} : memref<1x16x128xf32, #tpu.memory_space<vmem>>, vector<1x16x128xf32>,
    %c8_55 = arith.constant 8 : index
    %c0_56 = arith.constant 0 : index
    %66 = vector.load %arg26[%c8_55, %c0_56] : memref<40x384xf32, #tpu.memory_space<vmem>>, vector<16x128xf32>
    tpu.vector_store %arg26[%c8_55, %c0_56], %62 {strides = array<i32>} : memref<40x384xf32, #tpu.memory_space<vmem>>, vector<16x128xf32>,
    %c6_57 = arith.constant 6 : index
    %c0_58 = arith.constant 0 : index
    %67 = vector.load %arg26[%c6_57, %c0_58] : memref<40x384xf32, #tpu.memory_space<vmem>>, vector<16x128xf32>
    %68 = arith.truncf %67 : vector<16x128xf32> to vector<16x128xbf16>
    %c0_59 = arith.constant 0 : index
    %c0_60 = arith.constant 0 : index
    %69 = vector.load %arg7[%c0_59, %c0_60] : memref<640x384xbf16, #tpu.memory_space<vmem>>, vector<128x384xbf16>
    %cst_61 = arith.constant dense<0.000000e+00> : vector<16x384xf32>
    %70 = tpu.matmul %68, %69, %cst_61 {dimension_numbers = #tpu.dot_dimension_numbers<[1], [0], [0], [1], [0, 0, 1, 1], [], []>} : vector<16x128xbf16>, vector<128x384xbf16>, vector<16x384xf32> -> vector<16x384xf32>
    %c7_62 = arith.constant 7 : index
    %c0_63 = arith.constant 0 : index
    %71 = vector.load %arg26[%c7_62, %c0_63] : memref<40x384xf32, #tpu.memory_space<vmem>>, vector<16x128xf32>
    %72 = arith.truncf %71 : vector<16x128xf32> to vector<16x128xbf16>
    %c128_64 = arith.constant 128 : index
    %c0_65 = arith.constant 0 : index
    %73 = vector.load %arg7[%c128_64, %c0_65] : memref<640x384xbf16, #tpu.memory_space<vmem>>, vector<128x384xbf16>
    %cst_66 = arith.constant dense<0.000000e+00> : vector<16x384xf32>
    %74 = tpu.matmul %72, %73, %cst_66 {dimension_numbers = #tpu.dot_dimension_numbers<[1], [0], [0], [1], [0, 0, 1, 1], [], []>} : vector<16x128xbf16>, vector<128x384xbf16>, vector<16x384xf32> -> vector<16x384xf32>
    %75 = arith.addf %70, %74 : vector<16x384xf32>
    %c8_67 = arith.constant 8 : index
    %c0_68 = arith.constant 0 : index
    %76 = vector.load %arg26[%c8_67, %c0_68] : memref<40x384xf32, #tpu.memory_space<vmem>>, vector<16x128xf32>
    %77 = arith.truncf %76 : vector<16x128xf32> to vector<16x128xbf16>
    %c256_69 = arith.constant 256 : index
    %c0_70 = arith.constant 0 : index
    %78 = vector.load %arg7[%c256_69, %c0_70] : memref<640x384xbf16, #tpu.memory_space<vmem>>, vector<128x384xbf16>
    %cst_71 = arith.constant dense<0.000000e+00> : vector<16x384xf32>
    %79 = tpu.matmul %77, %78, %cst_71 {dimension_numbers = #tpu.dot_dimension_numbers<[1], [0], [0], [1], [0, 0, 1, 1], [], []>} : vector<16x128xbf16>, vector<128x384xbf16>, vector<16x384xf32> -> vector<16x384xf32>
    %80 = arith.addf %75, %79 : vector<16x384xf32>
    %c9_72 = arith.constant 9 : index
    %c0_73 = arith.constant 0 : index
    %81 = vector.load %arg26[%c9_72, %c0_73] : memref<40x384xf32, #tpu.memory_space<vmem>>, vector<16x128xf32>
    %82 = arith.truncf %81 : vector<16x128xf32> to vector<16x128xbf16>
    %c384_74 = arith.constant 384 : index
    %c0_75 = arith.constant 0 : index
    %83 = vector.load %arg7[%c384_74, %c0_75] : memref<640x384xbf16, #tpu.memory_space<vmem>>, vector<128x384xbf16>
    %cst_76 = arith.constant dense<0.000000e+00> : vector<16x384xf32>
    %84 = tpu.matmul %82, %83, %cst_76 {dimension_numbers = #tpu.dot_dimension_numbers<[1], [0], [0], [1], [0, 0, 1, 1], [], []>} : vector<16x128xbf16>, vector<128x384xbf16>, vector<16x384xf32> -> vector<16x384xf32>
    %85 = arith.addf %80, %84 : vector<16x384xf32>
    %c10_77 = arith.constant 10 : index
    %c0_78 = arith.constant 0 : index
    %86 = vector.load %arg26[%c10_77, %c0_78] : memref<40x384xf32, #tpu.memory_space<vmem>>, vector<16x128xf32>
    %87 = arith.truncf %86 : vector<16x128xf32> to vector<16x128xbf16>
    %c512_79 = arith.constant 512 : index
    %c0_80 = arith.constant 0 : index
    %88 = vector.load %arg7[%c512_79, %c0_80] : memref<640x384xbf16, #tpu.memory_space<vmem>>, vector<128x384xbf16>
    %cst_81 = arith.constant dense<0.000000e+00> : vector<16x384xf32>
    %89 = tpu.matmul %87, %88, %cst_81 {dimension_numbers = #tpu.dot_dimension_numbers<[1], [0], [0], [1], [0, 0, 1, 1], [], []>} : vector<16x128xbf16>, vector<128x384xbf16>, vector<16x384xf32> -> vector<16x384xf32>
    %90 = arith.addf %85, %89 : vector<16x384xf32>
    %c0_82 = arith.constant 0 : index
    %c0_83 = arith.constant 0 : index
    %91 = vector.load %arg8[%c0_82, %c0_83] : memref<1x384xf32, #tpu.memory_space<vmem>>, vector<1x384xf32>
    %92 = vector.broadcast %91 : vector<1x384xf32> to vector<16x384xf32>
    %93 = arith.addf %90, %92 : vector<16x384xf32>
    %cst_84 = arith.constant 2.000000e-01 : f32
    %94 = vector.broadcast %cst_84 : f32 to vector<16x384xf32>
    %95 = arith.mulf %94, %93 : vector<16x384xf32>
    %96 = arith.maximumf %93, %95 : vector<16x384xf32>
    %c0_85 = arith.constant 0 : index
    %c0_86 = arith.constant 0 : index
    %c0_87 = arith.constant 0 : index
    %97 = vector.load %arg21[%c0_85, %c0_86, %c0_87] : memref<1x16x384xf32, #tpu.memory_space<vmem>>, vector<1x16x384xf32>
    %98 = vector.shape_cast %97 : vector<1x16x384xf32> to vector<16x384xf32>
    %99 = vector.shape_cast %96 : vector<16x384xf32> to vector<1x16x384xf32>
    tpu.vector_store %arg21[%c0_85, %c0_86, %c0_87], %99 {strides = array<i32>} : memref<1x16x384xf32, #tpu.memory_space<vmem>>, vector<1x16x384xf32>,
    %c0_88 = arith.constant 0 : index
    %c0_89 = arith.constant 0 : index
    %c0_90 = arith.constant 0 : index
    %100 = vector.load %arg2[%c0_88, %c0_89, %c0_90] : memref<1x8x384xf32, #tpu.memory_space<vmem>>, vector<1x8x384xf32>
    %101 = vector.shape_cast %100 : vector<1x8x384xf32> to vector<8x384xf32>
    %102 = arith.truncf %101 : vector<8x384xf32> to vector<8x384xbf16>
    %c0_91 = arith.constant 0 : index
    %c0_92 = arith.constant 0 : index
    %103 = vector.load %arg9[%c0_91, %c0_92] : memref<384x384xbf16, #tpu.memory_space<vmem>>, vector<384x384xbf16>
    %cst_93 = arith.constant dense<0.000000e+00> : vector<8x384xf32>
    %104 = tpu.matmul %102, %103, %cst_93 {dimension_numbers = #tpu.dot_dimension_numbers<[1], [0], [0], [1], [0, 0, 1, 1], [], []>} : vector<8x384xbf16>, vector<384x384xbf16>, vector<8x384xf32> -> vector<8x384xf32>
    %c0_94 = arith.constant 0 : index
    %c0_95 = arith.constant 0 : index
    %105 = vector.load %arg10[%c0_94, %c0_95] : memref<1x384xf32, #tpu.memory_space<vmem>>, vector<1x384xf32>
    %106 = vector.broadcast %105 : vector<1x384xf32> to vector<8x384xf32>
    %107 = arith.addf %104, %106 : vector<8x384xf32>
    %cst_96 = arith.constant 2.000000e-01 : f32
    %108 = vector.broadcast %cst_96 : f32 to vector<8x384xf32>
    %109 = arith.mulf %108, %107 : vector<8x384xf32>
    %110 = arith.maximumf %107, %109 : vector<8x384xf32>
    %c8_97 = arith.constant 8 : index
    %c0_98 = arith.constant 0 : index
    %111 = vector.load %arg26[%c8_97, %c0_98] : memref<40x384xf32, #tpu.memory_space<vmem>>, vector<16x384xf32>
    tpu.vector_store %arg26[%c8_97, %c0_98], %96 {strides = array<i32>} : memref<40x384xf32, #tpu.memory_space<vmem>>, vector<16x384xf32>,
    %c24_99 = arith.constant 24 : index
    %c0_100 = arith.constant 0 : index
    %112 = vector.load %arg26[%c24_99, %c0_100] : memref<40x384xf32, #tpu.memory_space<vmem>>, vector<8x384xf32>
    tpu.vector_store %arg26[%c24_99, %c0_100], %110 {strides = array<i32>} : memref<40x384xf32, #tpu.memory_space<vmem>>, vector<8x384xf32>,
    %c6_101 = arith.constant 6 : index
    %c0_102 = arith.constant 0 : index
    %113 = vector.load %arg26[%c6_101, %c0_102] : memref<40x384xf32, #tpu.memory_space<vmem>>, vector<24x384xf32>
    %114 = arith.truncf %113 : vector<24x384xf32> to vector<24x384xbf16>
    %c0_103 = arith.constant 0 : index
    %c0_104 = arith.constant 0 : index
    %115 = vector.load %arg11[%c0_103, %c0_104] : memref<1920x128xbf16, #tpu.memory_space<vmem>>, vector<384x128xbf16>
    %cst_105 = arith.constant dense<0.000000e+00> : vector<24x128xf32>
    %116 = tpu.matmul %114, %115, %cst_105 {dimension_numbers = #tpu.dot_dimension_numbers<[1], [0], [0], [1], [0, 0, 1, 1], [], []>} : vector<24x384xbf16>, vector<384x128xbf16>, vector<24x128xf32> -> vector<24x128xf32>
    %c7_106 = arith.constant 7 : index
    %c0_107 = arith.constant 0 : index
    %117 = vector.load %arg26[%c7_106, %c0_107] : memref<40x384xf32, #tpu.memory_space<vmem>>, vector<24x384xf32>
    %118 = arith.truncf %117 : vector<24x384xf32> to vector<24x384xbf16>
    %c384_108 = arith.constant 384 : index
    %c0_109 = arith.constant 0 : index
    %119 = vector.load %arg11[%c384_108, %c0_109] : memref<1920x128xbf16, #tpu.memory_space<vmem>>, vector<384x128xbf16>
    %cst_110 = arith.constant dense<0.000000e+00> : vector<24x128xf32>
    %120 = tpu.matmul %118, %119, %cst_110 {dimension_numbers = #tpu.dot_dimension_numbers<[1], [0], [0], [1], [0, 0, 1, 1], [], []>} : vector<24x384xbf16>, vector<384x128xbf16>, vector<24x128xf32> -> vector<24x128xf32>
    %121 = arith.addf %116, %120 : vector<24x128xf32>
    %c8_111 = arith.constant 8 : index
    %c0_112 = arith.constant 0 : index
    %122 = vector.load %arg26[%c8_111, %c0_112] : memref<40x384xf32, #tpu.memory_space<vmem>>, vector<24x384xf32>
    %123 = arith.truncf %122 : vector<24x384xf32> to vector<24x384xbf16>
    %c768 = arith.constant 768 : index
    %c0_113 = arith.constant 0 : index
    %124 = vector.load %arg11[%c768, %c0_113] : memref<1920x128xbf16, #tpu.memory_space<vmem>>, vector<384x128xbf16>
    %cst_114 = arith.constant dense<0.000000e+00> : vector<24x128xf32>
    %125 = tpu.matmul %123, %124, %cst_114 {dimension_numbers = #tpu.dot_dimension_numbers<[1], [0], [0], [1], [0, 0, 1, 1], [], []>} : vector<24x384xbf16>, vector<384x128xbf16>, vector<24x128xf32> -> vector<24x128xf32>
    %126 = arith.addf %121, %125 : vector<24x128xf32>
    %c9_115 = arith.constant 9 : index
    %c0_116 = arith.constant 0 : index
    %127 = vector.load %arg26[%c9_115, %c0_116] : memref<40x384xf32, #tpu.memory_space<vmem>>, vector<24x384xf32>
    %128 = arith.truncf %127 : vector<24x384xf32> to vector<24x384xbf16>
    %c1152 = arith.constant 1152 : index
    %c0_117 = arith.constant 0 : index
    %129 = vector.load %arg11[%c1152, %c0_117] : memref<1920x128xbf16, #tpu.memory_space<vmem>>, vector<384x128xbf16>
    %cst_118 = arith.constant dense<0.000000e+00> : vector<24x128xf32>
    %130 = tpu.matmul %128, %129, %cst_118 {dimension_numbers = #tpu.dot_dimension_numbers<[1], [0], [0], [1], [0, 0, 1, 1], [], []>} : vector<24x384xbf16>, vector<384x128xbf16>, vector<24x128xf32> -> vector<24x128xf32>
    %131 = arith.addf %126, %130 : vector<24x128xf32>
    %c10_119 = arith.constant 10 : index
    %c0_120 = arith.constant 0 : index
    %132 = vector.load %arg26[%c10_119, %c0_120] : memref<40x384xf32, #tpu.memory_space<vmem>>, vector<24x384xf32>
    %133 = arith.truncf %132 : vector<24x384xf32> to vector<24x384xbf16>
    %c1536 = arith.constant 1536 : index
    %c0_121 = arith.constant 0 : index
    %134 = vector.load %arg11[%c1536, %c0_121] : memref<1920x128xbf16, #tpu.memory_space<vmem>>, vector<384x128xbf16>
    %cst_122 = arith.constant dense<0.000000e+00> : vector<24x128xf32>
    %135 = tpu.matmul %133, %134, %cst_122 {dimension_numbers = #tpu.dot_dimension_numbers<[1], [0], [0], [1], [0, 0, 1, 1], [], []>} : vector<24x384xbf16>, vector<384x128xbf16>, vector<24x128xf32> -> vector<24x128xf32>
    %136 = arith.addf %131, %135 : vector<24x128xf32>
    %c0_123 = arith.constant 0 : index
    %c0_124 = arith.constant 0 : index
    %137 = vector.load %arg12[%c0_123, %c0_124] : memref<1x128xf32, #tpu.memory_space<vmem>>, vector<1x128xf32>
    %138 = vector.broadcast %137 : vector<1x128xf32> to vector<24x128xf32>
    %139 = arith.addf %136, %138 : vector<24x128xf32>
    %cst_125 = arith.constant 2.000000e-01 : f32
    %140 = vector.broadcast %cst_125 : f32 to vector<24x128xf32>
    %141 = arith.mulf %140, %139 : vector<24x128xf32>
    %142 = arith.maximumf %139, %141 : vector<24x128xf32>
    %c0_126 = arith.constant 0 : index
    %c0_127 = arith.constant 0 : index
    %c0_128 = arith.constant 0 : index
    %143 = vector.load %arg22[%c0_126, %c0_127, %c0_128] : memref<1x24x128xf32, #tpu.memory_space<vmem>>, vector<1x24x128xf32>
    %144 = vector.shape_cast %143 : vector<1x24x128xf32> to vector<24x128xf32>
    %145 = vector.shape_cast %142 : vector<24x128xf32> to vector<1x24x128xf32>
    tpu.vector_store %arg22[%c0_126, %c0_127, %c0_128], %145 {strides = array<i32>} : memref<1x24x128xf32, #tpu.memory_space<vmem>>, vector<1x24x128xf32>,
    %c8_129 = arith.constant 8 : index
    %c0_130 = arith.constant 0 : index
    %146 = vector.load %arg26[%c8_129, %c0_130] : memref<40x384xf32, #tpu.memory_space<vmem>>, vector<24x128xf32>
    tpu.vector_store %arg26[%c8_129, %c0_130], %142 {strides = array<i32>} : memref<40x384xf32, #tpu.memory_space<vmem>>, vector<24x128xf32>,
    %c7_131 = arith.constant 7 : index
    %c0_132 = arith.constant 0 : index
    %147 = vector.load %arg26[%c7_131, %c0_132] : memref<40x384xf32, #tpu.memory_space<vmem>>, vector<24x128xf32>
    %148 = arith.truncf %147 : vector<24x128xf32> to vector<24x128xbf16>
    %c0_133 = arith.constant 0 : index
    %c0_134 = arith.constant 0 : index
    %149 = vector.load %arg13[%c0_133, %c0_134] : memref<384x128xbf16, #tpu.memory_space<vmem>>, vector<128x128xbf16>
    %cst_135 = arith.constant dense<0.000000e+00> : vector<24x128xf32>
    %150 = tpu.matmul %148, %149, %cst_135 {dimension_numbers = #tpu.dot_dimension_numbers<[1], [0], [0], [1], [0, 0, 1, 1], [], []>} : vector<24x128xbf16>, vector<128x128xbf16>, vector<24x128xf32> -> vector<24x128xf32>
    %c8_136 = arith.constant 8 : index
    %c0_137 = arith.constant 0 : index
    %151 = vector.load %arg26[%c8_136, %c0_137] : memref<40x384xf32, #tpu.memory_space<vmem>>, vector<24x128xf32>
    %152 = arith.truncf %151 : vector<24x128xf32> to vector<24x128xbf16>
    %c128_138 = arith.constant 128 : index
    %c0_139 = arith.constant 0 : index
    %153 = vector.load %arg13[%c128_138, %c0_139] : memref<384x128xbf16, #tpu.memory_space<vmem>>, vector<128x128xbf16>
    %cst_140 = arith.constant dense<0.000000e+00> : vector<24x128xf32>
    %154 = tpu.matmul %152, %153, %cst_140 {dimension_numbers = #tpu.dot_dimension_numbers<[1], [0], [0], [1], [0, 0, 1, 1], [], []>} : vector<24x128xbf16>, vector<128x128xbf16>, vector<24x128xf32> -> vector<24x128xf32>
    %155 = arith.addf %150, %154 : vector<24x128xf32>
    %c9_141 = arith.constant 9 : index
    %c0_142 = arith.constant 0 : index
    %156 = vector.load %arg26[%c9_141, %c0_142] : memref<40x384xf32, #tpu.memory_space<vmem>>, vector<24x128xf32>
    %157 = arith.truncf %156 : vector<24x128xf32> to vector<24x128xbf16>
    %c256_143 = arith.constant 256 : index
    %c0_144 = arith.constant 0 : index
    %158 = vector.load %arg13[%c256_143, %c0_144] : memref<384x128xbf16, #tpu.memory_space<vmem>>, vector<128x128xbf16>
    %cst_145 = arith.constant dense<0.000000e+00> : vector<24x128xf32>
    %159 = tpu.matmul %157, %158, %cst_145 {dimension_numbers = #tpu.dot_dimension_numbers<[1], [0], [0], [1], [0, 0, 1, 1], [], []>} : vector<24x128xbf16>, vector<128x128xbf16>, vector<24x128xf32> -> vector<24x128xf32>
    %160 = arith.addf %155, %159 : vector<24x128xf32>
    %c0_146 = arith.constant 0 : index
    %c0_147 = arith.constant 0 : index
    %161 = vector.load %arg14[%c0_146, %c0_147] : memref<1x128xf32, #tpu.memory_space<vmem>>, vector<1x128xf32>
    %162 = vector.broadcast %161 : vector<1x128xf32> to vector<24x128xf32>
    %163 = arith.addf %160, %162 : vector<24x128xf32>
    %cst_148 = arith.constant 2.000000e-01 : f32
    %164 = vector.broadcast %cst_148 : f32 to vector<24x128xf32>
    %165 = arith.mulf %164, %163 : vector<24x128xf32>
    %166 = arith.maximumf %163, %165 : vector<24x128xf32>
    %c0_149 = arith.constant 0 : index
    %c0_150 = arith.constant 0 : index
    %c0_151 = arith.constant 0 : index
    %167 = vector.load %arg23[%c0_149, %c0_150, %c0_151] : memref<1x24x128xf32, #tpu.memory_space<vmem>>, vector<1x24x128xf32>
    %168 = vector.shape_cast %167 : vector<1x24x128xf32> to vector<24x128xf32>
    %169 = vector.shape_cast %166 : vector<24x128xf32> to vector<1x24x128xf32>
    tpu.vector_store %arg23[%c0_149, %c0_150, %c0_151], %169 {strides = array<i32>} : memref<1x24x128xf32, #tpu.memory_space<vmem>>, vector<1x24x128xf32>,
    %cst_152 = arith.constant 0.000000e+00 : f32
    %170 = vector.broadcast %cst_152 : f32 to vector<8x384xf32>
    %c24_153 = arith.constant 24 : index
    %c0_154 = arith.constant 0 : index
    %171 = vector.load %arg26[%c24_153, %c0_154] : memref<40x384xf32, #tpu.memory_space<vmem>>, vector<8x384xf32>
    tpu.vector_store %arg26[%c24_153, %c0_154], %170 {strides = array<i32>} : memref<40x384xf32, #tpu.memory_space<vmem>>, vector<8x384xf32>,
    %c8_155 = arith.constant 8 : index
    %c0_156 = arith.constant 0 : index
    %172 = vector.load %arg26[%c8_155, %c0_156] : memref<40x384xf32, #tpu.memory_space<vmem>>, vector<16x384xf32>
    tpu.vector_store %arg26[%c8_155, %c0_156], %96 {strides = array<i32>} : memref<40x384xf32, #tpu.memory_space<vmem>>, vector<16x384xf32>,
    %c6_157 = arith.constant 6 : index
    %c0_158 = arith.constant 0 : index
    %173 = vector.load %arg26[%c6_157, %c0_158] : memref<40x384xf32, #tpu.memory_space<vmem>>, vector<16x384xf32>
    %174 = arith.truncf %173 : vector<16x384xf32> to vector<16x384xbf16>
    %c0_159 = arith.constant 0 : index
    %c0_160 = arith.constant 0 : index
    %175 = vector.load %arg15[%c0_159, %c0_160] : memref<1920x128xbf16, #tpu.memory_space<vmem>>, vector<384x128xbf16>
    %cst_161 = arith.constant dense<0.000000e+00> : vector<16x128xf32>
    %176 = tpu.matmul %174, %175, %cst_161 {dimension_numbers = #tpu.dot_dimension_numbers<[1], [0], [0], [1], [0, 0, 1, 1], [], []>} : vector<16x384xbf16>, vector<384x128xbf16>, vector<16x128xf32> -> vector<16x128xf32>
    %c7_162 = arith.constant 7 : index
    %c0_163 = arith.constant 0 : index
    %177 = vector.load %arg26[%c7_162, %c0_163] : memref<40x384xf32, #tpu.memory_space<vmem>>, vector<16x384xf32>
    %178 = arith.truncf %177 : vector<16x384xf32> to vector<16x384xbf16>
    %c384_164 = arith.constant 384 : index
    %c0_165 = arith.constant 0 : index
    %179 = vector.load %arg15[%c384_164, %c0_165] : memref<1920x128xbf16, #tpu.memory_space<vmem>>, vector<384x128xbf16>
    %cst_166 = arith.constant dense<0.000000e+00> : vector<16x128xf32>
    %180 = tpu.matmul %178, %179, %cst_166 {dimension_numbers = #tpu.dot_dimension_numbers<[1], [0], [0], [1], [0, 0, 1, 1], [], []>} : vector<16x384xbf16>, vector<384x128xbf16>, vector<16x128xf32> -> vector<16x128xf32>
    %181 = arith.addf %176, %180 : vector<16x128xf32>
    %c8_167 = arith.constant 8 : index
    %c0_168 = arith.constant 0 : index
    %182 = vector.load %arg26[%c8_167, %c0_168] : memref<40x384xf32, #tpu.memory_space<vmem>>, vector<16x384xf32>
    %183 = arith.truncf %182 : vector<16x384xf32> to vector<16x384xbf16>
    %c768_169 = arith.constant 768 : index
    %c0_170 = arith.constant 0 : index
    %184 = vector.load %arg15[%c768_169, %c0_170] : memref<1920x128xbf16, #tpu.memory_space<vmem>>, vector<384x128xbf16>
    %cst_171 = arith.constant dense<0.000000e+00> : vector<16x128xf32>
    %185 = tpu.matmul %183, %184, %cst_171 {dimension_numbers = #tpu.dot_dimension_numbers<[1], [0], [0], [1], [0, 0, 1, 1], [], []>} : vector<16x384xbf16>, vector<384x128xbf16>, vector<16x128xf32> -> vector<16x128xf32>
    %186 = arith.addf %181, %185 : vector<16x128xf32>
    %c9_172 = arith.constant 9 : index
    %c0_173 = arith.constant 0 : index
    %187 = vector.load %arg26[%c9_172, %c0_173] : memref<40x384xf32, #tpu.memory_space<vmem>>, vector<16x384xf32>
    %188 = arith.truncf %187 : vector<16x384xf32> to vector<16x384xbf16>
    %c1152_174 = arith.constant 1152 : index
    %c0_175 = arith.constant 0 : index
    %189 = vector.load %arg15[%c1152_174, %c0_175] : memref<1920x128xbf16, #tpu.memory_space<vmem>>, vector<384x128xbf16>
    %cst_176 = arith.constant dense<0.000000e+00> : vector<16x128xf32>
    %190 = tpu.matmul %188, %189, %cst_176 {dimension_numbers = #tpu.dot_dimension_numbers<[1], [0], [0], [1], [0, 0, 1, 1], [], []>} : vector<16x384xbf16>, vector<384x128xbf16>, vector<16x128xf32> -> vector<16x128xf32>
    %191 = arith.addf %186, %190 : vector<16x128xf32>
    %c10_177 = arith.constant 10 : index
    %c0_178 = arith.constant 0 : index
    %192 = vector.load %arg26[%c10_177, %c0_178] : memref<40x384xf32, #tpu.memory_space<vmem>>, vector<16x384xf32>
    %193 = arith.truncf %192 : vector<16x384xf32> to vector<16x384xbf16>
    %c1536_179 = arith.constant 1536 : index
    %c0_180 = arith.constant 0 : index
    %194 = vector.load %arg15[%c1536_179, %c0_180] : memref<1920x128xbf16, #tpu.memory_space<vmem>>, vector<384x128xbf16>
    %cst_181 = arith.constant dense<0.000000e+00> : vector<16x128xf32>
    %195 = tpu.matmul %193, %194, %cst_181 {dimension_numbers = #tpu.dot_dimension_numbers<[1], [0], [0], [1], [0, 0, 1, 1], [], []>} : vector<16x384xbf16>, vector<384x128xbf16>, vector<16x128xf32> -> vector<16x128xf32>
    %196 = arith.addf %191, %195 : vector<16x128xf32>
    %c0_182 = arith.constant 0 : index
    %c0_183 = arith.constant 0 : index
    %197 = vector.load %arg16[%c0_182, %c0_183] : memref<1x128xf32, #tpu.memory_space<vmem>>, vector<1x128xf32>
    %198 = vector.broadcast %197 : vector<1x128xf32> to vector<16x128xf32>
    %199 = arith.addf %196, %198 : vector<16x128xf32>
    %cst_184 = arith.constant 2.000000e-01 : f32
    %200 = vector.broadcast %cst_184 : f32 to vector<16x128xf32>
    %201 = arith.mulf %200, %199 : vector<16x128xf32>
    %202 = arith.maximumf %199, %201 : vector<16x128xf32>
    %c0_185 = arith.constant 0 : index
    %c0_186 = arith.constant 0 : index
    %c0_187 = arith.constant 0 : index
    %203 = vector.load %arg24[%c0_185, %c0_186, %c0_187] : memref<1x16x128xf32, #tpu.memory_space<vmem>>, vector<1x16x128xf32>
    %204 = vector.shape_cast %203 : vector<1x16x128xf32> to vector<16x128xf32>
    %205 = vector.shape_cast %202 : vector<16x128xf32> to vector<1x16x128xf32>
    tpu.vector_store %arg24[%c0_185, %c0_186, %c0_187], %205 {strides = array<i32>} : memref<1x16x128xf32, #tpu.memory_space<vmem>>, vector<1x16x128xf32>,
    %c8_188 = arith.constant 8 : index
    %c0_189 = arith.constant 0 : index
    %206 = vector.load %arg26[%c8_188, %c0_189] : memref<40x384xf32, #tpu.memory_space<vmem>>, vector<16x128xf32>
    tpu.vector_store %arg26[%c8_188, %c0_189], %202 {strides = array<i32>} : memref<40x384xf32, #tpu.memory_space<vmem>>, vector<16x128xf32>,
    %c7_190 = arith.constant 7 : index
    %c0_191 = arith.constant 0 : index
    %207 = vector.load %arg26[%c7_190, %c0_191] : memref<40x384xf32, #tpu.memory_space<vmem>>, vector<16x128xf32>
    %208 = arith.truncf %207 : vector<16x128xf32> to vector<16x128xbf16>
    %c0_192 = arith.constant 0 : index
    %c0_193 = arith.constant 0 : index
    %209 = vector.load %arg17[%c0_192, %c0_193] : memref<384x128xbf16, #tpu.memory_space<vmem>>, vector<128x128xbf16>
    %cst_194 = arith.constant dense<0.000000e+00> : vector<16x128xf32>
    %210 = tpu.matmul %208, %209, %cst_194 {dimension_numbers = #tpu.dot_dimension_numbers<[1], [0], [0], [1], [0, 0, 1, 1], [], []>} : vector<16x128xbf16>, vector<128x128xbf16>, vector<16x128xf32> -> vector<16x128xf32>
    %c8_195 = arith.constant 8 : index
    %c0_196 = arith.constant 0 : index
    %211 = vector.load %arg26[%c8_195, %c0_196] : memref<40x384xf32, #tpu.memory_space<vmem>>, vector<16x128xf32>
    %212 = arith.truncf %211 : vector<16x128xf32> to vector<16x128xbf16>
    %c128_197 = arith.constant 128 : index
    %c0_198 = arith.constant 0 : index
    %213 = vector.load %arg17[%c128_197, %c0_198] : memref<384x128xbf16, #tpu.memory_space<vmem>>, vector<128x128xbf16>
    %cst_199 = arith.constant dense<0.000000e+00> : vector<16x128xf32>
    %214 = tpu.matmul %212, %213, %cst_199 {dimension_numbers = #tpu.dot_dimension_numbers<[1], [0], [0], [1], [0, 0, 1, 1], [], []>} : vector<16x128xbf16>, vector<128x128xbf16>, vector<16x128xf32> -> vector<16x128xf32>
    %215 = arith.addf %210, %214 : vector<16x128xf32>
    %c9_200 = arith.constant 9 : index
    %c0_201 = arith.constant 0 : index
    %216 = vector.load %arg26[%c9_200, %c0_201] : memref<40x384xf32, #tpu.memory_space<vmem>>, vector<16x128xf32>
    %217 = arith.truncf %216 : vector<16x128xf32> to vector<16x128xbf16>
    %c256_202 = arith.constant 256 : index
    %c0_203 = arith.constant 0 : index
    %218 = vector.load %arg17[%c256_202, %c0_203] : memref<384x128xbf16, #tpu.memory_space<vmem>>, vector<128x128xbf16>
    %cst_204 = arith.constant dense<0.000000e+00> : vector<16x128xf32>
    %219 = tpu.matmul %217, %218, %cst_204 {dimension_numbers = #tpu.dot_dimension_numbers<[1], [0], [0], [1], [0, 0, 1, 1], [], []>} : vector<16x128xbf16>, vector<128x128xbf16>, vector<16x128xf32> -> vector<16x128xf32>
    %220 = arith.addf %215, %219 : vector<16x128xf32>
    %c0_205 = arith.constant 0 : index
    %c0_206 = arith.constant 0 : index
    %221 = vector.load %arg18[%c0_205, %c0_206] : memref<1x128xf32, #tpu.memory_space<vmem>>, vector<1x128xf32>
    %222 = vector.broadcast %221 : vector<1x128xf32> to vector<16x128xf32>
    %223 = arith.addf %220, %222 : vector<16x128xf32>
    %cst_207 = arith.constant 2.000000e-01 : f32
    %224 = vector.broadcast %cst_207 : f32 to vector<16x128xf32>
    %225 = arith.mulf %224, %223 : vector<16x128xf32>
    %226 = arith.maximumf %223, %225 : vector<16x128xf32>
    %c0_208 = arith.constant 0 : index
    %c0_209 = arith.constant 0 : index
    %c0_210 = arith.constant 0 : index
    %227 = vector.load %arg25[%c0_208, %c0_209, %c0_210] : memref<1x16x128xf32, #tpu.memory_space<vmem>>, vector<1x16x128xf32>
    %228 = vector.shape_cast %227 : vector<1x16x128xf32> to vector<16x128xf32>
    %229 = vector.shape_cast %226 : vector<16x128xf32> to vector<1x16x128xf32>
    tpu.vector_store %arg25[%c0_208, %c0_209, %c0_210], %229 {strides = array<i32>} : memref<1x16x128xf32, #tpu.memory_space<vmem>>, vector<1x16x128xf32>,
    return
  }
  func.func @transform_0(%arg0: i32) -> (i32, i32, i32) {
    %c0_i32 = arith.constant 0 : i32
    %c0_i32_0 = arith.constant 0 : i32
    %c0_i32_1 = arith.constant 0 : i32
    return %arg0, %c0_i32, %c0_i32_0 : i32, i32, i32
  }
  func.func @transform_1(%arg0: i32) -> (i32, i32, i32) {
    %c0_i32 = arith.constant 0 : i32
    %c0_i32_0 = arith.constant 0 : i32
    %c0_i32_1 = arith.constant 0 : i32
    return %arg0, %c0_i32, %c0_i32_0 : i32, i32, i32
  }
  func.func @transform_2(%arg0: i32) -> (i32, i32) {
    %c0_i32 = arith.constant 0 : i32
    %c0_i32_0 = arith.constant 0 : i32
    %c0_i32_1 = arith.constant 0 : i32
    return %c0_i32, %c0_i32_0 : i32, i32
  }
  func.func @transform_3(%arg0: i32) -> (i32, i32) {
    %c0_i32 = arith.constant 0 : i32
    %c0_i32_0 = arith.constant 0 : i32
    %c0_i32_1 = arith.constant 0 : i32
    return %c0_i32, %c0_i32_0 : i32, i32
  }
  func.func @transform_4(%arg0: i32) -> (i32, i32) {
    %c0_i32 = arith.constant 0 : i32
    %c0_i32_0 = arith.constant 0 : i32
    %c0_i32_1 = arith.constant 0 : i32
    return %c0_i32, %c0_i32_0 : i32, i32
  }
  func.func @transform_5(%arg0: i32) -> (i32, i32) {
    %c0_i32 = arith.constant 0 : i32
    %c0_i32_0 = arith.constant 0 : i32
    %c0_i32_1 = arith.constant 0 : i32
    return %c0_i32, %c0_i32_0 : i32, i32
  }
  func.func @transform_6(%arg0: i32) -> (i32, i32) {
    %c0_i32 = arith.constant 0 : i32
    %c0_i32_0 = arith.constant 0 : i32
    %c0_i32_1 = arith.constant 0 : i32
    return %c0_i32, %c0_i32_0 : i32, i32
  }
  func.func @transform_7(%arg0: i32) -> (i32, i32) {
    %c0_i32 = arith.constant 0 : i32
    %c0_i32_0 = arith.constant 0 : i32
    %c0_i32_1 = arith.constant 0 : i32
    return %c0_i32, %c0_i32_0 : i32, i32
  }
  func.func @transform_8(%arg0: i32) -> (i32, i32) {
    %c0_i32 = arith.constant 0 : i32
    %c0_i32_0 = arith.constant 0 : i32
    %c0_i32_1 = arith.constant 0 : i32
    return %c0_i32, %c0_i32_0 : i32, i32
  }
  func.func @transform_9(%arg0: i32) -> (i32, i32) {
    %c0_i32 = arith.constant 0 : i32
    %c0_i32_0 = arith.constant 0 : i32
    %c0_i32_1 = arith.constant 0 : i32
    return %c0_i32, %c0_i32_0 : i32, i32
  }
  func.func @transform_10(%arg0: i32) -> (i32, i32) {
    %c0_i32 = arith.constant 0 : i32
    %c0_i32_0 = arith.constant 0 : i32
    %c0_i32_1 = arith.constant 0 : i32
    return %c0_i32, %c0_i32_0 : i32, i32
  }
  func.func @transform_11(%arg0: i32) -> (i32, i32) {
    %c0_i32 = arith.constant 0 : i32
    %c0_i32_0 = arith.constant 0 : i32
    %c0_i32_1 = arith.constant 0 : i32
    return %c0_i32, %c0_i32_0 : i32, i32
  }
  func.func @transform_12(%arg0: i32) -> (i32, i32) {
    %c0_i32 = arith.constant 0 : i32
    %c0_i32_0 = arith.constant 0 : i32
    %c0_i32_1 = arith.constant 0 : i32
    return %c0_i32, %c0_i32_0 : i32, i32
  }
  func.func @transform_13(%arg0: i32) -> (i32, i32) {
    %c0_i32 = arith.constant 0 : i32
    %c0_i32_0 = arith.constant 0 : i32
    %c0_i32_1 = arith.constant 0 : i32
    return %c0_i32, %c0_i32_0 : i32, i32
  }
  func.func @transform_14(%arg0: i32) -> (i32, i32) {
    %c0_i32 = arith.constant 0 : i32
    %c0_i32_0 = arith.constant 0 : i32
    %c0_i32_1 = arith.constant 0 : i32
    return %c0_i32, %c0_i32_0 : i32, i32
  }
  func.func @transform_15(%arg0: i32) -> (i32, i32) {
    %c0_i32 = arith.constant 0 : i32
    %c0_i32_0 = arith.constant 0 : i32
    %c0_i32_1 = arith.constant 0 : i32
    return %c0_i32, %c0_i32_0 : i32, i32
  }
  func.func @transform_16(%arg0: i32) -> (i32, i32) {
    %c0_i32 = arith.constant 0 : i32
    %c0_i32_0 = arith.constant 0 : i32
    %c0_i32_1 = arith.constant 0 : i32
    return %c0_i32, %c0_i32_0 : i32, i32
  }
  func.func @transform_17(%arg0: i32) -> (i32, i32) {
    %c0_i32 = arith.constant 0 : i32
    %c0_i32_0 = arith.constant 0 : i32
    %c0_i32_1 = arith.constant 0 : i32
    return %c0_i32, %c0_i32_0 : i32, i32
  }
  func.func @transform_18(%arg0: i32) -> (i32, i32, i32) {
    %c0_i32 = arith.constant 0 : i32
    %c0_i32_0 = arith.constant 0 : i32
    %c0_i32_1 = arith.constant 0 : i32
    return %arg0, %c0_i32, %c0_i32_0 : i32, i32, i32
  }
  func.func @transform_19(%arg0: i32) -> (i32, i32, i32) {
    %c0_i32 = arith.constant 0 : i32
    %c0_i32_0 = arith.constant 0 : i32
    %c0_i32_1 = arith.constant 0 : i32
    return %arg0, %c0_i32, %c0_i32_0 : i32, i32, i32
  }
  func.func @transform_20(%arg0: i32) -> (i32, i32, i32) {
    %c0_i32 = arith.constant 0 : i32
    %c0_i32_0 = arith.constant 0 : i32
    %c0_i32_1 = arith.constant 0 : i32
    return %arg0, %c0_i32, %c0_i32_0 : i32, i32, i32
  }
  func.func @transform_21(%arg0: i32) -> (i32, i32, i32) {
    %c0_i32 = arith.constant 0 : i32
    %c0_i32_0 = arith.constant 0 : i32
    %c0_i32_1 = arith.constant 0 : i32
    return %arg0, %c0_i32, %c0_i32_0 : i32, i32, i32
  }
  func.func @transform_22(%arg0: i32) -> (i32, i32, i32) {
    %c0_i32 = arith.constant 0 : i32
    %c0_i32_0 = arith.constant 0 : i32
    %c0_i32_1 = arith.constant 0 : i32
    return %arg0, %c0_i32, %c0_i32_0 : i32, i32, i32
  }
  func.func @transform_23(%arg0: i32) -> (i32, i32, i32) {
    %c0_i32 = arith.constant 0 : i32
    %c0_i32_0 = arith.constant 0 : i32
    %c0_i32_1 = arith.constant 0 : i32
    return %arg0, %c0_i32, %c0_i32_0 : i32, i32, i32
  }
  func.func @transform_24(%arg0: i32) -> (i32, i32, i32) {
    %c0_i32 = arith.constant 0 : i32
    %c0_i32_0 = arith.constant 0 : i32
    %c0_i32_1 = arith.constant 0 : i32
    return %arg0, %c0_i32, %c0_i32_0 : i32, i32, i32
  }
}

</mosaic_0001>

<bundles_post_ra>
// kernel: jcu_forward.1
= control target key start
LH: loop header
LB: loop body
LE: loop exit
PB: predicated region body
PF: predicated region fallthrough
CT: control target
= control target key end

     0   :  { %s12197_s0 = inlined_call_operand.vmem [shape: f32[2,16,128], index: 0, kind: input, shape index: {}]   ;;  %s12198_s1 = inlined_call_operand.vmem [shape: f32[2,8,384], index: 1, kind: input, shape index: {}]   ;;  %s12199_s2 = inlined_call_operand.hbm [shape: bf16[384,128], index: 2, kind: input, shape index: {}]   ;;  %s12200_s3 = inlined_call_operand.vmem [shape: f32[1,128], index: 3, kind: input, shape index: {}]   ;;  %s12201_s4 = inlined_call_operand.hbm [shape: bf16[640,128], index: 4, kind: input, shape index: {}]   ;;  %s12202_s5 = inlined_call_operand.vmem [shape: f32[1,128], index: 5, kind: input, shape index: {}]   ;;  %s12203_s6 = inlined_call_operand.hbm [shape: bf16[640,384], index: 6, kind: input, shape index: {}]   ;;  %s12204_s7 = inlined_call_operand.vmem [shape: f32[1,384], index: 7, kind: input, shape index: {}]   ;;  %s12205_s8 = inlined_call_operand.hbm [shape: bf16[384,384], index: 8, kind: input, shape index: {}]   ;;  %s12206_s9 = inlined_call_operand.vmem [shape: f32[1,384], index: 9, kind: input, shape index: {}]   ;;  %s12207_s10 = inlined_call_operand.hbm [shape: bf16[1920,128], index: 10, kind: input, shape index: {}]   ;;  %s12208_s11 = inlined_call_operand.vmem [shape: f32[1,128], index: 11, kind: input, shape index: {}]   ;;  %s12209_s12 = inlined_call_operand.hbm [shape: bf16[384,128], index: 12, kind: input, shape index: {}]   ;;  %s12210_s13 = inlined_call_operand.vmem [shape: f32[1,128], index: 13, kind: input, shape index: {}]   ;;  %s12211_s14 = inlined_call_operand.hbm [shape: bf16[1920,128], index: 14, kind: input, shape index: {}]   ;;  %s12212_s15 = inlined_call_operand.vmem [shape: f32[1,128], index: 15, kind: input, shape index: {}]   ;;  %s12213_s16 = inlined_call_operand.hbm [shape: bf16[384,128], index: 16, kind: input, shape index: {}]   ;;  %s12214_s17 = inlined_call_operand.vmem [shape: f32[1,128], index: 17, kind: input, shape index: {}]   ;;  %s12215_s18 = inlined_call_operand.vmem [shape: f32[2,16,128], index: 18, kind: output, shape index: {0}]   ;;  %s12216_s19 = inlined_call_operand.vmem [shape: f32[2,16,128], index: 19, kind: output, shape index: {1}]   ;;  %s12217_s20 = inlined_call_operand.hbm [shape: f32[2,16,384], index: 20, kind: output, shape index: {2}]   ;;  %s12218_s21 = inlined_call_operand.vmem [shape: f32[2,24,128], index: 21, kind: output, shape index: {3}]   ;;  %s12219_s22 = inlined_call_operand.vmem [shape: f32[2,24,128], index: 22, kind: output, shape index: {4}]   ;;  %s12220_s23 = inlined_call_operand.vmem [shape: f32[2,16,128], index: 23, kind: output, shape index: {5}]   ;;  %s12221_s24 = inlined_call_operand.vmem [shape: f32[2,16,128], index: 24, kind: output, shape index: {6}]  }
   0x1   :  { %12235 = sst [smem:[#allocation30_spill]] %s12197_s0 }
   0x2   :  { %12236 = sst [smem:[#allocation31_spill]] %s12198_s1 }
   0x3   :  { %12237 = sst [smem:[#allocation32_spill]] %s12199_s2 }
   0x4   :  { %12238 = sst [smem:[#allocation33_spill]] %s12200_s3 }
   0x5   :  { %12239 = sst [smem:[#allocation34_spill]] %s12201_s4 }
   0x6   :  { %12240 = sst [smem:[#allocation35_spill]] %s12202_s5 }
   0x7   :  { %12241 = sst [smem:[#allocation36_spill]] %s12203_s6 }
   0x8   :  { %12242 = sst [smem:[#allocation37_spill]] %s12204_s7 }
   0x9   :  { %12243 = sst [smem:[#allocation38_spill]] %s12205_s8 }
   0xa   :  { %12244 = sst [smem:[#allocation39_spill]] %s12214_s17 }
   0xb   :  { %12245 = sst [smem:[#allocation40_spill]] %s12217_s20 }
   0xc   :  { %12246 = sst [smem:[#allocation41_spill]] %s12221_s24 }
   0xd   :  { %30 = vsyncpa [#allocation4], 0 }
   0xe   :  { %31 = vsyncpa [#allocation7], 0 }
   0xf   :  { %32 = vsyncpa [#allocation10], 0 }
  0x10   :  { %33 = vsyncpa [#allocation13], 0 }
  0x11   :  { %34 = vsyncpa [#allocation16], 0 }
  0x12   :  { %35 = vsyncpa [#allocation5], 0 }
  0x13   :  { %37 = vsyncpa [#allocation5 + $0x1], 0  ;;  %s11327_s5 = smov 0   ;;  %s11329_s26 = smov 0  }
  0x14   :  { %s11331_s27 = smov 0   ;;  %s11333_s28 = smov 0  }
  0x15 LB: > { %12247 = sst [smem:[#allocation24_spill]] %s11170_s5  ;;  %s11348_s6 = sadd.s32 4294967295, %s11182_s28   ;;  %s11182_s28 = sphi %s11333_s28, %s12287_s28   ;;  %s11178_s27 = sphi %s11331_s27, %s12289_s27   ;;  %s11174_s26 = sphi %s11329_s26, %s12291_s26   ;;  %s11170_s5 = sphi %s11327_s5, %s12290_s5  }
  0x16   : > { %12248 = sst [smem:[#allocation25_spill]] %s11178_s27  ;;  %s8404_s2 = sadd.s32 4294967294, %s11182_s28  }
  0x17   : > { %12249 = sst [smem:[#allocation26_spill]] %s11182_s28  ;;  %s11352_s29 = sadd.s32 1, %s11182_s28  }
  0x18   : > { %12250 = sst [smem:[#allocation27_spill]] %s11352_s29  ;;  %s490_s0 = sadd.s32 1, %s11178_s27 }
  0x19   : > { %s487_s7 = ssub.s32 %s11182_s28, %s11352_s29  ;;  %p500_p0 = scmp.ne.s32.totalorder %s11178_s27, %s11174_s26 }
  0x1a   : > { %p488_p1 = scmp.eq.s32.totalorder %s487_s7, 0  ;;  %p501_p2 = scmp.eq.s32.totalorder %s11348_s6, 1 }
  0x1b   : > { %p506_p3 = scmp.ne.s32.totalorder %s11174_s26, %s11170_s5  ;;  %p507_p4 = scmp.eq.s32.totalorder %s8404_s2, 1 }
  0x1c   : > { %s11363_s30 = scalar_select %p488_p1, %s11178_s27, %s490_s0  }
  0x1d   : > { %p11365_p5 = por %p501_p2, %p500_p0  ;;  %p11369_p6 = por %p507_p4, %p506_p3 }
  0x1e   : > { %12251 = sst [smem:[#allocation28_spill]] %s11363_s30  ;;  %p8405_p7 = scmp.ge.s32.totalorder %s11182_s28, 1 }
  0x1f   : > { %s12253_s25 = scalar_select %p11369_p6, 1, 0 }
  0x20   : > { %p618_p8 = scmp.lt.s32.totalorder %s11182_s28, 3  ;;  %p12230_p9 = scmp.eq.s32.totalorder %s11348_s6, 0 }
  0x21   : > { %12254 = sst [smem:[#allocation29_spill]] %s12253_s25  ;;  %s11184_s4 = smov [#allocation6]  }
  0x22   : > { %p11376_p10 = pnand %p8405_p7, %p618_p8  ;;  %s646_s1 = sshll.u32 %s11184_s4, 4  ;;  %s647_s1 = int_to_ptr.vmem [resolvable:$true] %s646_s1 }
  0x23   : > { %s11185_s0 = smov [#allocation9]   ;;  %s10905_s27 = scalar_lea.vmem %s647_s1, 5120 }
  0x24   : > { %p10182_p11 = pneg %p11376_p10  ;;  %s678_s7 = sshll.u32 %s11185_s0, 4  ;;  %s679_s7 = int_to_ptr.vmem [resolvable:$true] %s678_s7 }
  0x25   : > { %p10906_p0 = scmp.ne.s32.totalorder %s647_s1, %s10905_s27  ;;  %p10913_p3 = scmp.lt.s32.totalorder %s647_s1, %s647_s1 }
  0x26   : > { %p11384_p12 = pnand %p12230_p9, %p10182_p11  ;;  %p10914_p4 = scmp.lt.s32.totalorder %s10905_s27, %s10905_s27 }
  0x28   : > { %p11390_p13 = pneg %p11384_p12  ;;  %p10915_p7 = por %p10914_p4, %p10913_p3 }
  0x2a   : > { %p10908_p1 = pnand %p10906_p0, %p11390_p13 }
  0x2c   : > { %p10909_p2 = pneg %p10908_p1 }
  0x2e   : > { %p10916_p8 = pnand %p10915_p7, %p10909_p2 }
  0x30   : > { %10919 = shalt.err (!%p10916_p8)
}
  0x31   : > { %s12231_s4 = smov 64   ;;  %s12233_s0 = smov 4  }
  0x32   : > { %s12258_s5 = sld [smem:[#allocation34_spill]]  ;;  %s11188_s28 = smov [#allocation12]  }
  0x33   : > { %s710_s24 = sshll.u32 %s11188_s28, 4  ;;  %s10931_s17 = scalar_lea.vmem %s679_s7, 9216  ;;  %s711_s24 = int_to_ptr.vmem [resolvable:$true] %s710_s24 }
  0x34   : > { %p10932_p11 = scmp.ne.s32.totalorder %s679_s7, %s10931_s17  ;;  %p10939_p2 = scmp.lt.s32.totalorder %s679_s7, %s679_s7 }
  0x35   : > { %p10940_p3 = scmp.lt.s32.totalorder %s10931_s17, %s10931_s17 }
  0x36   : > { %p10934_p0 = pnand %p10932_p11, %p11390_p13 }
  0x37   : > { %p10941_p4 = por %p10940_p3, %p10939_p2 }
  0x38   : > { %10188 = dma.hbm_to_vmem [thread:$0]  (!%p11384_p12), %s12258_s5, 5120, %s647_s1, [#allocation7], %s12231_s4, %s12231_s4, %s12233_s0  }
  0x39   : > { %p10935_p1 = pneg %p10934_p0 }
  0x3b   : > { %p10942_p7 = pnand %p10941_p4, %p10935_p1 }
  0x3d   : > { %10945 = shalt.err (!%p10942_p7)
}
  0x3e   : > { %s12229_s27 = smov 192   ;;  %s11190_s20 = smov 12  }
  0x3f   : > { %s12259_s29 = sld [smem:[#allocation38_spill]]  ;;  %s10957_s25 = scalar_lea.vmem %s711_s24, 3072 }
  0x40   : > { %p10958_p8 = scmp.ne.s32.totalorder %s711_s24, %s10957_s25  ;;  %p10965_p1 = scmp.lt.s32.totalorder %s711_s24, %s711_s24 }
  0x41   : > { %p10966_p2 = scmp.lt.s32.totalorder %s10957_s25, %s10957_s25 }
  0x42   : > { %p10960_p11 = pnand %p10958_p8, %p11390_p13 }
  0x43   : > { %p10967_p3 = por %p10966_p2, %p10965_p1 }
  0x44   : > { %p10961_p0 = pneg %p10960_p11 }
  0x45   : > { %10194 = dma.hbm_to_vmem [thread:$0]  (!%p11384_p12), %s12259_s29, 9216, %s679_s7, [#allocation10], %s12229_s27, %s12229_s27, %s11190_s20  }
  0x46   : > { %p10968_p4 = pnand %p10967_p3, %p10961_p0 }
  0x48   : > { %10971 = shalt.err (!%p10968_p4)
}
  0x49   : > { %10200 = dma.hbm_to_vmem [thread:$0]  (!%p11384_p12), %s12209_s12, 3072, %s711_s24, [#allocation13], %s12231_s4, %s12231_s4, %s12233_s0  }
  0x4a   : > { %s11191_s7 = smov [#allocation3]   ;;  %s11192_s28 = smov [#allocation8]  }
  0x4b   : > { %s630_s5 = sshll.u32 %s11191_s7, 4  ;;  %s662_s29 = sshll.u32 %s11192_s28, 4  ;;  %s631_s5 = int_to_ptr.vmem [resolvable:$true] %s630_s5  ;;  %s663_s29 = int_to_ptr.vmem [resolvable:$true] %s662_s29 }
  0x4c   : > { %s10983_s27 = scalar_lea.vmem %s631_s5, 3072  ;;  %p10991_p0 = scmp.lt.s32.totalorder %s631_s5, %s631_s5 }
  0x4d   : > { %p10984_p7 = scmp.ne.s32.totalorder %s631_s5, %s10983_s27  ;;  %p10992_p1 = scmp.lt.s32.totalorder %s10983_s27, %s10983_s27 }
  0x4f   : > { %p10986_p8 = pnand %p10984_p7, %p11390_p13  ;;  %p10993_p2 = por %p10992_p1, %p10991_p0 }
  0x51   : > { %p10987_p11 = pneg %p10986_p8 }
  0x53   : > { %p10994_p3 = pnand %p10993_p2, %p10987_p11 }
  0x55   : > { %10997 = shalt.err (!%p10994_p3)
}
  0x56   : > { %s12260_s17 = sld [smem:[#allocation32_spill]]  ;;  %s11009_s1 = scalar_lea.vmem %s663_s29, 15360 }
  0x57   : > { %p11010_p4 = scmp.ne.s32.totalorder %s663_s29, %s11009_s1  ;;  %p11017_p9 = scmp.lt.s32.totalorder %s663_s29, %s663_s29 }
  0x58   : > { %p11018_p0 = scmp.lt.s32.totalorder %s11009_s1, %s11009_s1 }
  0x59   : > { %p11012_p7 = pnand %p11010_p4, %p11390_p13 }
  0x5a   : > { %p11019_p11 = por %p11018_p0, %p11017_p9 }
  0x5b   : > { %p11013_p8 = pneg %p11012_p7 }
  0x5c   : > { %10185 = dma.hbm_to_vmem [thread:$0]  (!%p11384_p12), %s12260_s17, 3072, %s631_s5, [#allocation4], %s12231_s4, %s12231_s4, %s12233_s0  }
  0x5d   : > { %p11020_p1 = pnand %p11019_p11, %p11013_p8 }
  0x5f   : > { %11023 = shalt.err (!%p11020_p1)
}
  0x60   : > { %s12261_s27 = smov 192   ;;  %s12262_s24 = sld [smem:[#allocation36_spill]] }
  0x61   : > { %s11193_s5 = smov [#allocation11]   ;;  %s11194_s17 = smov [#allocation14]  }
  0x62   : > { %s694_s25 = sshll.u32 %s11193_s5, 4  ;;  %s726_s4 = sshll.u32 %s11194_s17, 4  ;;  %s695_s25 = int_to_ptr.vmem [resolvable:$true] %s694_s25  ;;  %s727_s4 = int_to_ptr.vmem [resolvable:$true] %s726_s4 }
  0x63   : > { %s11035_s0 = scalar_lea.vmem %s695_s25, 15360  ;;  %p11043_p4 = scmp.lt.s32.totalorder %s695_s25, %s695_s25 }
  0x64   : > { %p11036_p2 = scmp.ne.s32.totalorder %s695_s25, %s11035_s0  ;;  %p11044_p7 = scmp.lt.s32.totalorder %s11035_s0, %s11035_s0 }
  0x66   : > { %10191 = dma.hbm_to_vmem [thread:$0]  (!%p11384_p12), %s12262_s24, 15360, %s663_s29, [#allocation7], %s12261_s27, %s12261_s27, %s11190_s20  }
  0x67   : > { %p11038_p9 = pnand %p11036_p2, %p11390_p13  ;;  %p11045_p8 = por %p11044_p7, %p11043_p4 }
  0x69   : > { %p11039_p3 = pneg %p11038_p9 }
  0x6b   : > { %p11046_p0 = pnand %p11045_p8, %p11039_p3 }
  0x6d   : > { %11049 = shalt.err (!%p11046_p0)
}
  0x6e   : > { %s12263_s1 = smov 4   ;;  %s12264_s7 = smov 64  }
  0x6f   : > { %10197 = dma.hbm_to_vmem [thread:$0]  (!%p11384_p12), %s12207_s10, 15360, %s695_s25, [#allocation10], %s12264_s7, %s12264_s7, %s12263_s1  }
  0x70   : > { %s11061_s27 = scalar_lea.vmem %s727_s4, 15360  ;;  %p11069_p9 = scmp.lt.s32.totalorder %s727_s4, %s727_s4 }
  0x71   : > { %p11062_p11 = scmp.ne.s32.totalorder %s727_s4, %s11061_s27  ;;  %p11070_p4 = scmp.lt.s32.totalorder %s11061_s27, %s11061_s27 }
  0x73   : > { %p11064_p1 = pnand %p11062_p11, %p11390_p13  ;;  %p11071_p3 = por %p11070_p4, %p11069_p9 }
  0x75   : > { %p11065_p2 = pneg %p11064_p1 }
  0x77   : > { %p11072_p7 = pnand %p11071_p3, %p11065_p2 }
  0x79   : > { %11075 = shalt.err (!%p11072_p7)
}
  0x7a   : > { %10203 = dma.hbm_to_vmem [thread:$0]  (!%p11384_p12), %s12211_s14, 15360, %s727_s4, [#allocation13], %s12264_s7, %s12264_s7, %s12263_s1  }
  0x7b   : > { %s11195_s24 = smov [#allocation15]  }
  0x7c   : > { %s742_s5 = sshll.u32 %s11195_s24, 4  ;;  %s743_s5 = int_to_ptr.vmem [resolvable:$true] %s742_s5 }
  0x7d   : > { %s11087_s25 = scalar_lea.vmem %s743_s5, 3072  ;;  %p11095_p1 = scmp.lt.s32.totalorder %s743_s5, %s743_s5 }
  0x7e   : > { %p11088_p8 = scmp.ne.s32.totalorder %s743_s5, %s11087_s25  ;;  %p11096_p2 = scmp.lt.s32.totalorder %s11087_s25, %s11087_s25 }
  0x80   : > { %p11090_p0 = pnand %p11088_p8, %p11390_p13  ;;  %p11097_p9 = por %p11096_p2, %p11095_p1 }
  0x82   : > { %p11091_p11 = pneg %p11090_p0 }
  0x84   : > { %p11098_p4 = pnand %p11097_p9, %p11091_p11 }
  0x86   : > { %11101 = shalt.err (!%p11098_p4)
}
  0x87   : > { %10206 = dma.hbm_to_vmem [thread:$0]  (!%p11384_p12), %s12213_s16, 3072, %s743_s5, [#allocation16], %s12264_s7, %s12264_s7, %s12263_s1  }
  0x88   : > { %777 = sbr.rel (%p11376_p10) target bundleno = 2150 (0x866), region = 92  ;;  %p12265_p13 = scmp.eq.s32.totalorder (!%p11376_p10), %s11348_s6, 0 }
  0x8d   : > { %11145 = dma.done.wait (%p12265_p13), [#allocation4], 3072   ;;  %p12266_p3 = pmov %p12265_p13 }
  0x8f   : > { %11147 = vsyncadd (%p12266_p3), [#allocation4], 4294964224  ;;  %p12267_p7 = pmov %p12266_p3 }
  0x90   : > { %p12268_p8 = pmov %p12266_p3 }
  0x91   : > { %11149 = dma.done.wait (%p12267_p7), [#allocation7], 20480  }
  0x92   : > { %11151 = vsyncadd (%p12268_p8), [#allocation7], 4294946816  ;;  %p12269_p0 = pmov %p12266_p3 }
  0x94   : > { %11153 = dma.done.wait (%p12269_p0), [#allocation10], 24576   ;;  %p12270_p12 = pmov %p12269_p0 }
  0x95   : > { %p12271_p10 = pmov %p12269_p0 }
  0x96   : > { %11155 = vsyncadd (%p12270_p12), [#allocation10], 4294942720 }
  0x97   : > { %11157 = dma.done.wait (%p12271_p10), [#allocation13], 18432   ;;  %p12272_p11 = pmov %p12269_p0 }
  0x98   : > { %p12273_p1 = pmov %p12269_p0 }
  0x99   : > { %11159 = vsyncadd (%p12272_p11), [#allocation13], 4294948864 }
  0x9a   : > { %11161 = dma.done.wait (%p12273_p1), [#allocation16], 3072   ;;  %p12274_p2 = pmov %p12269_p0 }
  0x9b   : > { %v11196_v0 = vmov 0.0   ;;  %vm11197_vm0 = vmmov 0   ;;  %v10277_v1 = vld [vmem:[#allocation3 + $0x78] sm:$0xff]   ;;  %v10279_v3 = vld [vmem:[#allocation3 + $0x70] sm:$0xff]   ;;  %p906_p9 = scmp.lt.s32.totalorder %s11348_s6, 1  ;;  %v10281_v5 = vld [vmem:[#allocation3 + $0x68] sm:$0xff]  }
  0x9c   : > { %11163 = vsyncadd (%p12274_p2), [#allocation16], 4294964224  ;;  %9545 = vmatprep.subr.bf16.mxu0 %v11196_v0  ;;  %947 = vst [vmem:[#allocation2 + $0x60] sm:$0xff] %v11196_v0  ;;  %9565 = vmatprep.subr.bf16.mxu1 %v11196_v0  ;;  %v10278_v2 = vld [vmem:[#allocation3 + $0x38] sm:$0xff]   ;;  %v10280_v4 = vld [vmem:[#allocation3 + $0x30] sm:$0xff]   ;;  %s12275_s7 = sld [smem:[#allocation30_spill]] }
  0x9d   : > { %948 = vst [vmem:[#allocation2] sm:$0xff] %v11196_v0  ;;  %949 = vst [vmem:[#allocation2 + $0x20] sm:$0xff] %v11196_v0  ;;  %9561 = vmatprep.mubr.msk.bf16.mxu0 %vm11197_vm0, %v11196_v0  ;;  %9581 = vmatprep.mubr.msk.bf16.mxu1 %vm11197_vm0, %v11196_v0  ;;  %s11513_s30 = scalar_select %p906_p9, %s11348_s6, 1  ;;  %v10282_v6 = vld [vmem:[#allocation3 + $0x28] sm:$0xff]   ;;  %v10283_v7 = vld [vmem:[#allocation3 + $0x60] sm:$0xff]   ;;  %vm1489_vm3 = vcmask 1044480  }
  0x9e   : > { %950 = vst [vmem:[#allocation2 + $0x48] sm:$0xff] %v11196_v0  ;;  %953 = vst [vmem:[#allocation2 + $0x8] sm:$0xff] %v11196_v0  ;;  %9546 = vmatpush3.bf16.msra.mxu0 %v10277_v1  ;;  %9566 = vmatpush3.bf16.msra.mxu1 %v10278_v2  ;;  %v10284_v8 = vld [vmem:[#allocation3 + $0x20] sm:$0xff]   ;;  %v10285_v9 = vld [vmem:[#allocation3 + $0x58] sm:$0xff]   ;;  %vm1088_vm1 = vsmask.f32 4352 }
  0x9f   : > { %954 = vst [vmem:[#allocation2 + $0x18] sm:$0xff] %v11196_v0  ;;  %955 = vst [vmem:[#allocation2 + $0x70] sm:$0xff] %v11196_v0  ;;  %9547 = vmatprep.subr.bf16.mxu0 %v11196_v0  ;;  %9567 = vmatprep.subr.bf16.mxu1 %v11196_v0  ;;  %s11518_s8 = sshll.u32 %s11513_s30, 4  ;;  %v10286_v10 = vld [vmem:[#allocation3 + $0x18] sm:$0xff]   ;;  %v10287_v15 = vld [vmem:[#allocation3 + $0x50] sm:$0xff]   ;;  %s12276_s0 = sld [smem:[#allocation33_spill]] }
  0xa0   : > { %v10288_v16 = vld [vmem:[#allocation3 + $0x10] sm:$0xff]   ;;  %v10289_v17 = vld [vmem:[#allocation3 + $0x48] sm:$0xff]   ;;  %v10291_v21 = vld [vmem:[#allocation3 + $0x40] sm:$0xff]   ;;  %vm1217_vm2 = vsmask.f32 7424  ;;  %s920_s5 = scalar_lea.vmem %s12215_s18, %s11518_s8  ;;  %vm1839_vm4 = vcmask 1046528   ;;  %s940_s27 = scalar_lea.vmem %s12220_s23, %s11518_s8 }
  0xa1   : > { %v10290_v20 = vld [vmem:[#allocation3 + $0x8] sm:$0xff]   ;;  %v10292_v23 = vld [vmem:[#allocation3] sm:$0xff]   ;;  %v10293_v34 = vld [vmem:[#allocation3 + $0xb8] sm:$0xff]   ;;  %s12277_s4 = sld [smem:[#allocation35_spill]]  ;;  %s875_s25 = sand.u32 1, %s11174_s26  }
  0xa2   : > { %9548 = vmatpush3.bf16.msra.mxu0 %v10279_v3  ;;  %9568 = vmatpush3.bf16.msra.mxu1 %v10280_v4  ;;  %s910_s20 = scalar_lea.vmem %s12275_s7, %s11518_s8  ;;  %v10294_v43 = vld [vmem:[#allocation3 + $0xb0] sm:$0xff]   ;;  %v10295_v45 = vld [vmem:[#allocation3 + $0xa8] sm:$0xff]   ;;  %v10296_v46 = vld [vmem:[#allocation3 + $0xa0] sm:$0xff]   ;;  %s925_s7 = scalar_lea.vmem %s12216_s19, %s11518_s8 }
  0xa3   : > { %9549 = vmatprep.subr.bf16.mxu0 %v11196_v0  ;;  %9569 = vmatprep.subr.bf16.mxu1 %v11196_v0  ;;  %v956_v11 = vld [vmem:[%s910_s20] sm:$0xff]  ;;  %v957_v12 = vld [vmem:[%s910_s20 + $0x8] sm:$0xff]  ;;  %v10297_v47 = vld [vmem:[#allocation3 + $0x98] sm:$0xff]   ;;  %s11725_s20 = smul.u32 24, %s11513_s30 }
  0xa4   : > { %v960_v13 = vld [vmem:[#allocation2 + $0x60] sm:$0x80]  ;;  %958 = vst [vmem:[#allocation2 + $0x50] sm:$0xff] %v956_v11  ;;  %959 = vst [vmem:[#allocation2 + $0x10] sm:$0xff] %v957_v12  ;;  %v982_v33 = vpack.c.bf16 %v957_v12, %v956_v11  ;;  %v10298_v48 = vld [vmem:[#allocation3 + $0x90] sm:$0xff]   ;;  %s10145_s17 = smul.u32 48, %s875_s25 }
  0xa5   : > { %v963_v14 = vpack.c.bf16 %v956_v11, %v960_v13  ;;  %v1198_v28 = vld [vmem:[#allocation2 + $0x48] sm:$0x1]  ;;  %v10299_v49 = vld [vmem:[#allocation3 + $0x88] sm:$0xff]   ;;  %v10300_v50 = vld [vmem:[#allocation3 + $0x80] sm:$0xff]   ;;  %s935_s2 = scalar_lea.vmem %s12219_s22, %s11725_s20 }
  0xa6   : > { %9550 = vmatpush3.bf16.msra.mxu0 %v10281_v5  ;;  %9570 = vmatpush3.bf16.msra.mxu1 %v10282_v6  ;;  %v1200_v32 = vpack.c.bf16 %v1198_v28, %v1198_v28  ;;  %v10301_v54 = vld [vmem:[#allocation6 + $0x38] sm:$0xff]   ;;  %v10303_v56 = vld [vmem:[#allocation6 + $0x30] sm:$0xff]   ;;  %v10305_v58 = vld [vmem:[#allocation6 + $0x28] sm:$0xff]  }
  0xa7   : > { %9551 = vmatprep.subr.bf16.mxu0 %v11196_v0  ;;  %9571 = vmatprep.subr.bf16.mxu1 %v11196_v0  ;;  %v1090_v18 = vshrl.u32 %v963_v14, 16  ;;  %v1093_v19 = vshll.u32 %v963_v14, 16  ;;  %v10302_v55 = vld [vmem:[#allocation6 + $0x78] sm:$0xff]   ;;  %v10304_v57 = vld [vmem:[#allocation6 + $0x70] sm:$0xff]   ;;  %v10306_v59 = vld [vmem:[#allocation6 + $0x68] sm:$0xff]  }
  0xa8   : > { %v1226_v40 = vshll.u32 %v1200_v32, 16  ;;  %v10307_v60 = vld [vmem:[#allocation6 + $0x20] sm:$0xff]   ;;  %v11557_v61 = vld [vmem:[#allocation2 + $0x60] sm:$0xff]  ;;  %v10309_v63 = vld [vmem:[#allocation6 + $0x18] sm:$0xff]  }
  0xa9   : > { %v1092_v25 = vrot.slane %v1090_v18, 3  ;;  %v1095_v26 = vrot.slane %v1093_v19, 4  ;;  %v10308_v62 = vld [vmem:[#allocation6 + $0x60] sm:$0xff]   ;;  %v10310_v1 = vld [vmem:[#allocation6 + $0x58] sm:$0xff]   ;;  %v10312_v2 = vld [vmem:[#allocation6 + $0x50] sm:$0xff]  }
  0xaa   : > { %9552 = vmatpush3.bf16.msra.mxu0 %v10283_v7  ;;  %9572 = vmatpush3.bf16.msra.mxu1 %v10284_v8  ;;  %v1228_v52 = vrot.slane %v1226_v40, 1  ;;  %v10313_v3 = vld [vmem:[#allocation6 + $0x8] sm:$0xff]   ;;  %v10315_v5 = vld [vmem:[#allocation6] sm:$0xff]   ;;  %v1694_v7 = vld [vmem:[#allocation2 + $0x48] sm:$0x1] }
  0xab   : > { %9553 = vmatprep.subr.bf16.mxu0 %v11196_v0  ;;  %9573 = vmatprep.subr.bf16.mxu1 %v11196_v0  ;;  %v962_v22 = vld [vmem:[#allocation2 + $0x10] sm:$0x7f]  ;;  %v1096_v36 = vor.u32 %v1095_v26, %v1092_v25  ;;  %v10314_v4 = vld [vmem:[#allocation6 + $0x48] sm:$0xff]   ;;  %v10316_v6 = vld [vmem:[#allocation6 + $0x40] sm:$0xff]   ;;  %v1696_v8 = vpack.c.bf16 %v1694_v7, %v1694_v7 }
  0xac   : > { %v964_v24 = vpack.c.bf16 %v962_v22, %v962_v22  ;;  %v1196_v27 = vld [vmem:[#allocation2 + $0x50] sm:$0xfe]  ;;  %v8461_v18 = vld [vmem:[%s12276_s0] ss:$0 sm:$0xff]  ;;  %v10320_v7 = vld [vmem:[#allocation6 + $0xb0] sm:$0xff]   ;;  %s12278_s0 = sld [smem:[#allocation31_spill]] }
  0xad   : > { %v1199_v29 = vpack.c.bf16 %v957_v12, %v1196_v27  ;;  %v1360_v27 = vld [vmem:[#allocation2 + $0x60] sm:$0x80] }
  0xae   : > { %9554 = vmatpush3.bf16.msra.mxu0 %v10285_v9  ;;  %9574 = vmatpush3.bf16.msra.mxu1 %v10286_v10  ;;  %v1098_v30 = vshrl.u32 %v964_v24, 16  ;;  %v1101_v31 = vshll.u32 %v964_v24, 16  ;;  %v11570_v9 = vshll.u32 %v1696_v8, 16  ;;  %v10321_v8 = vld [vmem:[#allocation6 + $0xe8] sm:$0xff]  }
  0xaf   : > { %9555 = vmatprep.subr.bf16.mxu0 %v11196_v0  ;;  %9575 = vmatprep.subr.bf16.mxu1 %v11196_v0  ;;  %v1221_v35 = vshll.u32 %v1199_v29, 16  ;;  %v1219_v39 = vshrl.u32 %v1199_v29, 16 }
  0xb0   : > { %v1100_v37 = vrot.slane %v1098_v30, 3  ;;  %v1103_v38 = vrot.slane %v1101_v31, 4 }
  0xb1   : > { %v1223_v42 = vrot.slane %v1221_v35, 1 }
  0xb2   : > { %9556 = vmatpush3.bf16.msra.mxu0 %v10287_v15  ;;  %9576 = vmatpush3.bf16.msra.mxu1 %v10288_v16  ;;  %v1104_v41 = vor.u32 %v1103_v38, %v1100_v37  ;;  %v1339_v37 = vld [vmem:[#allocation2 + $0x60] sm:$0xc0]  ;;  %v1723_v38 = vrot.slane %v11570_v9, 1  ;;  %v10336_v9 = vld [vmem:[#allocation6 + $0x120] sm:$0xff]   ;;  %s11732_s28 = scalar_lea.vmem %s12278_s0, %s11725_s20 }
  0xb3   : > { %9557 = vmatprep.subr.bf16.mxu0 %v11196_v0  ;;  %9577 = vmatprep.subr.bf16.mxu1 %v11196_v0  ;;  %v1224_v51 = vor.u32 %v1223_v42, %v1219_v39 }
  0xb4   : > { %v1105_v44 = vsel %vm1088_vm1, %v1096_v36, %v1104_v41 }
  0xb5   : > { %v1229_v53 = vsel %vm1217_vm2, %v1224_v51, %v1228_v52 }
  0xb6   : > { %9558 = vmatpush3.bf16.msra.mxu0 %v10289_v17  ;;  %9578 = vmatpush3.bf16.msra.mxu1 %v10290_v20 }
  0xb7   : > { %9559 = vmatprep.subr.bf16.mxu0 %v11196_v0  ;;  %9579 = vmatprep.subr.bf16.mxu1 %v11196_v0 }
  0xba   : > { %9560 = vmatpush3.bf16.msra.mxu0 %v10291_v21  ;;  %9580 = vmatpush3.bf16.msra.mxu1 %v10292_v23  ;;  %v1818_v23 = vld [vmem:[#allocation2 + $0x48] sm:$0x3] }
  0xbb   : > { %9585 = vmatprep.subr.bf16.mxu0 %v11196_v0  ;;  %9605 = vmatprep.subr.bf16.mxu1 %v11196_v0 }
  0xbd   : > { %9562 = vmatmul.mubr.bf16.vlgmr.msra.gmra.mxu0 %v982_v33  ;;  %9582 = vmatmul.mubr.bf16.vlgmr.msra.gmra.mxu1 %v1105_v44  ;;  %v1820_v33 = vpack.c.bf16 %v1818_v23, %v1818_v23  ;;  %v10333_v23 = vld [vmem:[#allocation6 + $0x138] sm:$0xff]  }
  0xbe   : > { %9586 = vmatpush3.bf16.msra.mxu0 %v10293_v34  ;;  %9601 = vmatprep.mubr.msk.bf16.mxu0 %vm11197_vm0, %v11196_v0 }
  0xbf   : > { %9587 = vmatprep.subr.bf16.mxu0 %v11196_v0  ;;  %9621 = vmatprep.mubr.msk.bf16.mxu1 %vm11197_vm0, %v11196_v0  ;;  %v11587_v39 = vrot.slane %v1820_v33, 1  ;;  %v10343_v33 = vld [vmem:[#allocation8 + $0x16c] ss:$12 sps:$4 sm:$0xff]  }
  0xc0   : > { %9606 = vmatpush3.bf16.msra.mxu1 %v10302_v55 }
  0xc1   : > { %9607 = vmatprep.subr.bf16.mxu1 %v11196_v0 }
  0xc2   : > { %9588 = vmatpush3.bf16.msra.mxu0 %v10294_v43 }
  0xc3   : > { %9589 = vmatprep.subr.bf16.mxu0 %v11196_v0 }
  0xc4   : > { %9608 = vmatpush3.bf16.msra.mxu1 %v10304_v57 }
  0xc5   : > { %9609 = vmatprep.subr.bf16.mxu1 %v11196_v0 }
  0xc6   : > { %9590 = vmatpush3.bf16.msra.mxu0 %v10295_v45 }
  0xc7   : > { %9591 = vmatprep.subr.bf16.mxu0 %v11196_v0 }
  0xc8   : > { %9610 = vmatpush3.bf16.msra.mxu1 %v10306_v59 }
  0xc9   : > { %9611 = vmatprep.subr.bf16.mxu1 %v11557_v61 }
  0xca   : > { %9592 = vmatpush3.bf16.msra.mxu0 %v10296_v46 }
  0xcb   : > { %9593 = vmatprep.subr.bf16.mxu0 %v11196_v0 }
  0xcc   : > { %9612 = vmatpush3.bf16.msra.mxu1 %v10308_v62 }
  0xcd   : > { %9613 = vmatprep.subr.bf16.mxu1 %v11557_v61 }
  0xce   : > { %9594 = vmatpush3.bf16.msra.mxu0 %v10297_v47 }
  0xcf   : > { %9595 = vmatprep.subr.bf16.mxu0 %v11196_v0 }
  0xd0   : > { %9614 = vmatpush3.bf16.msra.mxu1 %v10310_v1 }
  0xd1   : > { %9615 = vmatprep.subr.bf16.mxu1 %v11557_v61 }
  0xd2   : > { %9596 = vmatpush3.bf16.msra.mxu0 %v10298_v48 }
  0xd3   : > { %9597 = vmatprep.subr.bf16.mxu0 %v11196_v0 }
  0xd4   : > { %9616 = vmatpush3.bf16.msra.mxu1 %v10312_v2  ;;  %v10318_v2 = vld [vmem:[#allocation6 + $0xb8] sm:$0xff]  }
  0xd5   : > { %9617 = vmatprep.subr.bf16.mxu1 %v11557_v61 }
  0xd6   : > { %9598 = vmatpush3.bf16.msra.mxu0 %v10299_v49 }
  0xd7   : > { %9599 = vmatprep.subr.bf16.mxu0 %v11196_v0 }
  0xd8   : > { %9618 = vmatpush3.bf16.msra.mxu1 %v10314_v4 }
  0xd9   : > { %9619 = vmatprep.subr.bf16.mxu1 %v11557_v61 }
  0xda   : > { %9600 = vmatpush3.bf16.msra.mxu0 %v10300_v50 }
  0xdb   : > { %9625 = vmatprep.subr.bf16.mxu0 %v11196_v0 }
  0xdc   : > { %9620 = vmatpush3.bf16.msra.mxu1 %v10316_v6 }
  0xdd   : > { %9602 = vmatmul.mubr.bf16.vlgmr.msra.gmra.mxu0 %v1229_v53  ;;  %9645 = vmatprep.subr.bf16.mxu1 %v11557_v61 }
  0xde   : > { %9641 = vmatprep.mubr.msk.bf16.mxu0 %vm11197_vm0, %v11196_v0  ;;  %9626 = vmatpush3.bf16.msra.mxu0 %v10301_v54  ;;  %v10317_v54 = vld [vmem:[#allocation6 + $0xf8] sm:$0xff]  }
  0xdf   : > { %9627 = vmatprep.subr.bf16.mxu0 %v11196_v0 }
  0xe2   : > { %9628 = vmatpush3.bf16.msra.mxu0 %v10303_v56 }
  0xe3   : > { %9629 = vmatprep.subr.bf16.mxu0 %v11196_v0 }
  0xe6   : > { %9630 = vmatpush3.bf16.msra.mxu0 %v10305_v58 }
  0xe7   : > { %9631 = vmatprep.subr.bf16.mxu0 %v11196_v0  ;;  %v10311_v0 = vld [vmem:[#allocation6 + $0x10] sm:$0xff]  }
  0xea   : > { %9632 = vmatpush3.bf16.msra.mxu0 %v10307_v60 }
  0xeb   : > { %9633 = vmatprep.subr.bf16.mxu0 %v11557_v61 }
  0xee   : > { %9634 = vmatpush3.bf16.msra.mxu0 %v10309_v63 }
  0xef   : > { %9635 = vmatprep.subr.bf16.mxu0 %v11557_v61 }
  0xf2   : > { %9636 = vmatpush3.bf16.msra.mxu0 %v10311_v0 }
  0xf3   : > { %9637 = vmatprep.subr.bf16.mxu0 %v11557_v61 }
  0xf6   : > { %9638 = vmatpush3.bf16.msra.mxu0 %v10313_v3  ;;  %v10319_v3 = vld [vmem:[#allocation6 + $0xf0] sm:$0xff]  }
  0xf7   : > { %9639 = vmatprep.subr.bf16.mxu0 %v11557_v61 }
  0xfa   : > { %9640 = vmatpush3.bf16.msra.mxu0 %v10315_v5 }
  0xfb   : > { %9665 = vmatprep.subr.bf16.mxu0 %v11557_v61 }
 0x17d   : > { %v1081_v10 = vpop.f32.mrf.mxu0  ;;  %v1189_v11 = vpop.f32.mrf.mxu1 }
 0x17e   : > { %v1190_v19 = vadd.f32 %v1189_v11, %v1081_v10  ;;  %v10322_v10 = vld [vmem:[#allocation6 + $0xa8] sm:$0xff]   ;;  %v10323_v11 = vld [vmem:[#allocation6 + $0xe0] sm:$0xff]  }
 0x17f   : > { %v9563_v12 = vpop.f32.mrf.mxu0  ;;  %v9583_v13 = vpop.f32.mrf.mxu1 }
 0x180   : > { %v11607_v12 = vld [vmem:[#allocation2 + $0x60] sm:$0xff]  ;;  %v10324_v13 = vld [vmem:[#allocation6 + $0xa0] sm:$0xff]  }
 0x181   : > { %v1084_v14 = vpop.f32.mrf.mxu0  ;;  %v1192_v15 = vpop.f32.mrf.mxu1 }
 0x182   : > { %v1193_v24 = vadd.f32 %v1192_v15, %v1084_v14  ;;  %v10325_v14 = vld [vmem:[#allocation6 + $0xd8] sm:$0xff]   ;;  %v10327_v15 = vld [vmem:[#allocation6 + $0xd0] sm:$0xff]  }
 0x183   : > { %v9564_v16 = vpop.f32.mrf.mxu0  ;;  %v9584_v17 = vpop.f32.mrf.mxu1 }
 0x184   : > { %v10328_v16 = vld [vmem:[#allocation6 + $0x90] sm:$0xff]   ;;  %v10329_v17 = vld [vmem:[#allocation6 + $0xc8] sm:$0xff]  }
 0x19d   : > { %v1313_v20 = vpop.f32.mrf.mxu0 }
 0x19e   : > { %v1320_v21 = vadd.f32 %v1313_v20, %v1190_v19  ;;  %v10331_v19 = vld [vmem:[#allocation6 + $0xc0] sm:$0xff]  }
 0x19f   : > { %v9603_v22 = vpop.f32.mrf.mxu0 }
 0x1a0   : > { %v1329_v25 = vadd.f32 %v8461_v18, %v1320_v21  ;;  %v10332_v21 = vld [vmem:[#allocation6 + $0x80] sm:$0xff]  }
 0x1a1   : > { %v1316_v26 = vpop.f32.mrf.mxu0 }
 0x1a2   : > { %v1331_v28 = vmul.f32 0.2, %v1329_v25  ;;  %v1321_v29 = vadd.f32 %v1316_v26, %v1193_v24  ;;  %v10335_v26 = vld [vmem:[#allocation6 + $0x128] sm:$0xff]  }
 0x1a3   : > { %v9604_v30 = vpop.f32.mrf.mxu0 }
 0x1a4   : > { %v11579_v31 = vmax.f32 %v1329_v25, %v1331_v28  ;;  %v1330_v32 = vadd.f32 %v8461_v18, %v1321_v29  ;;  %v10330_v18 = vld [vmem:[#allocation6 + $0x88] sm:$0xff]   ;;  %v10334_v25 = vld [vmem:[#allocation6 + $0x130] sm:$0xff]   ;;  %v10340_v30 = vld [vmem:[#allocation6 + $0x100] sm:$0xff]  }
 0x1a5   : > { %v10338_v28 = vld [vmem:[#allocation6 + $0x110] sm:$0xff]   ;;  %v10339_v29 = vld [vmem:[#allocation6 + $0x108] sm:$0xff]  }
 0x1a6   : > { %1335 = vst [vmem:[%s920_s5] sm:$0xff] %v11579_v31  ;;  %1337 = vst [vmem:[#allocation2 + $0x50] sm:$0xff] %v11579_v31  ;;  %v1332_v34 = vmul.f32 0.2, %v1330_v32  ;;  %v1362_v35 = vpack.c.bf16 %v11579_v31, %v1360_v27  ;;  %v1342_v42 = vpack.c.bf16 %v11579_v31, %v1339_v37  ;;  %v10337_v27 = vld [vmem:[#allocation6 + $0x118] sm:$0xff]  }
 0x1a7   : > { %v10348_v37 = vld [vmem:[#allocation8 + $0x158] ss:$12 sps:$4 sm:$0xff]  }
 0x1a8   : > { %v11584_v36 = vmax.f32 %v1330_v32, %v1332_v34  ;;  %v1381_v40 = vshrl.u32 %v1362_v35, 16  ;;  %v1384_v41 = vshll.u32 %v1362_v35, 16  ;;  %v1490_v47 = vrot.slane %v1342_v42, 3  ;;  %v10341_v32 = vld [vmem:[#allocation8 + $0x168] ss:$12 sps:$4 sm:$0xff]  }
 0x1a9   : > { %v10344_v34 = vld [vmem:[#allocation8 + $0x170] ss:$12 sps:$4 sm:$0xff]   ;;  %v10347_v35 = vld [vmem:[#allocation8 + $0x154] ss:$12 sps:$4 sm:$0xff]  }
 0x1aa   : > { %1336 = vst [vmem:[%s920_s5 + $0x8] sm:$0xff] %v11584_v36  ;;  %1338 = vst [vmem:[#allocation2 + $0x10] sm:$0xff] %v11584_v36  ;;  %v1383_v48 = vrot.slane %v1381_v40, 3  ;;  %v1386_v49 = vrot.slane %v1384_v41, 4  ;;  %v1584_v24 = vpack.c.bf16 %v11584_v36, %v11579_v31  ;;  %v10352_v40 = vld [vmem:[#allocation8 + $0x140] ss:$12 sps:$4 sm:$0xff]  }
 0x1ab   : > { %v10355_v41 = vld [vmem:[#allocation8 + $0x124] ss:$12 sps:$4 sm:$0xff]   ;;  %v10353_v42 = vld [vmem:[#allocation8 + $0x120] ss:$12 sps:$4 sm:$0xff]   ;;  %s12279_s5 = sld [smem:[#allocation37_spill]] }
 0x1ac   : > { %v1387_v4 = vor.u32 %v1386_v49, %v1383_v48  ;;  %v10361_v48 = vld [vmem:[#allocation8 + $0xf0] ss:$12 sps:$4 sm:$0xff]   ;;  %v10364_v49 = vld [vmem:[#allocation8 + $0xf8] ss:$12 sps:$4 sm:$0xff]  }
 0x1ad   : > { %v1692_v43 = vld [vmem:[#allocation2 + $0x50] sm:$0xfe] }
 0x1ae   : > { %v1817_v44 = vld [vmem:[#allocation2 + $0x50] sm:$0xfc]  ;;  %v11593_v45 = vpack.c.bf16 %v11584_v36, %v1692_v43  ;;  %v10356_v43 = vld [vmem:[#allocation8 + $0x128] ss:$12 sps:$4 sm:$0xff]  }
 0x1af   : > { %v1819_v46 = vpack.c.bf16 %v11584_v36, %v1817_v44  ;;  %v10345_v36 = vld [vmem:[#allocation8 + $0x150] ss:$12 sps:$4 sm:$0xff]   ;;  %v10359_v44 = vld [vmem:[#allocation8 + $0x10c] ss:$12 sps:$4 sm:$0xff]  }
 0x1b0   : > { %v1716_v50 = vshll.u32 %v11593_v45, 16  ;;  %v1714_v56 = vshrl.u32 %v11593_v45, 16  ;;  %v10357_v45 = vld [vmem:[#allocation8 + $0x108] ss:$12 sps:$4 sm:$0xff]  }
 0x1b1   : > { %v1341_v51 = vld [vmem:[#allocation2 + $0x10] sm:$0x3f]  ;;  %v11598_v57 = vrot.slane %v1819_v46, 1 }
 0x1b2   : > { %v1361_v52 = vld [vmem:[#allocation2 + $0x10] sm:$0x7f]  ;;  %v1343_v53 = vpack.c.bf16 %v1341_v51, %v1341_v51  ;;  %v1718_v62 = vrot.slane %v1716_v50, 1  ;;  %v11198_v51 = vmov 0  }
 0x1b3   : > { %v1363_v55 = vpack.c.bf16 %v1361_v52, %v1361_v52  ;;  %v1842_v31 = vsel %vm1839_vm4, %v11598_v57, %v11587_v39  ;;  %v10349_v39 = vld [vmem:[#allocation8 + $0x138] ss:$12 sps:$4 sm:$0xff]   ;;  %v10360_v46 = vld [vmem:[#allocation8 + $0x110] ss:$12 sps:$4 sm:$0xff]  }
 0x1b4   : > { %v1491_v58 = vrot.slane %v1343_v53, 3  ;;  %v1719_v20 = vor.u32 %v1718_v62, %v1714_v56  ;;  %v10367_v50 = vld [vmem:[#allocation8 + $0xdc] ss:$12 sps:$4 sm:$0xff]   ;;  %v10365_v52 = vld [vmem:[#allocation8 + $0xd8] ss:$12 sps:$4 sm:$0xff]  }
 0x1b5   : > { %v1389_v59 = vshrl.u32 %v1363_v55, 16  ;;  %v1392_v60 = vshll.u32 %v1363_v55, 16  ;;  %v10368_v53 = vld [vmem:[#allocation8 + $0xe0] ss:$12 sps:$4 sm:$0xff]   ;;  %v10372_v56 = vld [vmem:[#allocation8 + $0xc8] ss:$12 sps:$4 sm:$0xff]  }
 0x1b6   : > { %v1492_v63 = vsel %vm1489_vm3, %v1490_v47, %v1491_v58  ;;  %v1724_v22 = vsel %vm1217_vm2, %v1719_v20, %v1723_v38  ;;  %v10351_v38 = vld [vmem:[#allocation8 + $0x13c] ss:$12 sps:$4 sm:$0xff]   ;;  %v10363_v47 = vld [vmem:[#allocation8 + $0xf4] ss:$12 sps:$4 sm:$0xff]   ;;  %v10375_v57 = vld [vmem:[#allocation8 + $0xac] ss:$12 sps:$4 sm:$0xff]  }
 0x1b7   : > { %v1391_v1 = vrot.slane %v1389_v59, 3  ;;  %v1394_v0 = vrot.slane %v1392_v60, 4  ;;  %9642 = vmatmul.mubr.bf16.vlgmr.msra.gmra.mxu0 %v1492_v63  ;;  %v10369_v55 = vld [vmem:[#allocation8 + $0xc0] ss:$12 sps:$4 sm:$0xff]  }
 0x1b8   : > { %9666 = vmatpush3.bf16.msra.mxu0 %v10317_v54  ;;  %9681 = vmatprep.mubr.msk.bf16.mxu0 %vm11197_vm0, %v11557_v61  ;;  %v10371_v54 = vld [vmem:[#allocation8 + $0xc4] ss:$12 sps:$4 sm:$0xff]  }
 0x1b9   : > { %v1395_v5 = vor.u32 %v1394_v0, %v1391_v1  ;;  %9667 = vmatprep.subr.bf16.mxu0 %v11557_v61 }
 0x1bb   : > { %v1396_v6 = vsel %vm1088_vm1, %v1387_v4, %v1395_v5 }
 0x1bc   : > { %9622 = vmatmul.mubr.bf16.vlgmr.msra.gmra.mxu1 %v1396_v6  ;;  %9668 = vmatpush3.bf16.msra.mxu0 %v10319_v3 }
 0x1bd   : > { %9646 = vmatpush3.bf16.msra.mxu1 %v10318_v2  ;;  %9669 = vmatprep.subr.bf16.mxu0 %v11557_v61 }
 0x1be   : > { %9647 = vmatprep.subr.bf16.mxu1 %v11557_v61  ;;  %9661 = vmatprep.mubr.msk.bf16.mxu1 %vm11197_vm0, %v11607_v12  ;;  %v10326_v61 = vld [vmem:[#allocation6 + $0x98] sm:$0xff]  }
 0x1c0   : > { %9670 = vmatpush3.bf16.msra.mxu0 %v10321_v8 }
 0x1c1   : > { %9648 = vmatpush3.bf16.msra.mxu1 %v10320_v7  ;;  %9671 = vmatprep.subr.bf16.mxu0 %v11607_v12 }
 0x1c2   : > { %9649 = vmatprep.subr.bf16.mxu1 %v11607_v12 }
 0x1c4   : > { %9672 = vmatpush3.bf16.msra.mxu0 %v10323_v11 }
 0x1c5   : > { %9650 = vmatpush3.bf16.msra.mxu1 %v10322_v10  ;;  %9673 = vmatprep.subr.bf16.mxu0 %v11607_v12 }
 0x1c6   : > { %9651 = vmatprep.subr.bf16.mxu1 %v11607_v12 }
 0x1c8   : > { %9674 = vmatpush3.bf16.msra.mxu0 %v10325_v14 }
 0x1c9   : > { %9652 = vmatpush3.bf16.msra.mxu1 %v10324_v13  ;;  %9675 = vmatprep.subr.bf16.mxu0 %v11607_v12 }
 0x1ca   : > { %9653 = vmatprep.subr.bf16.mxu1 %v11607_v12 }
 0x1cc   : > { %9676 = vmatpush3.bf16.msra.mxu0 %v10327_v15 }
 0x1cd   : > { %9654 = vmatpush3.bf16.msra.mxu1 %v10326_v61  ;;  %9677 = vmatprep.subr.bf16.mxu0 %v11607_v12 }
 0x1ce   : > { %9655 = vmatprep.subr.bf16.mxu1 %v11607_v12 }
 0x1d0   : > { %9678 = vmatpush3.bf16.msra.mxu0 %v10329_v17 }
 0x1d1   : > { %9656 = vmatpush3.bf16.msra.mxu1 %v10328_v16  ;;  %9679 = vmatprep.subr.bf16.mxu0 %v11607_v12 }
 0x1d2   : > { %9657 = vmatprep.subr.bf16.mxu1 %v11607_v12 }
 0x1d4   : > { %9680 = vmatpush3.bf16.msra.mxu0 %v10331_v19 }
 0x1d5   : > { %9658 = vmatpush3.bf16.msra.mxu1 %v10330_v18  ;;  %2171 = vmatprep.subr.bf16.mxu0 %v10343_v33  ;;  %v8502_v18 = vld [vmem:[%s12277_s4] ss:$0 sm:$0xff]  ;;  %s11805_s4 = scalar_lea.vmem [#allocation17], %s10145_s17 }
 0x1d6   : > { %9659 = vmatprep.subr.bf16.mxu1 %v11607_v12  ;;  %s8089_s0 = sshll.u32 %s11805_s4, 4  ;;  %s12140_s0 = int_to_ptr.vmem [resolvable:$true] %s8089_s0 }
 0x1d7   : > { %9682 = vmatmul.mubr.bf16.vlgmr.msra.gmra.mxu0 %v1724_v22  ;;  %s11102_s1 = scalar_lea.vmem %s12140_s0, 768 }
 0x1d8   : > { %2172 = vmatpush1.bf16.msra.mxu0 %v10341_v32  ;;  %2203 = vmatprep.mubr.bf16.mxu0 %v11198_v51  ;;  %p11103_p4 = scmp.ne.s32.totalorder %s12140_s0, %s11102_s1 }
 0x1d9   : > { %9660 = vmatpush3.bf16.msra.mxu1 %v10332_v21  ;;  %2173 = vmatprep.subr.bf16.mxu0 %v10347_v35 }
 0x1da   : > { %9685 = vmatprep.subr.bf16.mxu1 %v11607_v12  ;;  %p11104_p13 = pnand %p11103_p4, %p11365_p5 }
 0x1dc   : > { %9662 = vmatmul.mubr.bf16.vlgmr.msra.gmra.mxu1 %v1584_v24  ;;  %2174 = vmatpush1.bf16.msra.mxu0 %v10345_v36  ;;  %p11105_p3 = pneg %p11104_p13 }
 0x1dd   : > { %9686 = vmatpush3.bf16.msra.mxu1 %v10333_v23  ;;  %9701 = vmatprep.mubr.msk.bf16.mxu1 %vm11197_vm0, %v11607_v12 }
 0x1de   : > { %9687 = vmatprep.subr.bf16.mxu1 %v11607_v12  ;;  %2175 = vmatprep.subr.bf16.mxu0 %v10351_v38 }
 0x1e0   : > { %2176 = vmatpush1.bf16.msra.mxu0 %v10349_v39 }
 0x1e1   : > { %9688 = vmatpush3.bf16.msra.mxu1 %v10334_v25  ;;  %2177 = vmatprep.subr.bf16.mxu0 %v10355_v41 }
 0x1e2   : > { %9689 = vmatprep.subr.bf16.mxu1 %v11607_v12 }
 0x1e4   : > { %2178 = vmatpush1.bf16.msra.mxu0 %v10353_v42 }
 0x1e5   : > { %9690 = vmatpush3.bf16.msra.mxu1 %v10335_v26  ;;  %2179 = vmatprep.subr.bf16.mxu0 %v10359_v44 }
 0x1e6   : > { %9691 = vmatprep.subr.bf16.mxu1 %v11607_v12 }
 0x1e8   : > { %2180 = vmatpush1.bf16.msra.mxu0 %v10357_v45 }
 0x1e9   : > { %9692 = vmatpush3.bf16.msra.mxu1 %v10336_v9  ;;  %2181 = vmatprep.subr.bf16.mxu0 %v10363_v47  ;;  %v10379_v47 = vld [vmem:[#allocation8 + $0x94] ss:$12 sps:$4 sm:$0xff]  }
 0x1ea   : > { %9693 = vmatprep.subr.bf16.mxu1 %v11607_v12 }
 0x1ec   : > { %2182 = vmatpush1.bf16.msra.mxu0 %v10361_v48 }
 0x1ed   : > { %9694 = vmatpush3.bf16.msra.mxu1 %v10337_v27  ;;  %2183 = vmatprep.subr.bf16.mxu0 %v10367_v50  ;;  %v10380_v50 = vld [vmem:[#allocation8 + $0x98] ss:$12 sps:$4 sm:$0xff]  }
 0x1ee   : > { %9695 = vmatprep.subr.bf16.mxu1 %v11607_v12 }
 0x1f0   : > { %2184 = vmatpush1.bf16.msra.mxu0 %v10365_v52  ;;  %v10383_v52 = vld [vmem:[#allocation8 + $0x7c] ss:$12 sps:$4 sm:$0xff]  }
 0x1f1   : > { %9696 = vmatpush3.bf16.msra.mxu1 %v10338_v28  ;;  %2185 = vmatprep.subr.bf16.mxu0 %v10371_v54  ;;  %v10384_v54 = vld [vmem:[#allocation8 + $0x80] ss:$12 sps:$4 sm:$0xff]  }
 0x1f2   : > { %9697 = vmatprep.subr.bf16.mxu1 %v11607_v12 }
 0x1f4   : > { %2186 = vmatpush1.bf16.msra.mxu0 %v10369_v55  ;;  %v10387_v55 = vld [vmem:[#allocation8 + $0x64] ss:$12 sps:$4 sm:$0xff]  }
 0x1f5   : > { %9698 = vmatpush3.bf16.msra.mxu1 %v10339_v29  ;;  %2389 = vmatprep.subr.bf16.mxu0 %v10375_v57  ;;  %v10388_v57 = vld [vmem:[#allocation8 + $0x68] ss:$12 sps:$4 sm:$0xff]  }
 0x1f6   : > { %9699 = vmatprep.subr.bf16.mxu1 %v11607_v12 }
 0x1f9   : > { %9700 = vmatpush3.bf16.msra.mxu1 %v10340_v30  ;;  %v1989_v30 = vld [vmem:[#allocation2 + $0x60] sm:$0x80] }
 0x1fa   : > { %9705 = vmatprep.subr.bf16.mxu1 %v11607_v12 }
 0x1fc   : > { %9702 = vmatmul.mubr.bf16.vlgmr.msra.gmra.mxu1 %v1842_v31 }
 0x1fd   : > { %9721 = vmatprep.mubr.msk.bf16.mxu1 %vm11197_vm0, %v11607_v12  ;;  %9706 = vmatpush3.bf16.msra.mxu1 %v10344_v34 }
 0x1fe   : > { %9707 = vmatprep.subr.bf16.mxu1 %v11607_v12 }
 0x201   : > { %9708 = vmatpush3.bf16.msra.mxu1 %v10348_v37 }
 0x202   : > { %9709 = vmatprep.subr.bf16.mxu1 %v11607_v12 }
 0x205   : > { %9710 = vmatpush3.bf16.msra.mxu1 %v10352_v40 }
 0x206   : > { %9711 = vmatprep.subr.bf16.mxu1 %v11607_v12 }
 0x209   : > { %9712 = vmatpush3.bf16.msra.mxu1 %v10356_v43  ;;  %v10373_v43 = vld [vmem:[#allocation8 + $0xa8] ss:$12 sps:$4 sm:$0xff]  }
 0x20a   : > { %9713 = vmatprep.subr.bf16.mxu1 %v11607_v12 }
 0x20d   : > { %9714 = vmatpush3.bf16.msra.mxu1 %v10360_v46  ;;  %v10376_v46 = vld [vmem:[#allocation8 + $0xb0] ss:$12 sps:$4 sm:$0xff]  }
 0x20e   : > { %9715 = vmatprep.subr.bf16.mxu1 %v11607_v12 }
 0x211   : > { %9716 = vmatpush3.bf16.msra.mxu1 %v10364_v49  ;;  %v10377_v49 = vld [vmem:[#allocation8 + $0x90] ss:$12 sps:$4 sm:$0xff]  }
 0x212   : > { %9717 = vmatprep.subr.bf16.mxu1 %v11607_v12 }
 0x215   : > { %9718 = vmatpush3.bf16.msra.mxu1 %v10368_v53  ;;  %v10381_v53 = vld [vmem:[#allocation8 + $0x78] ss:$12 sps:$4 sm:$0xff]  }
 0x216   : > { %9719 = vmatprep.subr.bf16.mxu1 %v11607_v12 }
 0x219   : > { %9720 = vmatpush3.bf16.msra.mxu1 %v10372_v56  ;;  %v10385_v56 = vld [vmem:[#allocation8 + $0x60] ss:$12 sps:$4 sm:$0xff]  }
 0x21a   : > { %9725 = vmatprep.subr.bf16.mxu1 %v11607_v12 }
 0x277   : > { %v1576_v58 = vpop.f32.mrf.mxu0 }
 0x279   : > { %v9643_v59 = vpop.f32.mrf.mxu0 }
 0x27a   : > { %v10389_v59 = vld [vmem:[#allocation8 + $0x48] ss:$12 sps:$4 sm:$0xff]  }
 0x27b   : > { %v1579_v62 = vpop.f32.mrf.mxu0 }
 0x27c   : > { %v1480_v60 = vpop.f32.mrf.mxu1 }
 0x27d   : > { %v9644_v1 = vpop.f32.mrf.mxu0  ;;  %v1577_v13 = vadd.f32 %v1576_v58, %v1480_v60  ;;  %v10391_v58 = vld [vmem:[#allocation8 + $0x4c] ss:$12 sps:$4 sm:$0xff]   ;;  %v10392_v60 = vld [vmem:[#allocation8 + $0x50] ss:$12 sps:$4 sm:$0xff]  }
 0x27e   : > { %v9623_v63 = vpop.f32.mrf.mxu1  ;;  %v10396_v1 = vld [vmem:[#allocation8 + $0x38] ss:$12 sps:$4 sm:$0xff]  }
 0x27f   : > { %v10393_v63 = vld [vmem:[#allocation8 + $0x30] ss:$12 sps:$4 sm:$0xff]  }
 0x280   : > { %v1483_v0 = vpop.f32.mrf.mxu1 }
 0x281   : > { %v1580_v61 = vadd.f32 %v1579_v62, %v1483_v0  ;;  %v10395_v62 = vld [vmem:[#allocation8 + $0x34] ss:$12 sps:$4 sm:$0xff]   ;;  %v10399_v0 = vld [vmem:[#allocation8 + $0x1c] ss:$12 sps:$4 sm:$0xff]  }
 0x282   : > { %v9624_v2 = vpop.f32.mrf.mxu1 }
 0x297   : > { %v1808_v3 = vpop.f32.mrf.mxu0 }
 0x299   : > { %v9683_v4 = vpop.f32.mrf.mxu0 }
 0x29a   : > { %v10400_v4 = vld [vmem:[#allocation8 + $0x20] ss:$12 sps:$4 sm:$0xff]  }
 0x29b   : > { %v1811_v6 = vpop.f32.mrf.mxu0 }
 0x29c   : > { %v1683_v5 = vpop.f32.mrf.mxu1 }
 0x29d   : > { %v9684_v8 = vpop.f32.mrf.mxu0  ;;  %v1690_v14 = vadd.f32 %v1683_v5, %v1577_v13  ;;  %v10403_v5 = vld [vmem:[#allocation8 + $0x4] ss:$12 sps:$4 sm:$0xff]   ;;  %v10407_v13 = vld [vmem:[#allocation8 + $0x22c] ss:$12 sps:$4 sm:$0xff]  }
 0x29e   : > { %v9663_v7 = vpop.f32.mrf.mxu1  ;;  %v10401_v8 = vld [vmem:[#allocation8] ss:$12 sps:$4 sm:$0xff]  }
 0x29f   : > { %v1815_v16 = vadd.f32 %v1808_v3, %v1690_v14  ;;  %v10397_v3 = vld [vmem:[#allocation8 + $0x18] ss:$12 sps:$4 sm:$0xff]  }
 0x2a0   : > { %v1686_v10 = vpop.f32.mrf.mxu1 }
 0x2a1   : > { %v1691_v15 = vadd.f32 %v1686_v10, %v1580_v61  ;;  %v10404_v10 = vld [vmem:[#allocation8 + $0x8] ss:$12 sps:$4 sm:$0xff]  }
 0x2a2   : > { %v9664_v11 = vpop.f32.mrf.mxu1 }
 0x2a3   : > { %v1816_v22 = vadd.f32 %v1811_v6, %v1691_v15  ;;  %v1952_v6 = vld [vmem:[#allocation2 + $0x60] sm:$0xc0]  ;;  %v10405_v15 = vld [vmem:[#allocation8 + $0x228] ss:$12 sps:$4 sm:$0xff]  }
 0x2bc   : > { %v1926_v17 = vpop.f32.mrf.mxu1 }
 0x2bd   : > { %v1933_v19 = vadd.f32 %v1926_v17, %v1815_v16  ;;  %v10408_v16 = vld [vmem:[#allocation8 + $0x230] ss:$12 sps:$4 sm:$0xff]   ;;  %v10411_v17 = vld [vmem:[#allocation8 + $0x214] ss:$12 sps:$4 sm:$0xff]  }
 0x2be   : > { %v9703_v20 = vpop.f32.mrf.mxu1 }
 0x2bf   : > { %v1942_v21 = vadd.f32 %v8502_v18, %v1933_v19  ;;  %v10409_v19 = vld [vmem:[#allocation8 + $0x210] ss:$12 sps:$4 sm:$0xff]   ;;  %v10412_v20 = vld [vmem:[#allocation8 + $0x218] ss:$12 sps:$4 sm:$0xff]  }
 0x2c0   : > { %v1929_v23 = vpop.f32.mrf.mxu1 }
 0x2c1   : > { %v1944_v24 = vmul.f32 0.2, %v1942_v21  ;;  %v1934_v25 = vadd.f32 %v1929_v23, %v1816_v22  ;;  %v10413_v22 = vld [vmem:[#allocation8 + $0x1f8] ss:$12 sps:$4 sm:$0xff]   ;;  %v10416_v23 = vld [vmem:[#allocation8 + $0x200] ss:$12 sps:$4 sm:$0xff]  }
 0x2c2   : > { %v9704_v26 = vpop.f32.mrf.mxu1 }
 0x2c3   : > { %v11659_v9 = vmax.f32 %v1942_v21, %v1944_v24  ;;  %v1943_v27 = vadd.f32 %v8502_v18, %v1934_v25  ;;  %v10415_v21 = vld [vmem:[#allocation8 + $0x1fc] ss:$12 sps:$4 sm:$0xff]   ;;  %v10419_v24 = vld [vmem:[#allocation8 + $0x1e4] ss:$12 sps:$4 sm:$0xff]   ;;  %v10417_v25 = vld [vmem:[#allocation8 + $0x1e0] ss:$12 sps:$4 sm:$0xff]  }
 0x2c4   : > { %v10420_v26 = vld [vmem:[#allocation8 + $0x1e8] ss:$12 sps:$4 sm:$0xff]  }
 0x2c5   : > { %1948 = vst [vmem:[%s925_s7] sm:$0xff] %v11659_v9  ;;  %1950 = vst [vmem:[#allocation2 + $0x50] sm:$0xff] %v11659_v9  ;;  %v1945_v28 = vmul.f32 0.2, %v1943_v27  ;;  %v1991_v32 = vpack.c.bf16 %v11659_v9, %v1989_v30  ;;  %v1955_v11 = vpack.c.bf16 %v11659_v9, %v1952_v6  ;;  %v10427_v30 = vld [vmem:[#allocation8 + $0x1b4] ss:$12 sps:$4 sm:$0xff]  }
 0x2c6   : > { %v10465_v6 = vld [vmem:[#allocation8 + $0x240] ss:$12 sps:$4 sm:$0xff]  }
 0x2c7   : > { %v11663_v29 = vmax.f32 %v1943_v27, %v1945_v28  ;;  %v2026_v33 = vshrl.u32 %v1991_v32, 16  ;;  %v2029_v34 = vshll.u32 %v1991_v32, 16  ;;  %v2257_v61 = vrot.slane %v1955_v11, 3  ;;  %v10421_v27 = vld [vmem:[#allocation8 + $0x1c8] ss:$12 sps:$4 sm:$0xff]  }
 0x2c8   : > { %v10424_v28 = vld [vmem:[#allocation8 + $0x1d0] ss:$12 sps:$4 sm:$0xff]  }
 0x2c9   : > { %1949 = vst [vmem:[%s925_s7 + $0x8] sm:$0xff] %v11663_v29  ;;  %1951 = vst [vmem:[#allocation2 + $0x10] sm:$0xff] %v11663_v29  ;;  %v11669_v31 = vpack.c.bf16 %v11663_v29, %v11659_v9  ;;  %v2028_v37 = vrot.slane %v2026_v33, 3  ;;  %v2031_v38 = vrot.slane %v2029_v34, 4  ;;  %v10423_v9 = vld [vmem:[#allocation8 + $0x1cc] ss:$12 sps:$4 sm:$0xff]  }
 0x2ca   : > { %v10425_v32 = vld [vmem:[#allocation8 + $0x1b0] ss:$12 sps:$4 sm:$0xff]   ;;  %v10428_v33 = vld [vmem:[#allocation8 + $0x1b8] ss:$12 sps:$4 sm:$0xff]  }
 0x2cb   : > { %v2032_v44 = vor.u32 %v2031_v38, %v2028_v37  ;;  %v10431_v34 = vld [vmem:[#allocation8 + $0x19c] ss:$12 sps:$4 sm:$0xff]   ;;  %v10435_v37 = vld [vmem:[#allocation8 + $0x184] ss:$12 sps:$4 sm:$0xff]   ;;  %v10433_v38 = vld [vmem:[#allocation8 + $0x180] ss:$12 sps:$4 sm:$0xff]  }
 0x2d0   : > { %v1990_v35 = vld [vmem:[#allocation2 + $0x10] sm:$0x7f] }
 0x2d1   : > { %v1992_v36 = vpack.c.bf16 %v1990_v35, %v1990_v35  ;;  %v1954_v2 = vld [vmem:[#allocation2 + $0x10] sm:$0x3f] }
 0x2d2   : > { %v1956_v7 = vpack.c.bf16 %v1954_v2, %v1954_v2  ;;  %v10429_v35 = vld [vmem:[#allocation8 + $0x198] ss:$12 sps:$4 sm:$0xff]   ;;  %v10464_v2 = vld [vmem:[#allocation8 + $0x260] ss:$12 sps:$4 sm:$0xff]  }
 0x2d3   : > { %v2034_v39 = vshrl.u32 %v1992_v36, 16  ;;  %v2037_v40 = vshll.u32 %v1992_v36, 16  ;;  %v10432_v36 = vld [vmem:[#allocation8 + $0x1a0] ss:$12 sps:$4 sm:$0xff]  }
 0x2d4   : > { %v2258_v14 = vrot.slane %v1956_v7, 3  ;;  %v10468_v7 = vld [vmem:[#allocation8 + $0x248] ss:$12 sps:$4 sm:$0xff]  }
 0x2d5   : > { %v2036_v41 = vrot.slane %v2034_v39, 3  ;;  %v2039_v42 = vrot.slane %v2037_v40, 4  ;;  %v10436_v39 = vld [vmem:[#allocation8 + $0x188] ss:$12 sps:$4 sm:$0xff]   ;;  %v10439_v40 = vld [vmem:[#allocation8 + $0x2ec] ss:$12 sps:$4 sm:$0xff]  }
 0x2d6   : > { %v2259_v18 = vsel %vm1489_vm3, %v2257_v61, %v2258_v14  ;;  %v10469_v14 = vld [vmem:[#allocation8 + $0x3a8] ss:$12 sps:$4 sm:$0xff]   ;;  %v10472_v61 = vld [vmem:[#allocation8 + $0x3b0] ss:$12 sps:$4 sm:$0xff]  }
 0x2d7   : > { %v2040_v45 = vor.u32 %v2039_v42, %v2036_v41  ;;  %v10437_v41 = vld [vmem:[#allocation8 + $0x2e8] ss:$12 sps:$4 sm:$0xff]   ;;  %v10440_v42 = vld [vmem:[#allocation8 + $0x2f0] ss:$12 sps:$4 sm:$0xff]  }
 0x2d9   : > { %v2041_v48 = vsel %vm1088_vm1, %v2032_v44, %v2040_v45  ;;  %v10441_v44 = vld [vmem:[#allocation8 + $0x2d0] ss:$12 sps:$4 sm:$0xff]   ;;  %v10444_v45 = vld [vmem:[#allocation8 + $0x2d8] ss:$12 sps:$4 sm:$0xff]  }
 0x2da   : > { %2204 = vmatmul.mubr.bf16.vlgmr.msra.gmra.mxu0 %v2041_v48  ;;  %9722 = vmatmul.mubr.bf16.vlgmr.msra.gmra.mxu1 %v2041_v48  ;;  %v10445_v48 = vld [vmem:[#allocation8 + $0x2b8] ss:$12 sps:$4 sm:$0xff]  }
 0x2db   : > { %2390 = vmatpush1.bf16.msra.mxu0 %v10373_v43  ;;  %9726 = vmatpush3.bf16.msra.mxu1 %v10376_v46  ;;  %v10443_v43 = vld [vmem:[#allocation8 + $0x2d4] ss:$12 sps:$4 sm:$0xff]   ;;  %v10447_v46 = vld [vmem:[#allocation8 + $0x2bc] ss:$12 sps:$4 sm:$0xff]  }
 0x2dc   : > { %2391 = vmatprep.subr.bf16.mxu0 %v10379_v47  ;;  %9727 = vmatprep.subr.bf16.mxu1 %v11607_v12  ;;  %v11701_v47 = vld [vmem:[#allocation2 + $0x60] sm:$0xff] }
 0x2dd   : > { %2421 = vmatprep.mubr.bf16.mxu0 %v11198_v51  ;;  %9741 = vmatprep.mubr.msk.bf16.mxu1 %vm11197_vm0, %v11607_v12 }
 0x2df   : > { %2392 = vmatpush1.bf16.msra.mxu0 %v10377_v49  ;;  %9728 = vmatpush3.bf16.msra.mxu1 %v10380_v50  ;;  %v10448_v49 = vld [vmem:[#allocation8 + $0x2c0] ss:$12 sps:$4 sm:$0xff]  }
 0x2e0   : > { %2393 = vmatprep.subr.bf16.mxu0 %v10383_v52  ;;  %9729 = vmatprep.subr.bf16.mxu1 %v11607_v12  ;;  %v10449_v50 = vld [vmem:[#allocation8 + $0x2a0] ss:$12 sps:$4 sm:$0xff]  }
 0x2e1   : > { %v10455_v52 = vld [vmem:[#allocation8 + $0x28c] ss:$12 sps:$4 sm:$0xff]  }
 0x2e3   : > { %2394 = vmatpush1.bf16.msra.mxu0 %v10381_v53  ;;  %9730 = vmatpush3.bf16.msra.mxu1 %v10384_v54  ;;  %v2725_v53 = vld [vmem:[#allocation2 + $0x50] sm:$0xfe]  ;;  %v10453_v54 = vld [vmem:[#allocation8 + $0x288] ss:$12 sps:$4 sm:$0xff]  }
 0x2e4   : > { %2395 = vmatprep.subr.bf16.mxu0 %v10387_v55  ;;  %9731 = vmatprep.subr.bf16.mxu1 %v11607_v12  ;;  %v10456_v55 = vld [vmem:[#allocation8 + $0x290] ss:$12 sps:$4 sm:$0xff]  }
 0x2e7   : > { %2396 = vmatpush1.bf16.msra.mxu0 %v10385_v56  ;;  %9732 = vmatpush3.bf16.msra.mxu1 %v10388_v57  ;;  %v10459_v56 = vld [vmem:[#allocation8 + $0x274] ss:$12 sps:$4 sm:$0xff]   ;;  %v2728_v57 = vpack.c.bf16 %v11663_v29, %v2725_v53  ;;  %v10525_v53 = vld [vmem:[#allocation9 + $0x210] ss:$12 sps:$4 sm:$0xff]  }
 0x2e8   : > { %2397 = vmatprep.subr.bf16.mxu0 %v10391_v58  ;;  %9733 = vmatprep.subr.bf16.mxu1 %v11607_v12  ;;  %v2727_v58 = vld [vmem:[#allocation2 + $0x48] sm:$0x1] }
 0x2eb   : > { %2398 = vmatpush1.bf16.msra.mxu0 %v10389_v59  ;;  %9734 = vmatpush3.bf16.msra.mxu1 %v10392_v60  ;;  %v10457_v59 = vld [vmem:[#allocation8 + $0x270] ss:$12 sps:$4 sm:$0xff]   ;;  %v10460_v60 = vld [vmem:[#allocation8 + $0x278] ss:$12 sps:$4 sm:$0xff]  }
 0x2ec   : > { %2399 = vmatprep.subr.bf16.mxu0 %v10395_v62  ;;  %9735 = vmatprep.subr.bf16.mxu1 %v11607_v12  ;;  %v10463_v62 = vld [vmem:[#allocation8 + $0x25c] ss:$12 sps:$4 sm:$0xff]  }
 0x2ef   : > { %2400 = vmatpush1.bf16.msra.mxu0 %v10393_v63  ;;  %9736 = vmatpush3.bf16.msra.mxu1 %v10396_v1  ;;  %v2729_v63 = vpack.c.bf16 %v2727_v58, %v2727_v58  ;;  %v2765_v1 = vshll.u32 %v2728_v57, 16  ;;  %v10512_v58 = vld [vmem:[#allocation9 + $0x64] ss:$12 sps:$4 sm:$0xff]  }
 0x2f0   : > { %2401 = vmatprep.subr.bf16.mxu0 %v10399_v0  ;;  %9737 = vmatprep.subr.bf16.mxu1 %v11607_v12  ;;  %v10461_v0 = vld [vmem:[#allocation8 + $0x258] ss:$12 sps:$4 sm:$0xff]  }
 0x2f3   : > { %2402 = vmatpush1.bf16.msra.mxu0 %v10397_v3  ;;  %9738 = vmatpush3.bf16.msra.mxu1 %v10400_v4  ;;  %v10467_v3 = vld [vmem:[#allocation8 + $0x244] ss:$12 sps:$4 sm:$0xff]   ;;  %v2767_v4 = vrot.slane %v2765_v1, 1  ;;  %v10545_v1 = vld [vmem:[#allocation9 + $0x1cc] ss:$12 sps:$4 sm:$0xff]  }
 0x2f4   : > { %2403 = vmatprep.subr.bf16.mxu0 %v10403_v5  ;;  %9739 = vmatprep.subr.bf16.mxu1 %v11607_v12  ;;  %v2770_v5 = vshll.u32 %v2729_v63, 16  ;;  %v10515_v63 = vld [vmem:[#allocation9 + $0x4c] ss:$12 sps:$4 sm:$0xff]  }
 0x2f7   : > { %2404 = vmatpush1.bf16.msra.mxu0 %v10401_v8  ;;  %9740 = vmatpush3.bf16.msra.mxu1 %v10404_v10  ;;  %v2763_v8 = vshrl.u32 %v2728_v57, 16  ;;  %v10471_v10 = vld [vmem:[#allocation8 + $0x3ac] ss:$12 sps:$4 sm:$0xff]  }
 0x2f8   : > { %2635 = vmatprep.subr.bf16.mxu0 %v10407_v13  ;;  %9745 = vmatprep.subr.bf16.mxu1 %v11607_v12  ;;  %v2772_v13 = vrot.slane %v2770_v5, 1  ;;  %v10531_v57 = vld [vmem:[#allocation9 + $0x1f8] ss:$12 sps:$4 sm:$0xff]   ;;  %v10549_v5 = vld [vmem:[#allocation9 + $0x1b0] ss:$12 sps:$4 sm:$0xff]  }
 0x2f9   : > { %v2768_v11 = vor.u32 %v2767_v4, %v2763_v8  ;;  %v10516_v4 = vld [vmem:[#allocation9 + $0x30] ss:$12 sps:$4 sm:$0xff]   ;;  %v10522_v8 = vld [vmem:[#allocation9 + $0x18] ss:$12 sps:$4 sm:$0xff]  }
 0x2fa   : > { %2422 = vmatmul.mubr.bf16.vlgmr.msra.gmra.mxu0 %v2259_v18  ;;  %9742 = vmatmul.mubr.bf16.vlgmr.msra.gmra.mxu1 %v2259_v18  ;;  %v10476_v18 = vld [vmem:[#allocation8 + $0x398] ss:$12 sps:$4 sm:$0xff]  }
 0x2fb   : > { %2636 = vmatpush1.bf16.msra.mxu0 %v10405_v15  ;;  %9746 = vmatpush3.bf16.msra.mxu1 %v10408_v16  ;;  %v10475_v15 = vld [vmem:[#allocation8 + $0x394] ss:$12 sps:$4 sm:$0xff]   ;;  %v2773_v16 = vsel %vm1217_vm2, %v2768_v11, %v2772_v13  ;;  %v10530_v11 = vld [vmem:[#allocation9 + $0x4] ss:$12 sps:$4 sm:$0xff]  }
 0x2fc   : > { %2637 = vmatprep.subr.bf16.mxu0 %v10411_v17  ;;  %9747 = vmatprep.subr.bf16.mxu1 %v11607_v12  ;;  %v10473_v17 = vld [vmem:[#allocation8 + $0x390] ss:$12 sps:$4 sm:$0xff]  }
 0x2fd   : > { %2667 = vmatprep.mubr.bf16.mxu0 %v11198_v51  ;;  %9761 = vmatprep.mubr.msk.bf16.mxu1 %vm11197_vm0, %v11607_v12  ;;  %v10563_v13 = vld [vmem:[#allocation9 + $0x184] ss:$12 sps:$4 sm:$0xff]  }
 0x2ff   : > { %2638 = vmatpush1.bf16.msra.mxu0 %v10409_v19  ;;  %9748 = vmatpush3.bf16.msra.mxu1 %v10412_v20  ;;  %v10479_v19 = vld [vmem:[#allocation8 + $0x37c] ss:$12 sps:$4 sm:$0xff]   ;;  %v10477_v20 = vld [vmem:[#allocation8 + $0x378] ss:$12 sps:$4 sm:$0xff]  }
 0x300   : > { %2639 = vmatprep.subr.bf16.mxu0 %v10415_v21  ;;  %9749 = vmatprep.subr.bf16.mxu1 %v11607_v12  ;;  %v10480_v21 = vld [vmem:[#allocation8 + $0x380] ss:$12 sps:$4 sm:$0xff]  }
 0x303   : > { %2640 = vmatpush1.bf16.msra.mxu0 %v10413_v22  ;;  %9750 = vmatpush3.bf16.msra.mxu1 %v10416_v23  ;;  %v10483_v22 = vld [vmem:[#allocation8 + $0x364] ss:$12 sps:$4 sm:$0xff]   ;;  %v10481_v23 = vld [vmem:[#allocation8 + $0x360] ss:$12 sps:$4 sm:$0xff]  }
 0x304   : > { %2641 = vmatprep.subr.bf16.mxu0 %v10419_v24  ;;  %9751 = vmatprep.subr.bf16.mxu1 %v11607_v12  ;;  %v10484_v24 = vld [vmem:[#allocation8 + $0x368] ss:$12 sps:$4 sm:$0xff]  }
 0x307   : > { %2642 = vmatpush1.bf16.msra.mxu0 %v10417_v25  ;;  %9752 = vmatpush3.bf16.msra.mxu1 %v10420_v26  ;;  %v10487_v25 = vld [vmem:[#allocation8 + $0x34c] ss:$12 sps:$4 sm:$0xff]   ;;  %v10485_v26 = vld [vmem:[#allocation8 + $0x348] ss:$12 sps:$4 sm:$0xff]  }
 0x308   : > { %2643 = vmatprep.subr.bf16.mxu0 %v10423_v9  ;;  %9753 = vmatprep.subr.bf16.mxu1 %v11607_v12  ;;  %v10488_v9 = vld [vmem:[#allocation8 + $0x350] ss:$12 sps:$4 sm:$0xff]  }
 0x30b   : > { %2644 = vmatpush1.bf16.msra.mxu0 %v10421_v27  ;;  %9754 = vmatpush3.bf16.msra.mxu1 %v10424_v28  ;;  %v10491_v27 = vld [vmem:[#allocation8 + $0x334] ss:$12 sps:$4 sm:$0xff]   ;;  %v10489_v28 = vld [vmem:[#allocation8 + $0x330] ss:$12 sps:$4 sm:$0xff]  }
 0x30c   : > { %2645 = vmatprep.subr.bf16.mxu0 %v10427_v30  ;;  %9755 = vmatprep.subr.bf16.mxu1 %v11607_v12  ;;  %v10492_v30 = vld [vmem:[#allocation8 + $0x338] ss:$12 sps:$4 sm:$0xff]  }
 0x30f   : > { %2646 = vmatpush1.bf16.msra.mxu0 %v10425_v32  ;;  %9756 = vmatpush3.bf16.msra.mxu1 %v10428_v33  ;;  %v10495_v32 = vld [vmem:[#allocation8 + $0x31c] ss:$12 sps:$4 sm:$0xff]  }
 0x310   : > { %2647 = vmatprep.subr.bf16.mxu0 %v10431_v34  ;;  %9757 = vmatprep.subr.bf16.mxu1 %v11607_v12  ;;  %v2993_v33 = vld [vmem:[#allocation2 + $0x50] sm:$0xfc]  ;;  %v2994_v34 = vld [vmem:[#allocation2 + $0x48] sm:$0x3] }
 0x313   : > { %2648 = vmatpush1.bf16.msra.mxu0 %v10429_v35  ;;  %9758 = vmatpush3.bf16.msra.mxu1 %v10432_v36  ;;  %v10493_v35 = vld [vmem:[#allocation8 + $0x318] ss:$12 sps:$4 sm:$0xff]   ;;  %v10496_v36 = vld [vmem:[#allocation8 + $0x320] ss:$12 sps:$4 sm:$0xff]  }
 0x314   : > { %2649 = vmatprep.subr.bf16.mxu0 %v10435_v37  ;;  %9759 = vmatprep.subr.bf16.mxu1 %v11607_v12  ;;  %v10499_v37 = vld [vmem:[#allocation8 + $0x304] ss:$12 sps:$4 sm:$0xff]  }
 0x317   : > { %2650 = vmatpush1.bf16.msra.mxu0 %v10433_v38  ;;  %9760 = vmatpush3.bf16.msra.mxu1 %v10436_v39  ;;  %v2995_v38 = vpack.c.bf16 %v11663_v29, %v2993_v33  ;;  %v2996_v39 = vpack.c.bf16 %v2994_v34, %v2994_v34  ;;  %v3295_v29 = vld [vmem:[%s11732_s28 + $0x8] sm:$0xff]  ;;  %v10560_v34 = vld [vmem:[#allocation9 + $0x10c] ss:$12 sps:$4 sm:$0xff]  }
 0x318   : > { %2903 = vmatprep.subr.bf16.mxu0 %v10439_v40  ;;  %9765 = vmatprep.subr.bf16.mxu1 %v11607_v12  ;;  %v10497_v40 = vld [vmem:[#allocation8 + $0x300] ss:$12 sps:$4 sm:$0xff]   ;;  %v10580_v33 = vld [vmem:[#allocation9 + $0x68] ss:$12 sps:$4 sm:$0xff]  }
 0x31a   : > { %2668 = vmatmul.mubr.bf16.vlgmr.msra.gmra.mxu0 %v11669_v31  ;;  %9762 = vmatmul.mubr.bf16.vlgmr.msra.gmra.mxu1 %v11669_v31  ;;  %v10451_v31 = vld [vmem:[#allocation8 + $0x2a4] ss:$12 sps:$4 sm:$0xff]  }
 0x31b   : > { %2904 = vmatpush1.bf16.msra.mxu0 %v10437_v41  ;;  %9766 = vmatpush3.bf16.msra.mxu1 %v10440_v42  ;;  %v10500_v41 = vld [vmem:[#allocation8 + $0x308] ss:$12 sps:$4 sm:$0xff]   ;;  %v10503_v42 = vld [vmem:[#allocation9 + $0xac] ss:$12 sps:$4 sm:$0xff]  }
 0x31c   : > { %2905 = vmatprep.subr.bf16.mxu0 %v10443_v43  ;;  %9767 = vmatprep.subr.bf16.mxu1 %v11607_v12  ;;  %v10452_v12 = vld [vmem:[#allocation8 + $0x2a8] ss:$12 sps:$4 sm:$0xff]   ;;  %v10521_v43 = vld [vmem:[#allocation9 + $0x22c] ss:$12 sps:$4 sm:$0xff]  }
 0x31d   : > { %2935 = vmatprep.mubr.bf16.mxu0 %v11198_v51  ;;  %9781 = vmatprep.mubr.msk.bf16.mxu1 %vm11197_vm0, %v11701_v47 }
 0x31f   : > { %2906 = vmatpush1.bf16.msra.mxu0 %v10441_v44  ;;  %9768 = vmatpush3.bf16.msra.mxu1 %v10444_v45  ;;  %v3031_v44 = vrot.slane %v2995_v38, 1  ;;  %v3032_v45 = vrot.slane %v2996_v39, 1  ;;  %v10566_v38 = vld [vmem:[#allocation9 + $0xf4] ss:$12 sps:$4 sm:$0xff]   ;;  %v10585_v39 = vld [vmem:[#allocation9 + $0xf8] ss:$12 sps:$4 sm:$0xff]  }
 0x320   : > { %2907 = vmatprep.subr.bf16.mxu0 %v10447_v46  ;;  %9769 = vmatprep.subr.bf16.mxu1 %v11701_v47  ;;  %v10501_v46 = vld [vmem:[#allocation9 + $0xa8] ss:$12 sps:$4 sm:$0xff]  }
 0x323   : > { %2908 = vmatpush1.bf16.msra.mxu0 %v10445_v48  ;;  %9770 = vmatpush3.bf16.msra.mxu1 %v10448_v49  ;;  %v10519_v48 = vld [vmem:[#allocation9 + $0x228] ss:$12 sps:$4 sm:$0xff]  }
 0x324   : > { %2909 = vmatprep.subr.bf16.mxu0 %v10451_v31  ;;  %9771 = vmatprep.subr.bf16.mxu1 %v11701_v47  ;;  %v10506_v49 = vld [vmem:[#allocation9 + $0x94] ss:$12 sps:$4 sm:$0xff]  }
 0x325   : > { %v10527_v31 = vld [vmem:[#allocation9 + $0x214] ss:$12 sps:$4 sm:$0xff]  }
 0x327   : > { %2910 = vmatpush1.bf16.msra.mxu0 %v10449_v50  ;;  %9772 = vmatpush3.bf16.msra.mxu1 %v10452_v12  ;;  %v3033_v50 = vsel %vm1839_vm4, %v3031_v44, %v3032_v45  ;;  %v11736_v12 = vpack.c.bf16 %v3295_v29, %v3295_v29  ;;  %v10569_v44 = vld [vmem:[#allocation9 + $0xd8] ss:$12 sps:$4 sm:$0xff]   ;;  %v10589_v45 = vld [vmem:[#allocation9 + $0x20] ss:$12 sps:$4 sm:$0xff]  }
 0x328   : > { %2911 = vmatprep.subr.bf16.mxu0 %v10455_v52  ;;  %9773 = vmatprep.subr.bf16.mxu1 %v11701_v47  ;;  %v10504_v52 = vld [vmem:[#allocation9 + $0x90] ss:$12 sps:$4 sm:$0xff]  }
 0x329   : > { %v10576_v29 = vld [vmem:[#allocation9 + $0xc4] ss:$12 sps:$4 sm:$0xff]  }
 0x32b   : > { %2912 = vmatpush1.bf16.msra.mxu0 %v10453_v54  ;;  %9774 = vmatpush3.bf16.msra.mxu1 %v10456_v55  ;;  %v10509_v54 = vld [vmem:[#allocation9 + $0x7c] ss:$12 sps:$4 sm:$0xff]  }
 0x32c   : > { %2913 = vmatprep.subr.bf16.mxu0 %v10459_v56  ;;  %9775 = vmatprep.subr.bf16.mxu1 %v11701_v47  ;;  %v10533_v55 = vld [vmem:[#allocation9 + $0x1fc] ss:$12 sps:$4 sm:$0xff]   ;;  %v10507_v56 = vld [vmem:[#allocation9 + $0x78] ss:$12 sps:$4 sm:$0xff]  }
 0x32f   : > { %2914 = vmatpush1.bf16.msra.mxu0 %v10457_v59  ;;  %9776 = vmatpush3.bf16.msra.mxu1 %v10460_v60  ;;  %v10539_v59 = vld [vmem:[#allocation9 + $0x1e4] ss:$12 sps:$4 sm:$0xff]   ;;  %v10510_v60 = vld [vmem:[#allocation9 + $0x60] ss:$12 sps:$4 sm:$0xff]  }
 0x330   : > { %2915 = vmatprep.subr.bf16.mxu0 %v10463_v62  ;;  %9777 = vmatprep.subr.bf16.mxu1 %v11701_v47  ;;  %v10537_v62 = vld [vmem:[#allocation9 + $0x1e0] ss:$12 sps:$4 sm:$0xff]  }
 0x333   : > { %2916 = vmatpush1.bf16.msra.mxu0 %v10461_v0  ;;  %9778 = vmatpush3.bf16.msra.mxu1 %v10464_v2  ;;  %v10543_v0 = vld [vmem:[#allocation9 + $0x1c8] ss:$12 sps:$4 sm:$0xff]  }
 0x334   : > { %2917 = vmatprep.subr.bf16.mxu0 %v10467_v3  ;;  %9779 = vmatprep.subr.bf16.mxu1 %v11701_v47  ;;  %v10518_v2 = vld [vmem:[#allocation9 + $0x34] ss:$12 sps:$4 sm:$0xff]  }
 0x335   : > { %v10551_v3 = vld [vmem:[#allocation9 + $0x1b4] ss:$12 sps:$4 sm:$0xff]  }
 0x337   : > { %2918 = vmatpush1.bf16.msra.mxu0 %v10465_v6  ;;  %9780 = vmatpush3.bf16.msra.mxu1 %v10468_v7  ;;  %v10524_v6 = vld [vmem:[#allocation9 + $0x1c] ss:$12 sps:$4 sm:$0xff]  }
 0x338   : > { %3163 = vmatprep.subr.bf16.mxu0 %v10471_v10  ;;  %9785 = vmatprep.subr.bf16.mxu1 %v11701_v47  ;;  %v10557_v7 = vld [vmem:[#allocation9 + $0x19c] ss:$12 sps:$4 sm:$0xff]   ;;  %v10555_v10 = vld [vmem:[#allocation9 + $0x198] ss:$12 sps:$4 sm:$0xff]  }
 0x33a   : > { %2936 = vmatmul.mubr.bf16.vlgmr.msra.gmra.mxu0 %v2773_v16  ;;  %9782 = vmatmul.mubr.bf16.vlgmr.msra.gmra.mxu1 %v2773_v16  ;;  %v10536_v16 = vld [vmem:[#allocation9 + $0x16c] ss:$12 sps:$4 sm:$0xff]  }
 0x33b   : > { %3164 = vmatpush1.bf16.msra.mxu0 %v10469_v14  ;;  %9786 = vmatpush3.bf16.msra.mxu1 %v10472_v61  ;;  %v10528_v14 = vld [vmem:[#allocation9] ss:$12 sps:$4 sm:$0xff]  }
 0x33c   : > { %3165 = vmatprep.subr.bf16.mxu0 %v10475_v15  ;;  %9787 = vmatprep.subr.bf16.mxu1 %v11701_v47  ;;  %v10561_v61 = vld [vmem:[#allocation9 + $0x180] ss:$12 sps:$4 sm:$0xff]   ;;  %v3296_v15 = vld [vmem:[%s11732_s28 + $0x10] sm:$0xff] }
 0x33d   : > { %3195 = vmatprep.mubr.bf16.mxu0 %v11198_v51  ;;  %9801 = vmatprep.mubr.msk.bf16.mxu1 %vm11197_vm0, %v11701_v47 }
 0x33f   : > { %3166 = vmatpush1.bf16.msra.mxu0 %v10473_v17  ;;  %9788 = vmatpush3.bf16.msra.mxu1 %v10476_v18  ;;  %v10567_v17 = vld [vmem:[#allocation9 + $0x170] ss:$12 sps:$4 sm:$0xff]   ;;  %v11741_v18 = vpack.c.bf16 %v3296_v15, %v3296_v15  ;;  %v10603_v15 = vld [vmem:[#allocation11 + $0x120] sm:$0xff]  }
 0x340   : > { %3167 = vmatprep.subr.bf16.mxu0 %v10479_v19  ;;  %9789 = vmatprep.subr.bf16.mxu1 %v11701_v47  ;;  %v10534_v19 = vld [vmem:[#allocation9 + $0x168] ss:$12 sps:$4 sm:$0xff]  }
 0x343   : > { %3168 = vmatpush1.bf16.msra.mxu0 %v10477_v20  ;;  %9790 = vmatpush3.bf16.msra.mxu1 %v10480_v21  ;;  %v10568_v20 = vld [vmem:[#allocation9 + $0xb0] ss:$12 sps:$4 sm:$0xff]   ;;  %v10542_v21 = vld [vmem:[#allocation9 + $0x154] ss:$12 sps:$4 sm:$0xff]  }
 0x344   : > { %3169 = vmatprep.subr.bf16.mxu0 %v10483_v22  ;;  %9791 = vmatprep.subr.bf16.mxu1 %v11701_v47  ;;  %v10572_v22 = vld [vmem:[#allocation9 + $0x158] ss:$12 sps:$4 sm:$0xff]  }
 0x347   : > { %3170 = vmatpush1.bf16.msra.mxu0 %v10481_v23  ;;  %9792 = vmatpush3.bf16.msra.mxu1 %v10484_v24  ;;  %v10540_v23 = vld [vmem:[#allocation9 + $0x150] ss:$12 sps:$4 sm:$0xff]   ;;  %v10573_v24 = vld [vmem:[#allocation9 + $0x98] ss:$12 sps:$4 sm:$0xff]  }
 0x348   : > { %3171 = vmatprep.subr.bf16.mxu0 %v10487_v25  ;;  %9793 = vmatprep.subr.bf16.mxu1 %v11701_v47  ;;  %v10548_v25 = vld [vmem:[#allocation9 + $0x13c] ss:$12 sps:$4 sm:$0xff]  }
 0x34b   : > { %3172 = vmatpush1.bf16.msra.mxu0 %v10485_v26  ;;  %9794 = vmatpush3.bf16.msra.mxu1 %v10488_v9  ;;  %v10577_v26 = vld [vmem:[#allocation9 + $0x140] ss:$12 sps:$4 sm:$0xff]   ;;  %v10546_v9 = vld [vmem:[#allocation9 + $0x138] ss:$12 sps:$4 sm:$0xff]  }
 0x34c   : > { %3173 = vmatprep.subr.bf16.mxu0 %v10491_v27  ;;  %9795 = vmatprep.subr.bf16.mxu1 %v11701_v47  ;;  %v10578_v27 = vld [vmem:[#allocation9 + $0x80] ss:$12 sps:$4 sm:$0xff]  }
 0x34f   : > { %3174 = vmatpush1.bf16.msra.mxu0 %v10489_v28  ;;  %9796 = vmatpush3.bf16.msra.mxu1 %v10492_v30  ;;  %v10554_v28 = vld [vmem:[#allocation9 + $0x124] ss:$12 sps:$4 sm:$0xff]   ;;  %v10579_v30 = vld [vmem:[#allocation9 + $0x128] ss:$12 sps:$4 sm:$0xff]  }
 0x350   : > { %3175 = vmatprep.subr.bf16.mxu0 %v10495_v32  ;;  %9797 = vmatprep.subr.bf16.mxu1 %v11701_v47  ;;  %v10552_v32 = vld [vmem:[#allocation9 + $0x120] ss:$12 sps:$4 sm:$0xff]  }
 0x353   : > { %3176 = vmatpush1.bf16.msra.mxu0 %v10493_v35  ;;  %9798 = vmatpush3.bf16.msra.mxu1 %v10496_v36  ;;  %v10582_v35 = vld [vmem:[#allocation9 + $0x110] ss:$12 sps:$4 sm:$0xff]   ;;  %v10558_v36 = vld [vmem:[#allocation9 + $0x108] ss:$12 sps:$4 sm:$0xff]  }
 0x354   : > { %3177 = vmatprep.subr.bf16.mxu0 %v10499_v37  ;;  %9799 = vmatprep.subr.bf16.mxu1 %v11701_v47  ;;  %v10583_v37 = vld [vmem:[#allocation9 + $0x50] ss:$12 sps:$4 sm:$0xff]  }
 0x357   : > { %3178 = vmatpush1.bf16.msra.mxu0 %v10497_v40  ;;  %9800 = vmatpush3.bf16.msra.mxu1 %v10500_v41  ;;  %v10564_v40 = vld [vmem:[#allocation9 + $0xf0] ss:$12 sps:$4 sm:$0xff]   ;;  %v10586_v41 = vld [vmem:[#allocation9 + $0x38] ss:$12 sps:$4 sm:$0xff]  }
 0x358   : > { %3797 = vmatprep.subr.bf16.mxu0 %v10503_v42  ;;  %3838 = vmatprep.subr.bf16.mxu1 %v10521_v43  ;;  %v10571_v42 = vld [vmem:[#allocation9 + $0xdc] ss:$12 sps:$4 sm:$0xff]   ;;  %v10588_v43 = vld [vmem:[#allocation9 + $0xe0] ss:$12 sps:$4 sm:$0xff]  }
 0x35a   : > { %3196 = vmatmul.mubr.bf16.vlgmr.msra.gmra.mxu0 %v3033_v50  ;;  %9802 = vmatmul.mubr.bf16.vlgmr.msra.gmra.mxu1 %v3033_v50 }
 0x35b   : > { %3798 = vmatpush1.bf16.msra.mxu0 %v10501_v46  ;;  %3839 = vmatpush1.bf16.msra.mxu1 %v10519_v48  ;;  %v10591_v46 = vld [vmem:[#allocation9 + $0xc8] ss:$12 sps:$4 sm:$0xff]   ;;  %v10574_v48 = vld [vmem:[#allocation9 + $0xc0] ss:$12 sps:$4 sm:$0xff]  }
 0x35c   : > { %3799 = vmatprep.subr.bf16.mxu0 %v10506_v49  ;;  %3840 = vmatprep.subr.bf16.mxu1 %v10527_v31  ;;  %v3294_v49 = vld [vmem:[%s11732_s28] sm:$0xff]  ;;  %s930_s28 = scalar_lea.vmem %s12218_s21, %s11725_s20  ;;  %s12150_s20 = scalar_lea.sflag [#allocation5], %s875_s25 }
 0x35d   : > { %3870 = vmatprep.mubr.bf16.mxu1 %v11198_v51  ;;  %3829 = vmatprep.mubr.bf16.mxu0 %v11736_v12  ;;  %v10513_v51 = vld [vmem:[#allocation9 + $0x48] ss:$12 sps:$4 sm:$0xff]   ;;  %v3297_v50 = vpack.c.bf16 %v3294_v49, %v3294_v49 }
 0x35e   : > { %v10592_v31 = vld [vmem:[#allocation9 + $0x8] ss:$12 sps:$4 sm:$0xff]  }
 0x35f   : > { %3800 = vmatpush1.bf16.msra.mxu0 %v10504_v52  ;;  %3841 = vmatpush1.bf16.msra.mxu1 %v10525_v53  ;;  %v10584_v53 = vld [vmem:[#allocation9 + $0x218] ss:$12 sps:$4 sm:$0xff]  }
 0x360   : > { %3801 = vmatprep.subr.bf16.mxu0 %v10509_v54  ;;  %3842 = vmatprep.subr.bf16.mxu1 %v10533_v55 }
 0x363   : > { %3802 = vmatpush1.bf16.msra.mxu0 %v10507_v56  ;;  %3843 = vmatpush1.bf16.msra.mxu1 %v10531_v57  ;;  %v10587_v56 = vld [vmem:[#allocation9 + $0x200] ss:$12 sps:$4 sm:$0xff]  }
 0x364   : > { %3803 = vmatprep.subr.bf16.mxu0 %v10512_v58  ;;  %3844 = vmatprep.subr.bf16.mxu1 %v10539_v59  ;;  %v10590_v58 = vld [vmem:[#allocation9 + $0x1e8] ss:$12 sps:$4 sm:$0xff]   ;;  %v10593_v59 = vld [vmem:[#allocation9 + $0x1d0] ss:$12 sps:$4 sm:$0xff]  }
 0x367   : > { %3804 = vmatpush1.bf16.msra.mxu0 %v10510_v60  ;;  %3845 = vmatpush1.bf16.msra.mxu1 %v10537_v62  ;;  %v10594_v60 = vld [vmem:[#allocation9 + $0x1b8] ss:$12 sps:$4 sm:$0xff]   ;;  %v10595_v62 = vld [vmem:[#allocation9 + $0x1a0] ss:$12 sps:$4 sm:$0xff]  }
 0x368   : > { %3805 = vmatprep.subr.bf16.mxu0 %v10515_v63  ;;  %3846 = vmatprep.subr.bf16.mxu1 %v10545_v1  ;;  %v10596_v63 = vld [vmem:[#allocation9 + $0x188] ss:$12 sps:$4 sm:$0xff]  }
 0x36b   : > { %3806 = vmatpush1.bf16.msra.mxu0 %v10513_v51  ;;  %3847 = vmatpush1.bf16.msra.mxu1 %v10543_v0 }
 0x36c   : > { %3807 = vmatprep.subr.bf16.mxu0 %v10518_v2  ;;  %3848 = vmatprep.subr.bf16.mxu1 %v10551_v3 }
 0x36f   : > { %3808 = vmatpush1.bf16.msra.mxu0 %v10516_v4  ;;  %3849 = vmatpush1.bf16.msra.mxu1 %v10549_v5  ;;  %v10597_v5 = vld [vmem:[#allocation11 + $0x138] sm:$0xff]  }
 0x370   : > { %3809 = vmatprep.subr.bf16.mxu0 %v10524_v6  ;;  %3850 = vmatprep.subr.bf16.mxu1 %v10557_v7  ;;  %v10598_v6 = vld [vmem:[#allocation11 + $0xf8] sm:$0xff]   ;;  %v10599_v7 = vld [vmem:[#allocation11 + $0x130] sm:$0xff]  }
 0x373   : > { %3810 = vmatpush1.bf16.msra.mxu0 %v10522_v8  ;;  %3851 = vmatpush1.bf16.msra.mxu1 %v10555_v10  ;;  %v10600_v10 = vld [vmem:[#allocation11 + $0xf0] sm:$0xff]  }
 0x374   : > { %3811 = vmatprep.subr.bf16.mxu0 %v10530_v11  ;;  %3852 = vmatprep.subr.bf16.mxu1 %v10563_v13  ;;  %v10601_v11 = vld [vmem:[#allocation11 + $0x128] sm:$0xff]  }
 0x377   : > { %3812 = vmatpush1.bf16.msra.mxu0 %v10528_v14  ;;  %3853 = vmatpush1.bf16.msra.mxu1 %v10561_v61  ;;  %v10602_v14 = vld [vmem:[#allocation11 + $0xe8] sm:$0xff]  }
 0x378   : > { %3813 = vmatprep.subr.bf16.mxu0 %v10536_v16  ;;  %9112 = vmatprep.subr.bf16.mxu1 %v10567_v17  ;;  %v10604_v17 = vld [vmem:[#allocation11 + $0xe0] sm:$0xff]  }
 0x37a   : > { %3871 = vmatmul.mubr.bf16.vlgmr.msra.gmra.mxu1 %v11741_v18 }
 0x37b   : > { %3814 = vmatpush2.bf16.msra.mxu0 %v10534_v19  ;;  %9113 = vmatpush3.bf16.msra.mxu1 %v10568_v20  ;;  %v10606_v19 = vld [vmem:[#allocation11 + $0xd8] sm:$0xff]   ;;  %v10607_v20 = vld [vmem:[#allocation11 + $0x110] sm:$0xff]  }
 0x37c   : > { %3815 = vmatprep.subr.bf16.mxu0 %v10542_v21  ;;  %9114 = vmatprep.subr.bf16.mxu1 %v10572_v22  ;;  %v10612_v22 = vld [vmem:[#allocation11 + $0x178] sm:$0xff]  }
 0x37d   : > { %3911 = vmatprep.mubr.bf16.mxu1 %v11736_v12  ;;  %v10581_v12 = vld [vmem:[#allocation9 + $0x230] ss:$12 sps:$4 sm:$0xff]  }
 0x37f   : > { %3816 = vmatpush2.bf16.msra.mxu0 %v10540_v23  ;;  %9115 = vmatpush3.bf16.msra.mxu1 %v10573_v24  ;;  %v10608_v23 = vld [vmem:[#allocation11 + $0xd0] sm:$0xff]   ;;  %v10609_v24 = vld [vmem:[#allocation11 + $0x108] sm:$0xff]  }
 0x380   : > { %3817 = vmatprep.subr.bf16.mxu0 %v10548_v25  ;;  %9116 = vmatprep.subr.bf16.mxu1 %v10577_v26  ;;  %v10610_v26 = vld [vmem:[#allocation11 + $0xc8] sm:$0xff]  }
 0x383   : > { %3818 = vmatpush2.bf16.msra.mxu0 %v10546_v9  ;;  %9117 = vmatpush3.bf16.msra.mxu1 %v10578_v27  ;;  %v10611_v9 = vld [vmem:[#allocation11 + $0x100] sm:$0xff]  }
 0x384   : > { %3819 = vmatprep.subr.bf16.mxu0 %v10554_v28  ;;  %9118 = vmatprep.subr.bf16.mxu1 %v10579_v30  ;;  %v10613_v30 = vld [vmem:[#allocation11 + $0xc0] sm:$0xff]  }
 0x387   : > { %3820 = vmatpush2.bf16.msra.mxu0 %v10552_v32  ;;  %9119 = vmatpush3.bf16.msra.mxu1 %v10580_v33  ;;  %v10614_v33 = vld [vmem:[#allocation11 + $0x170] sm:$0xff]  }
 0x388   : > { %3821 = vmatprep.subr.bf16.mxu0 %v10560_v34  ;;  %9120 = vmatprep.subr.bf16.mxu1 %v10582_v35  ;;  %v10615_v34 = vld [vmem:[#allocation11 + $0x78] sm:$0xff]  }
 0x38b   : > { %3822 = vmatpush2.bf16.msra.mxu0 %v10558_v36  ;;  %9121 = vmatpush3.bf16.msra.mxu1 %v10583_v37  ;;  %v10617_v36 = vld [vmem:[#allocation11 + $0x168] sm:$0xff]  }
 0x38c   : > { %3823 = vmatprep.subr.bf16.mxu0 %v10566_v38  ;;  %9122 = vmatprep.subr.bf16.mxu1 %v10585_v39 }
 0x38f   : > { %3824 = vmatpush2.bf16.msra.mxu0 %v10564_v40  ;;  %9123 = vmatpush3.bf16.msra.mxu1 %v10586_v41  ;;  %v10620_v40 = vld [vmem:[#allocation11 + $0x160] sm:$0xff]  }
 0x390   : > { %3825 = vmatprep.subr.bf16.mxu0 %v10571_v42  ;;  %9124 = vmatprep.subr.bf16.mxu1 %v10588_v43 }
 0x393   : > { %3826 = vmatpush2.bf16.msra.mxu0 %v10569_v44  ;;  %9125 = vmatpush3.bf16.msra.mxu1 %v10589_v45  ;;  %v10623_v44 = vld [vmem:[#allocation11 + $0x158] sm:$0xff]  }
 0x394   : > { %3827 = vmatprep.subr.bf16.mxu0 %v10576_v29  ;;  %9126 = vmatprep.subr.bf16.mxu1 %v10591_v46  ;;  %v10626_v29 = vld [vmem:[#allocation11 + $0x150] sm:$0xff]  }
 0x397   : > { %3828 = vmatpush2.bf16.msra.mxu0 %v10574_v48  ;;  %9127 = vmatpush3.bf16.msra.mxu1 %v10592_v31  ;;  %v10629_v48 = vld [vmem:[#allocation11 + $0x148] sm:$0xff]  }
 0x398   : > { %9805 = vmatprep.subr.bf16.mxu0 %v11701_v47  ;;  %9143 = vmatprep.subr.bf16.mxu1 %v10597_v5 }
 0x39a   : > { %3830 = vmatmul.mubr.bf16.vlgmr.msra.gmra.mxu0 %v3297_v50  ;;  %v2248_v52 = vpop.f32.mrf.mxu1  ;;  %3912 = vmatmul.mubr.bf16.vlgmr.msra.gmra.mxu1 %v3297_v50  ;;  %v11765_v16 = vpop.f32.mrf.mxu0  ;;  %v3255_v50 = vlaneseq }
 0x39b   : > { %9806 = vmatpush3.bf16.msra.mxu0 %v10581_v12  ;;  %9821 = vmatprep.mubr.msk.bf16.mxu0 %vm11197_vm0, %v11701_v47  ;;  %v10632_v12 = vld [vmem:[#allocation11 + $0x140] sm:$0xff]  }
 0x39c   : > { %v9723_v54 = vpop.f32.mrf.mxu1  ;;  %9807 = vmatprep.subr.bf16.mxu0 %v11701_v47  ;;  %9144 = vmatpush3.bf16.msra.mxu1 %v10598_v6  ;;  %v11767_v21 = vpop.f32.mrf.mxu0 }
 0x39d   : > { %9145 = vmatprep.subr.bf16.mxu1 %v10599_v7  ;;  %v11775_v54 = vld [vmem:[#allocation11 + $0xb8] sm:$0xff]  }
 0x39e   : > { %v2251_v55 = vpop.f32.mrf.mxu1  ;;  %v11769_v25 = vpop.f32.mrf.mxu0 }
 0x39f   : > { %9808 = vmatpush3.bf16.msra.mxu0 %v10584_v53  ;;  %v11773_v53 = vshrl.u32 %v3255_v50, 7 }
 0x3a0   : > { %v9724_v57 = vpop.f32.mrf.mxu1  ;;  %9809 = vmatprep.subr.bf16.mxu0 %v11701_v47  ;;  %9146 = vmatpush3.bf16.msra.mxu1 %v10600_v10  ;;  %v11771_v27 = vpop.f32.mrf.mxu0 }
 0x3a1   : > { %9147 = vmatprep.subr.bf16.mxu1 %v10601_v11  ;;  %v3265_v57 = vsub.s32 2, %v11773_v53 }
 0x3a3   : > { %9810 = vmatpush3.bf16.msra.mxu0 %v10587_v56  ;;  %v3257_v56 = vsub.s32 0, %v11773_v53 }
 0x3a4   : > { %9811 = vmatprep.subr.bf16.mxu0 %v11701_v47  ;;  %9148 = vmatpush3.bf16.msra.mxu1 %v10602_v14 }
 0x3a5   : > { %9149 = vmatprep.subr.bf16.mxu1 %v10603_v15 }
 0x3a7   : > { %9812 = vmatpush3.bf16.msra.mxu0 %v10590_v58 }
 0x3a8   : > { %9813 = vmatprep.subr.bf16.mxu0 %v11701_v47  ;;  %9150 = vmatpush3.bf16.msra.mxu1 %v10604_v17 }
 0x3ab   : > { %9814 = vmatpush3.bf16.msra.mxu0 %v10593_v59  ;;  %v3253_v59 = vld [vmem:[%s12279_s5] sm:$0x7]  ;;  %s12280_s5 = sld [smem:[#allocation40_spill]] }
 0x3ac   : > { %9815 = vmatprep.subr.bf16.mxu0 %v11701_v47 }
 0x3af   : > { %9816 = vmatpush3.bf16.msra.mxu0 %v10594_v60  ;;  %v3261_v60 = vsub.s32 1, %v11773_v53 }
 0x3b0   : > { %9817 = vmatprep.subr.bf16.mxu0 %v11701_v47 }
 0x3b1   : > { %v3262_v14 = vrot.slane %v3253_v59, %v3261_v60  ;;  %s12281_s17 = smov %s12280_s5 }
 0x3b3   : > { %9818 = vmatpush3.bf16.msra.mxu0 %v10595_v62 }
 0x3b4   : > { %9819 = vmatprep.subr.bf16.mxu0 %v11701_v47 }
 0x3b7   : > { %9820 = vmatpush3.bf16.msra.mxu0 %v10596_v63 }
 0x3b8   : > { %9825 = vmatprep.subr.bf16.mxu0 %v10612_v22 }
 0x3ba   : > { %v2466_v1 = vpop.f32.mrf.mxu1  ;;  %9822 = vmatmul.mubr.bf16.vlgmr.msra.gmra.mxu0 %v11741_v18  ;;  %v10605_v18 = vld [vmem:[#allocation11 + $0x118] sm:$0xff]   ;;  %v2423_v28 = vpop.f32.mrf.mxu0 }
 0x3bb   : > { %v11757_v51 = vadd.f32 %v2466_v1, %v2248_v52  ;;  %9151 = vmatprep.subr.bf16.mxu1 %v10605_v18  ;;  %9826 = vmatpush3.bf16.msra.mxu0 %v10612_v22  ;;  %v2424_v58 = vadd.f32 %v2423_v28, %v11765_v16 }
 0x3bc   : > { %v9743_v0 = vpop.f32.mrf.mxu1  ;;  %9152 = vmatpush3.bf16.msra.mxu1 %v10606_v19  ;;  %v2425_v32 = vpop.f32.mrf.mxu0  ;;  %9827 = vmatprep.subr.bf16.mxu0 %v10614_v33 }
 0x3bd   : > { %9153 = vmatprep.subr.bf16.mxu1 %v10607_v20  ;;  %v2426_v62 = vadd.f32 %v2425_v32, %v11767_v21 }
 0x3be   : > { %v2469_v2 = vpop.f32.mrf.mxu1  ;;  %v2427_v35 = vpop.f32.mrf.mxu0 }
 0x3bf   : > { %v11759_v3 = vadd.f32 %v2469_v2, %v2251_v55  ;;  %9828 = vmatpush3.bf16.msra.mxu0 %v10614_v33  ;;  %v3258_v2 = vrot.slane %v3253_v59, %v3257_v56  ;;  %v2428_v5 = vadd.f32 %v2427_v35, %v11769_v25 }
 0x3c0   : > { %v9744_v4 = vpop.f32.mrf.mxu1  ;;  %9154 = vmatpush3.bf16.msra.mxu1 %v10608_v23  ;;  %9829 = vmatprep.subr.bf16.mxu0 %v10617_v36  ;;  %v2429_v38 = vpop.f32.mrf.mxu0 }
 0x3c1   : > { %9155 = vmatprep.subr.bf16.mxu1 %v10609_v24  ;;  %v3266_v4 = vrot.slane %v3253_v59, %v3265_v57  ;;  %v2430_v16 = vadd.f32 %v2429_v38, %v11771_v27 }
 0x3c3   : > { %9830 = vmatpush3.bf16.msra.mxu0 %v10617_v36 }
 0x3c4   : > { %9156 = vmatpush3.bf16.msra.mxu1 %v10610_v26  ;;  %9831 = vmatprep.subr.bf16.mxu0 %v10620_v40 }
 0x3c5   : > { %9157 = vmatprep.subr.bf16.mxu1 %v10611_v9 }
 0x3c7   : > { %9832 = vmatpush3.bf16.msra.mxu0 %v10620_v40 }
 0x3c8   : > { %9158 = vmatpush3.bf16.msra.mxu1 %v10613_v30  ;;  %9833 = vmatprep.subr.bf16.mxu0 %v10623_v44 }
 0x3c9   : > { %9181 = vmatprep.subr.bf16.mxu1 %v10615_v34 }
 0x3cb   : > { %9834 = vmatpush3.bf16.msra.mxu0 %v10623_v44 }
 0x3cc   : > { %9835 = vmatprep.subr.bf16.mxu0 %v10626_v29 }
 0x3cf   : > { %9836 = vmatpush3.bf16.msra.mxu0 %v10626_v29 }
 0x3d0   : > { %9837 = vmatprep.subr.bf16.mxu0 %v10629_v48 }
 0x3d3   : > { %9838 = vmatpush3.bf16.msra.mxu0 %v10629_v48 }
 0x3d4   : > { %9839 = vmatprep.subr.bf16.mxu0 %v10632_v12 }
 0x3d7   : > { %9840 = vmatpush3.bf16.msra.mxu0 %v10632_v12 }
 0x3d8   : > { %9845 = vmatprep.subr.bf16.mxu0 %v11775_v54 }
 0x3da   : > { %v11761_v8 = vpop.f32.mrf.mxu1  ;;  %v2669_v41 = vpop.f32.mrf.mxu0 }
 0x3db   : > { %v2719_v63 = vadd.f32 %v2669_v41, %v2424_v58  ;;  %v2721_v1 = vadd.f32 %v11761_v8, %v11757_v51 }
 0x3dc   : > { %v9763_v47 = vpop.f32.mrf.mxu1  ;;  %v2671_v45 = vpop.f32.mrf.mxu0 }
 0x3dd   : > { %v2720_v6 = vadd.f32 %v2671_v45, %v2426_v62 }
 0x3de   : > { %v11763_v13 = vpop.f32.mrf.mxu1  ;;  %v2673_v46 = vpop.f32.mrf.mxu0 }
 0x3df   : > { %v2722_v51 = vadd.f32 %v2673_v46, %v2428_v5  ;;  %v2724_v17 = vadd.f32 %v11763_v13, %v11759_v3 }
 0x3e0   : > { %v9764_v61 = vpop.f32.mrf.mxu1  ;;  %v2675_v49 = vpop.f32.mrf.mxu0 }
 0x3e1   : > { %v2723_v24 = vadd.f32 %v2675_v49, %v2430_v16 }
 0x3fa   : > { %v2980_v37 = vpop.f32.mrf.mxu1  ;;  %v2937_v31 = vpop.f32.mrf.mxu0 }
 0x3fb   : > { %v2987_v7 = vadd.f32 %v2937_v31, %v2719_v63  ;;  %v2989_v10 = vadd.f32 %v2980_v37, %v2721_v1 }
 0x3fc   : > { %v9783_v39 = vpop.f32.mrf.mxu1  ;;  %v2939_v52 = vpop.f32.mrf.mxu0 }
 0x3fd   : > { %v2988_v8 = vadd.f32 %v2939_v52, %v2720_v6 }
 0x3fe   : > { %v2983_v42 = vpop.f32.mrf.mxu1  ;;  %v2941_v55 = vpop.f32.mrf.mxu0 }
 0x3ff   : > { %v2990_v20 = vadd.f32 %v2941_v55, %v2722_v51  ;;  %v2992_v25 = vadd.f32 %v2983_v42, %v2724_v17 }
 0x400   : > { %v9784_v43 = vpop.f32.mrf.mxu1  ;;  %v2943_v0 = vpop.f32.mrf.mxu0 }
 0x401   : > { %v2991_v27 = vadd.f32 %v2943_v0, %v2723_v24  ;;  %v4041_v24 = vld [vmem:[#allocation2] sm:$0x80] }
 0x41a   : > { %v3197_v47 = vpop.f32.mrf.mxu0  ;;  %v3240_v11 = vpop.f32.mrf.mxu1 }
 0x41b   : > { %v3247_v61 = vadd.f32 %v3197_v47, %v2987_v7  ;;  %v3249_v15 = vadd.f32 %v3240_v11, %v2989_v10 }
 0x41c   : > { %v3199_v18 = vpop.f32.mrf.mxu0  ;;  %v9803_v19 = vpop.f32.mrf.mxu1 }
 0x41d   : > { %v3270_v21 = vadd.f32 %v3258_v2, %v3247_v61  ;;  %v3272_v22 = vadd.f32 %v3266_v4, %v3249_v15  ;;  %v3248_v23 = vadd.f32 %v3199_v18, %v2988_v8 }
 0x41e   : > { %v3201_v26 = vpop.f32.mrf.mxu0  ;;  %v3243_v9 = vpop.f32.mrf.mxu1 }
 0x41f   : > { %v3276_v28 = vmul.f32 0.2, %v3270_v21  ;;  %v3278_v30 = vmul.f32 0.2, %v3272_v22  ;;  %v3271_v32 = vadd.f32 %v3262_v14, %v3248_v23  ;;  %v3250_v33 = vadd.f32 %v3201_v26, %v2990_v20  ;;  %v4040_v26 = vld [vmem:[#allocation2 + $0x60] sm:$0x80] }
 0x420   : > { %v3252_v34 = vadd.f32 %v3243_v9, %v2992_v25  ;;  %v3203_v35 = vpop.f32.mrf.mxu0  ;;  %v9804_v3 = vpop.f32.mrf.mxu1 }
 0x421   : > { %v11801_v13 = vmax.f32 %v3270_v21, %v3276_v28  ;;  %v11803_v36 = vmax.f32 %v3272_v22, %v3278_v30  ;;  %v3277_v37 = vmul.f32 0.2, %v3271_v32  ;;  %v3273_v38 = vadd.f32 %v3258_v2, %v3250_v33  ;;  %v11851_v2 = vld [vmem:[%s12206_s9] sm:$0x7]  ;;  %v4968_v21 = vld [vmem:[#allocation2 + $0x18] sm:$0x1] }
 0x422   : > { %v3275_v39 = vadd.f32 %v3266_v4, %v3252_v34  ;;  %v3251_v40 = vadd.f32 %v3203_v35, %v2991_v27  ;;  %v3401_v4 = vrot.slane %v11851_v2, %v3257_v56  ;;  %v3405_v5 = vrot.slane %v11851_v2, %v3261_v60  ;;  %v5322_v22 = vld [vmem:[#allocation2 + $0x18] sm:$0x3] }
 0x423   : > { %3288 = vst [vmem:[%s11805_s4] sm:$0xff] %v11801_v13  ;;  %3965 = vst [vmem:[#allocation2 + $0x50] sm:$0xff] %v11801_v13  ;;  %v11813_v41 = vmax.f32 %v3271_v32, %v3277_v37  ;;  %v3279_v42 = vmul.f32 0.2, %v3273_v38  ;;  %v4046_v3 = vpack.c.bf16 %v11801_v13, %v4040_v26 }
 0x424   : > { %3290 = vst [vmem:[%s11805_s4 + $0x10] sm:$0xff] %v11803_v36  ;;  %3967 = vst [vmem:[#allocation2 + $0x28] sm:$0xff] %v11803_v36  ;;  %v3281_v43 = vmul.f32 0.2, %v3275_v39  ;;  %v3274_v44 = vadd.f32 %v3262_v14, %v3251_v40 }
 0x425   : > { %3289 = vst [vmem:[%s11805_s4 + $0x8] sm:$0xff] %v11813_v41  ;;  %3966 = vst [vmem:[#allocation2 + $0x68] sm:$0xff] %v11813_v41  ;;  %v11818_v45 = vmax.f32 %v3273_v38, %v3279_v42  ;;  %v4047_v32 = vpack.c.bf16 %v11813_v41, %v4041_v24  ;;  %v3409_v24 = vrot.slane %v11851_v2, %v3265_v57  ;;  %v10622_v2 = vld [vmem:[#allocation11 + $0x28] sm:$0xff]  }
 0x426   : > { %v11820_v29 = vmax.f32 %v3275_v39, %v3281_v43  ;;  %v3280_v46 = vmul.f32 0.2, %v3274_v44 }
 0x427   : > { %3291 = vst [vmem:[%s11805_s4 + $0x18] sm:$0xff] %v11818_v45  ;;  %3968 = vst [vmem:[#allocation2 + $0x10] sm:$0xff] %v11818_v45  ;;  %v4118_v40 = vshrl.u32 %v4047_v32, 16  ;;  %v4121_v42 = vshll.u32 %v4047_v32, 16  ;;  %v10619_v32 = vld [vmem:[#allocation11 + $0x30] sm:$0xff]  }
 0x428   : > { %3293 = vst [vmem:[%s11805_s4 + $0x28] sm:$0xff] %v11820_v29  ;;  %3970 = vst [vmem:[#allocation2 + $0x58] sm:$0xff] %v11820_v29  ;;  %v11828_v48 = vmax.f32 %v3274_v44, %v3280_v46 }
 0x42a   : > { %3292 = vst [vmem:[%s11805_s4 + $0x20] sm:$0xff] %v11828_v48  ;;  %6080 = vst [vmem:[#allocation2 + $0x40] sm:$0xff] %v11828_v48 }
 0x42b   : > { %v4960_v49 = vld [vmem:[#allocation2 + $0x28] sm:$0xfe] }
 0x42c   : > { %v11833_v31 = vld [vmem:[#allocation2 + $0x28] sm:$0xfc] }
 0x42d   : > { %v4959_v50 = vld [vmem:[#allocation2 + $0x68] sm:$0xfe]  ;;  %6078 = vst [vmem:[#allocation2 + $0x28] sm:$0xff] %v11803_v36 }
 0x42e   : > { %v5319_v12 = vld [vmem:[#allocation2 + $0x68] sm:$0xfc]  ;;  %v11837_v52 = vld [vmem:[#allocation2 + $0x10] sm:$0xff]  ;;  %v4971_v8 = vpack.c.bf16 %v11828_v48, %v4959_v50  ;;  %v4101_v50 = vshrl.u32 %v4046_v3, 16 }
 0x42f   : > { %6077 = vst [vmem:[#allocation2 + $0x68] sm:$0xff] %v11813_v41  ;;  %v11839_v55 = vld [vmem:[#allocation2 + $0x58] sm:$0xff]  ;;  %6079 = vst [vmem:[#allocation2 + $0x10] sm:$0xff] %v11818_v45  ;;  %v5325_v25 = vpack.c.bf16 %v11828_v48, %v5319_v12  ;;  %v4104_v12 = vshll.u32 %v4046_v3, 16 }
 0x430   : > { %v11843_v58 = vpack.c.bf16 %v11839_v55, %v4960_v49  ;;  %6081 = vst [vmem:[#allocation2 + $0x58] sm:$0xff] %v11820_v29  ;;  %v5326_v59 = vpack.c.bf16 %v11839_v55, %v11833_v31  ;;  %v5039_v60 = vshll.u32 %v4971_v8, 16  ;;  %v5037_v33 = vshrl.u32 %v4971_v8, 16  ;;  %v10631_v31 = vld [vmem:[#allocation11 + $0x10] sm:$0xff]  }
 0x431   : > { %v5387_v34 = vrot.slane %v5325_v25, 1  ;;  %v4103_v8 = vrot.slane %v4101_v50, 3  ;;  %v10618_v25 = vld [vmem:[#allocation11 + $0x70] sm:$0xff]  }
 0x432   : > { %v5041_v28 = vrot.slane %v5039_v60, 1  ;;  %v10616_v60 = vld [vmem:[#allocation11 + $0x38] sm:$0xff]  }
 0x434   : > { %v5042_v37 = vor.u32 %v5041_v28, %v5037_v33  ;;  %v3975_v28 = vld [vmem:[#allocation2] sm:$0xc0] }
 0x43a   : > { %v3872_v62 = vpop.f32.mrf.mxu1 }
 0x43c   : > { %v3874_v63 = vpop.f32.mrf.mxu1 }
 0x43e   : > { %v3876_v1 = vpop.f32.mrf.mxu1 }
 0x440   : > { %v3877_v0 = vpop.f32.mrf.mxu1 }
 0x45a   : > { %v3831_v6 = vpop.f32.mrf.mxu0  ;;  %v11859_v7 = vpop.f32.mrf.mxu1 }
 0x45b   : > { %v3832_v10 = vadd.f32 %v3831_v6, %v3401_v4  ;;  %v11890_v4 = vld [vmem:[#allocation2 + $0x60] sm:$0xff]  ;;  %v4123_v6 = vrot.slane %v4121_v42, 4  ;;  %v5051_v42 = vshll.u32 %v11843_v58, 16 }
 0x45c   : > { %v3833_v47 = vpop.f32.mrf.mxu0  ;;  %v9129_v11 = vpop.f32.mrf.mxu1 }
 0x45d   : > { %v3873_v14 = vadd.f32 %v3872_v62, %v3832_v10  ;;  %v3834_v51 = vadd.f32 %v3833_v47, %v3405_v5  ;;  %v4120_v5 = vrot.slane %v4118_v40, 3  ;;  %v10624_v40 = vld [vmem:[#allocation11 + $0x60] sm:$0xff]  }
 0x45e   : > { %v3835_v61 = vpop.f32.mrf.mxu0  ;;  %v9131_v15 = vpop.f32.mrf.mxu1 }
 0x45f   : > { %v3959_v16 = vmul.f32 0.2, %v3873_v14  ;;  %v3875_v17 = vadd.f32 %v3874_v63, %v3834_v51  ;;  %v4106_v61 = vrot.slane %v4104_v12, 4 }
 0x460   : > { %v3836_v18 = vpop.f32.mrf.mxu0  ;;  %v9132_v56 = vpop.f32.mrf.mxu1 }
 0x461   : > { %v11862_v19 = vmax.f32 %v3873_v14, %v3959_v16  ;;  %v3960_v20 = vmul.f32 0.2, %v3875_v17  ;;  %v4124_v18 = vor.u32 %v4123_v6, %v4120_v5  ;;  %v5053_v6 = vrot.slane %v5051_v42, 1 }
 0x463   : > { %3971 = vst [vmem:[#allocation2 + $0x48] sm:$0xff] %v11862_v19  ;;  %v11865_v23 = vmax.f32 %v3875_v17, %v3960_v20  ;;  %v4107_v20 = vor.u32 %v4106_v61, %v4103_v8  ;;  %v5390_v8 = vrot.slane %v5326_v59, 1 }
 0x465   : > { %3972 = vst [vmem:[#allocation2 + $0x30] sm:$0xff] %v11865_v23  ;;  %v11870_v9 = vpack.c.bf16 %v4968_v21, %v11865_v23  ;;  %v5328_v30 = vpack.c.bf16 %v5322_v22, %v11865_v23  ;;  %v9130_v21 = vadd.f32 %v9129_v11, %v11859_v7  ;;  %v10621_v7 = vld [vmem:[#allocation11 + $0x68] sm:$0xff]   ;;  %v3987_v11 = vpack.c.bf16 %v11813_v41, %v3975_v28 }
 0x467   : > { %v5044_v27 = vshll.u32 %v11870_v9, 16  ;;  %v11875_v35 = vrot.slane %v5328_v30, 1  ;;  %v3914_v33 = vadd.f32 %v9130_v21, %v3409_v24  ;;  %v10633_v21 = vld [vmem:[#allocation11 + $0x48] sm:$0xff]  }
 0x468   : > { %v3976_v24 = vld [vmem:[#allocation2 + $0x20] sm:$0xc0] }
 0x469   : > { %v11878_v38 = vrot.slane %v5044_v27, 1  ;;  %v11882_v39 = vsel %vm1839_vm4, %v5387_v34, %v11875_v35 }
 0x46a   : > { %v4043_v43 = vld [vmem:[#allocation2 + $0x48] sm:$0x7f] }
 0x46b   : > { %v4049_v44 = vpack.c.bf16 %v4043_v43, %v11818_v45  ;;  %v11887_v46 = vsel %vm1217_vm2, %v5042_v37, %v11878_v38  ;;  %v4406_v37 = vrot.slane %v3987_v11, 3 }
 0x46c   : > { %v4044_v49 = vld [vmem:[#allocation2 + $0x30] sm:$0x7f] }
 0x46d   : > { %v3984_v62 = vld [vmem:[#allocation2 + $0x30] sm:$0x3f]  ;;  %v4050_v63 = vpack.c.bf16 %v4044_v49, %v11828_v48  ;;  %v4109_v1 = vshrl.u32 %v4049_v44, 16  ;;  %v4112_v0 = vshll.u32 %v4049_v44, 16 }
 0x46e   : > { %6074 = vst [vmem:[#allocation2 + $0x30] sm:$0xff] %v11890_v4  ;;  %v3990_v30 = vpack.c.bf16 %v3984_v62, %v11828_v48  ;;  %v4969_v44 = vld [vmem:[#allocation2 + $0x70] sm:$0x1]  ;;  %v4042_v62 = vld [vmem:[#allocation2 + $0x20] sm:$0x80] }
 0x46f   : > { %v4126_v10 = vshrl.u32 %v4050_v63, 16  ;;  %v4129_v47 = vshll.u32 %v4050_v63, 16  ;;  %v4111_v14 = vrot.slane %v4109_v1, 3  ;;  %v4114_v51 = vrot.slane %v4112_v0, 4  ;;  %v5323_v49 = vld [vmem:[#allocation2 + $0x70] sm:$0x3] }
 0x470   : > { %v11901_v34 = vrot.slane %v3990_v30, 3  ;;  %v10625_v1 = vld [vmem:[#allocation11 + $0x20] sm:$0xff]   ;;  %v10627_v0 = vld [vmem:[#allocation11 + $0x58] sm:$0xff]  }
 0x471   : > { %v4128_v15 = vrot.slane %v4126_v10, 3  ;;  %v4131_v16 = vrot.slane %v4129_v47, 4  ;;  %v4115_v17 = vor.u32 %v4114_v51, %v4111_v14  ;;  %v4048_v47 = vpack.c.bf16 %v11803_v36, %v4042_v62 }
 0x472   : > { %v4408_v12 = vsel %vm1489_vm3, %v4406_v37, %v11901_v34  ;;  %v5049_v14 = vshrl.u32 %v11843_v58, 16 }
 0x473   : > { %v4132_v56 = vor.u32 %v4131_v16, %v4128_v15  ;;  %v4116_v26 = vsel %vm1088_vm1, %v4107_v20, %v4115_v17  ;;  %v10628_v15 = vld [vmem:[#allocation11 + $0x18] sm:$0xff]   ;;  %v10630_v16 = vld [vmem:[#allocation11 + $0x50] sm:$0xff]   ;;  %v4135_v58 = vshrl.u32 %v4048_v47, 16  ;;  %v4138_v20 = vshll.u32 %v4048_v47, 16 }
 0x475   : > { %v4133_v22 = vsel %vm1088_vm1, %v4124_v18, %v4132_v56 }
 0x476   : > { %4333 = vmatprep.mubr.bf16.mxu1 %v4133_v22 }
 0x477   : > { %4334 = vmatmul.mubr.bf16.vlgmr.msra.gmra.mxu1 %v4116_v26  ;;  %v4140_v26 = vrot.slane %v4138_v20, 4  ;;  %v10650_v20 = vld [vmem:[#allocation11 + $0x90] sm:$0xff]  }
 0x478   : > { %9182 = vmatpush3.bf16.msra.mxu1 %v10616_v60  ;;  %4341 = vmatprep.mubr.bf16.mxu1 %v4132_v56 }
 0x479   : > { %9183 = vmatprep.subr.bf16.mxu1 %v10618_v25  ;;  %v4137_v25 = vrot.slane %v4135_v58, 3  ;;  %v10648_v58 = vld [vmem:[#allocation11 + $0x1e0] sm:$0xff]  }
 0x47a   : > { %v3953_v27 = vpop.f32.mrf.mxu0 }
 0x47b   : > { %v3954_v53 = vadd.f32 %v3953_v27, %v3914_v33  ;;  %v10634_v33 = vld [vmem:[#allocation11 + $0x8] sm:$0xff]  }
 0x47c   : > { %9184 = vmatpush3.bf16.msra.mxu1 %v10619_v32  ;;  %v9823_v57 = vpop.f32.mrf.mxu0  ;;  %v3983_v32 = vld [vmem:[#allocation2 + $0x48] sm:$0x3f] }
 0x47d   : > { %v3961_v3 = vmul.f32 0.2, %v3954_v53  ;;  %9185 = vmatprep.subr.bf16.mxu1 %v10621_v7  ;;  %v3974_v57 = vld [vmem:[#allocation2 + $0x60] sm:$0xc0] }
 0x47e   : > { %v3956_v43 = vpop.f32.mrf.mxu0 }
 0x47f   : > { %v11904_v50 = vmax.f32 %v3954_v53, %v3961_v3  ;;  %4342 = vmatmul.mubr.bf16.gmra.mxu1 %v4115_v17  ;;  %v5054_v17 = vor.u32 %v5053_v6, %v5049_v14  ;;  %v10635_v53 = vld [vmem:[#allocation11 + $0x40] sm:$0xff]   ;;  %v3989_v3 = vpack.c.bf16 %v3983_v32, %v11818_v45  ;;  %v3986_v43 = vpack.c.bf16 %v11801_v13, %v3974_v57  ;;  %v10640_v6 = vld [vmem:[#allocation11 + $0x1b8] sm:$0xff]   ;;  %v10642_v14 = vld [vmem:[#allocation11 + $0x1f0] sm:$0xff]  }
 0x480   : > { %9186 = vmatpush3.bf16.msra.mxu1 %v10622_v2  ;;  %v9824_v63 = vpop.f32.mrf.mxu0  ;;  %4594 = vmatprep.mubr.bf16.mxu1 %v4408_v12  ;;  %v3988_v2 = vpack.c.bf16 %v11803_v36, %v3976_v24  ;;  %v10658_v24 = vld [vmem:[#allocation11 + $0x188] sm:$0xff]   ;;  %v4663_v32 = vpack.c.bf16 %v11820_v29, %v11803_v36  ;;  %v4665_v57 = vpack.c.bf16 %v11865_v23, %v11865_v23  ;;  %v10667_v36 = vld [vmem:[#allocation11 + $0x270] sm:$0xff]   ;;  %v10673_v23 = vld [vmem:[#allocation11 + $0x260] sm:$0xff]  }
 0x481   : > { %3973 = vst [vmem:[#allocation2 + $0x38] sm:$0xff] %v11904_v50  ;;  %9187 = vmatprep.subr.bf16.mxu1 %v10624_v40  ;;  %v11910_v5 = vpack.c.bf16 %v4969_v44, %v11904_v50  ;;  %v5329_v10 = vpack.c.bf16 %v5323_v49, %v11904_v50  ;;  %v10637_v40 = vld [vmem:[#allocation11] sm:$0xff]   ;;  %v10638_v49 = vld [vmem:[#allocation11 + $0xb0] sm:$0xff]   ;;  %v4404_v62 = vrot.slane %v3989_v3, 3  ;;  %v10639_v63 = vld [vmem:[#allocation11 + $0x1f8] sm:$0xff]  }
 0x482   : > { %v4409_v12 = vrot.slane %v3988_v2, 3  ;;  %v10669_v2 = vld [vmem:[#allocation11 + $0x2a8] sm:$0xff]  }
 0x483   : > { %v5056_v51 = vshll.u32 %v11910_v5, 16  ;;  %v11919_v61 = vrot.slane %v5329_v10, 1  ;;  %v10641_v10 = vld [vmem:[#allocation11 + $0xa8] sm:$0xff]  }
 0x484   : > { %9188 = vmatpush3.bf16.msra.mxu1 %v10625_v1  ;;  %v10670_v3 = vld [vmem:[#allocation11 + $0x268] sm:$0xff]  }
 0x485   : > { %9189 = vmatprep.subr.bf16.mxu1 %v10627_v0  ;;  %v11921_v18 = vrot.slane %v5056_v51, 1  ;;  %v11925_v56 = vsel %vm1839_vm4, %v5390_v8, %v11919_v61  ;;  %v4403_v0 = vrot.slane %v3986_v43, 3  ;;  %v10643_v51 = vld [vmem:[#allocation11 + $0x1b0] sm:$0xff]   ;;  %v10645_v8 = vld [vmem:[#allocation11 + $0x1e8] sm:$0xff]  }
 0x486   : > { %v10677_v43 = vld [vmem:[#allocation11 + $0x208] sm:$0xff]  }
 0x487   : > { %v11929_v60 = vsel %vm1217_vm2, %v5054_v17, %v11921_v18  ;;  %v4405_v47 = vsel %vm1489_vm3, %v4403_v0, %v4404_v62  ;;  %v4662_v17 = vpack.c.bf16 %v11828_v48, %v11813_v41  ;;  %v10655_v41 = vld [vmem:[#allocation11 + $0x190] sm:$0xff]   ;;  %v10656_v48 = vld [vmem:[#allocation11 + $0x80] sm:$0xff]  }
 0x488   : > { %9190 = vmatpush3.bf16.msra.mxu1 %v10628_v15  ;;  %v4045_v55 = vld [vmem:[#allocation2 + $0x38] sm:$0x7f]  ;;  %v10646_v15 = vld [vmem:[#allocation11 + $0x1a8] sm:$0xff]  }
 0x489   : > { %v3985_v59 = vld [vmem:[#allocation2 + $0x38] sm:$0x3f]  ;;  %9191 = vmatprep.subr.bf16.mxu1 %v10630_v16  ;;  %v4051_v22 = vpack.c.bf16 %v4045_v55, %v11820_v29  ;;  %v10647_v16 = vld [vmem:[#allocation11 + $0x98] sm:$0xff]  }
 0x48a   : > { %6075 = vst [vmem:[#allocation2 + $0x38] sm:$0xff] %v11890_v4  ;;  %v3991_v7 = vpack.c.bf16 %v3985_v59, %v11820_v29  ;;  %v4141_v4 = vor.u32 %v4140_v26, %v4137_v25  ;;  %v10652_v55 = vld [vmem:[#allocation11 + $0x198] sm:$0xff]   ;;  %v10653_v59 = vld [vmem:[#allocation11 + $0x88] sm:$0xff]   ;;  %v10659_v26 = vld [vmem:[#allocation11 + $0x1c0] sm:$0xff]  }
 0x48b   : > { %v4143_v28 = vshrl.u32 %v4051_v22, 16  ;;  %v4146_v30 = vshll.u32 %v4051_v22, 16  ;;  %v10657_v22 = vld [vmem:[#allocation11 + $0x1c8] sm:$0xff]   ;;  %v10660_v25 = vld [vmem:[#allocation11 + $0x238] sm:$0xff]   ;;  %v10668_v29 = vld [vmem:[#allocation11 + $0x220] sm:$0xff]  }
 0x48c   : > { %9192 = vmatpush3.bf16.msra.mxu1 %v10631_v31  ;;  %v11936_v42 = vrot.slane %v3991_v7, 3  ;;  %v10651_v31 = vld [vmem:[#allocation11 + $0x1d8] sm:$0xff]  }
 0x48d   : > { %9193 = vmatprep.subr.bf16.mxu1 %v10633_v21  ;;  %v4145_v11 = vrot.slane %v4143_v28, 3  ;;  %v4148_v27 = vrot.slane %v4146_v30, 4  ;;  %v10654_v21 = vld [vmem:[#allocation11 + $0x1d0] sm:$0xff]   ;;  %v10661_v28 = vld [vmem:[#allocation11 + $0x180] sm:$0xff]   ;;  %v10664_v7 = vld [vmem:[#allocation11 + $0x278] sm:$0xff]  }
 0x48e   : > { %v4411_v1 = vsel %vm1489_vm3, %v4409_v12, %v11936_v42  ;;  %v10662_v30 = vld [vmem:[#allocation11 + $0x230] sm:$0xff]  }
 0x48f   : > { %v4149_v37 = vor.u32 %v4148_v27, %v4145_v11  ;;  %v4661_v11 = vpack.c.bf16 %v11818_v45, %v11801_v13  ;;  %v10665_v27 = vld [vmem:[#allocation11 + $0x228] sm:$0xff]   ;;  %v4664_v13 = vpack.c.bf16 %v11862_v19, %v11862_v19  ;;  %v10671_v45 = vld [vmem:[#allocation11 + $0x218] sm:$0xff]   ;;  %v10678_v19 = vld [vmem:[#allocation11 + $0x290] sm:$0xff]  }
 0x490   : > { %9194 = vmatpush3.bf16.msra.mxu1 %v10634_v33  ;;  %v10663_v33 = vld [vmem:[#allocation11 + $0x2b8] sm:$0xff]   ;;  %v4967_v12 = vld [vmem:[#allocation2 + $0x8] sm:$0x1] }
 0x491   : > { %v4150_v44 = vsel %vm1088_vm1, %v4141_v4, %v4149_v37  ;;  %9195 = vmatprep.subr.bf16.mxu1 %v10635_v53  ;;  %v10666_v53 = vld [vmem:[#allocation11 + $0x2b0] sm:$0xff]   ;;  %v10672_v4 = vld [vmem:[#allocation11 + $0x2a0] sm:$0xff]  }
 0x492   : > { %9841 = vmatprep.mubr.bf16.mxu0 %v4150_v44  ;;  %v4958_v44 = vld [vmem:[#allocation2 + $0x50] sm:$0xfe] }
 0x493   : > { %9842 = vmatmul.mubr.bf16.vlgmr.msra.gmra.mxu0 %v4149_v37  ;;  %v10674_v37 = vld [vmem:[#allocation11 + $0x210] sm:$0xff]  }
 0x494   : > { %9196 = vmatpush3.bf16.msra.mxu1 %v10637_v40  ;;  %9846 = vmatpush3.bf16.msra.mxu0 %v11775_v54  ;;  %v10644_v54 = vld [vmem:[#allocation11 + $0xa0] sm:$0xff]   ;;  %v10675_v40 = vld [vmem:[#allocation11 + $0x298] sm:$0xff]  }
 0x495   : > { %9861 = vmatprep.mubr.bf16.mxu0 %v4411_v1  ;;  %9847 = vmatprep.subr.bf16.mxu0 %v10638_v49  ;;  %v10681_v1 = vld [vmem:[#allocation11 + $0x288] sm:$0xff]  }
 0x496   : > { %9219 = vmatprep.subr.bf16.mxu1 %v10639_v63  ;;  %v4970_v63 = vpack.c.bf16 %v11837_v52, %v4958_v44  ;;  %v10714_v44 = vld [vmem:[#allocation11 + $0x390] sm:$0xff]  }
 0x497   : > { %4595 = vmatmul.mubr.bf16.vlgmr.msra.gmra.mxu1 %v4405_v47 }
 0x498   : > { %4602 = vmatprep.mubr.bf16.mxu1 %v11901_v34  ;;  %9848 = vmatpush3.bf16.msra.mxu0 %v10638_v49  ;;  %v10649_v34 = vld [vmem:[#allocation11 + $0x1a0] sm:$0xff]   ;;  %v11957_v49 = vld [vmem:[#allocation2 + $0x48] sm:$0xff]  ;;  %v5027_v47 = vshll.u32 %v4970_v63, 16 }
 0x499   : > { %9220 = vmatpush3.bf16.msra.mxu1 %v10640_v6  ;;  %9849 = vmatprep.subr.bf16.mxu0 %v10641_v10  ;;  %v4973_v0 = vpack.c.bf16 %v4967_v12, %v11957_v49  ;;  %v10682_v6 = vld [vmem:[#allocation11 + $0x248] sm:$0xff]  }
 0x49a   : > { %9221 = vmatprep.subr.bf16.mxu1 %v10642_v14  ;;  %v10683_v14 = vld [vmem:[#allocation11 + $0x280] sm:$0xff]  }
 0x49c   : > { %9850 = vmatpush3.bf16.msra.mxu0 %v10641_v10  ;;  %v10684_v10 = vld [vmem:[#allocation11 + $0x2f8] sm:$0xff]  }
 0x49d   : > { %9222 = vmatpush3.bf16.msra.mxu1 %v10643_v51  ;;  %9851 = vmatprep.subr.bf16.mxu0 %v10644_v54  ;;  %v5032_v51 = vshll.u32 %v4973_v0, 16 }
 0x49e   : > { %9223 = vmatprep.subr.bf16.mxu1 %v10645_v8  ;;  %v10685_v8 = vld [vmem:[#allocation11 + $0x240] sm:$0xff]  }
 0x49f   : > { %4603 = vmatmul.mubr.bf16.gmra.mxu1 %v4404_v62  ;;  %v10680_v62 = vld [vmem:[#allocation11 + $0x200] sm:$0xff]  }
 0x4a0   : > { %9852 = vmatpush3.bf16.msra.mxu0 %v10644_v54  ;;  %4891 = vmatprep.mubr.bf16.mxu1 %v4662_v17  ;;  %v4666_v54 = vpack.c.bf16 %v11904_v50, %v11904_v50  ;;  %v10687_v17 = vld [vmem:[#allocation11 + $0x378] sm:$0xff]   ;;  %v10689_v50 = vld [vmem:[#allocation11 + $0x2e8] sm:$0xff]  }
 0x4a1   : > { %9224 = vmatpush3.bf16.msra.mxu1 %v10646_v15  ;;  %9853 = vmatprep.subr.bf16.mxu0 %v10647_v16  ;;  %v5029_v15 = vrot.slane %v5027_v47, 1 }
 0x4a2   : > { %9225 = vmatprep.subr.bf16.mxu1 %v10648_v58  ;;  %v5025_v58 = vshrl.u32 %v4970_v63, 16 }
 0x4a4   : > { %9854 = vmatpush3.bf16.msra.mxu0 %v10647_v16  ;;  %v10686_v16 = vld [vmem:[#allocation11 + $0x2f0] sm:$0xff]  }
 0x4a5   : > { %9226 = vmatpush3.bf16.msra.mxu1 %v10649_v34  ;;  %9855 = vmatprep.subr.bf16.mxu0 %v10650_v20  ;;  %v5034_v34 = vrot.slane %v5032_v51, 1  ;;  %v10717_v51 = vld [vmem:[#allocation12 + $0x78] sm:$0xff]  }
 0x4a6   : > { %9227 = vmatprep.subr.bf16.mxu1 %v10651_v31  ;;  %v5063_v31 = vshrl.u32 %v11870_v9, 16  ;;  %v10694_v9 = vld [vmem:[#allocation11 + $0x328] sm:$0xff]  }
 0x4a8   : > { %9856 = vmatpush3.bf16.msra.mxu0 %v10650_v20  ;;  %v5030_v20 = vor.u32 %v5029_v15, %v5025_v58  ;;  %v10719_v15 = vld [vmem:[#allocation12 + $0x38] sm:$0xff]  }
 0x4a9   : > { %9228 = vmatpush3.bf16.msra.mxu1 %v10652_v55  ;;  %9857 = vmatprep.subr.bf16.mxu0 %v10653_v59  ;;  %v10688_v55 = vld [vmem:[#allocation11 + $0x338] sm:$0xff]  }
 0x4aa   : > { %9229 = vmatprep.subr.bf16.mxu1 %v10654_v21  ;;  %v5035_v21 = vsel %vm1217_vm2, %v5030_v20, %v5034_v34 }
 0x4ac   : > { %9858 = vmatpush3.bf16.msra.mxu0 %v10653_v59  ;;  %v10690_v59 = vld [vmem:[#allocation11 + $0x370] sm:$0xff]  }
 0x4ad   : > { %9230 = vmatpush3.bf16.msra.mxu1 %v10655_v41  ;;  %9859 = vmatprep.subr.bf16.mxu0 %v10656_v48  ;;  %v5065_v41 = vor.u32 %v5063_v31, %v11878_v38  ;;  %v10697_v38 = vld [vmem:[#allocation11 + $0x320] sm:$0xff]  }
 0x4ae   : > { %9231 = vmatprep.subr.bf16.mxu1 %v10657_v22  ;;  %v10692_v22 = vld [vmem:[#allocation11 + $0x2e0] sm:$0xff]  }
 0x4b0   : > { %9860 = vmatpush3.bf16.msra.mxu0 %v10656_v48  ;;  %v10691_v48 = vld [vmem:[#allocation11 + $0x330] sm:$0xff]  }
 0x4b1   : > { %9232 = vmatpush3.bf16.msra.mxu1 %v10658_v24  ;;  %9865 = vmatprep.subr.bf16.mxu0 %v10660_v25  ;;  %v5060_v24 = vshrl.u32 %v4973_v0, 16 }
 0x4b2   : > { %9233 = vmatprep.subr.bf16.mxu1 %v10659_v26  ;;  %v10695_v26 = vld [vmem:[#allocation11 + $0x2d8] sm:$0xff]  }
 0x4b3   : > { %9862 = vmatmul.mubr.bf16.vlgmr.msra.gmra.mxu0 %v11936_v42  ;;  %v10676_v42 = vld [vmem:[#allocation11 + $0x258] sm:$0xff]  }
 0x4b4   : > { %9866 = vmatpush3.bf16.msra.mxu0 %v10660_v25  ;;  %9881 = vmatprep.mubr.bf16.mxu0 %v4663_v32  ;;  %v5062_v25 = vor.u32 %v5060_v24, %v5034_v34  ;;  %v10699_v32 = vld [vmem:[#allocation11 + $0x358] sm:$0xff]   ;;  %v10721_v34 = vld [vmem:[#allocation12 + $0x30] sm:$0xff]  }
 0x4b5   : > { %9234 = vmatpush3.bf16.msra.mxu1 %v10661_v28  ;;  %9867 = vmatprep.subr.bf16.mxu0 %v10662_v30  ;;  %v10696_v28 = vld [vmem:[#allocation11 + $0x360] sm:$0xff]  }
 0x4b6   : > { %9257 = vmatprep.subr.bf16.mxu1 %v10663_v33  ;;  %v10700_v33 = vld [vmem:[#allocation11 + $0x318] sm:$0xff]  }
 0x4b8   : > { %4892 = vmatmul.mubr.bf16.vlgmr.msra.gmra.mxu1 %v4661_v11  ;;  %9868 = vmatpush3.bf16.msra.mxu0 %v10662_v30  ;;  %v10698_v30 = vld [vmem:[#allocation11 + $0x2d0] sm:$0xff]  }
 0x4b9   : > { %4899 = vmatprep.mubr.bf16.mxu1 %v4665_v57  ;;  %9258 = vmatpush3.bf16.msra.mxu1 %v10664_v7  ;;  %v10701_v7 = vld [vmem:[#allocation11 + $0x2c8] sm:$0xff]   ;;  %v10702_v11 = vld [vmem:[#allocation11 + $0x350] sm:$0xff]  }
 0x4ba   : > { %9869 = vmatprep.subr.bf16.mxu0 %v10665_v27  ;;  %9259 = vmatprep.subr.bf16.mxu1 %v10666_v53  ;;  %v10704_v53 = vld [vmem:[#allocation11 + $0x2c0] sm:$0xff]   ;;  %v10705_v57 = vld [vmem:[#allocation11 + $0x348] sm:$0xff]  }
 0x4bc   : > { %9870 = vmatpush3.bf16.msra.mxu0 %v10665_v27  ;;  %v10703_v27 = vld [vmem:[#allocation11 + $0x310] sm:$0xff]  }
 0x4bd   : > { %9260 = vmatpush3.bf16.msra.mxu1 %v10667_v36  ;;  %9871 = vmatprep.subr.bf16.mxu0 %v10668_v29  ;;  %v10706_v36 = vld [vmem:[#allocation11 + $0x308] sm:$0xff]  }
 0x4be   : > { %9261 = vmatprep.subr.bf16.mxu1 %v10669_v2  ;;  %v10707_v2 = vld [vmem:[#allocation11 + $0x340] sm:$0xff]  }
 0x4c0   : > { %4900 = vmatmul.mubr.bf16.gmra.mxu1 %v4664_v13  ;;  %9872 = vmatpush3.bf16.msra.mxu0 %v10668_v29  ;;  %v10708_v29 = vld [vmem:[#allocation11 + $0x3b8] sm:$0xff]  }
 0x4c1   : > { %9262 = vmatpush3.bf16.msra.mxu1 %v10670_v3  ;;  %5251 = vmatprep.mubr.bf16.mxu1 %v11887_v46  ;;  %v10679_v46 = vld [vmem:[#allocation11 + $0x250] sm:$0xff]   ;;  %v5066_v3 = vshrl.u32 %v11910_v5, 16 }
 0x4c2   : > { %9873 = vmatprep.subr.bf16.mxu0 %v10671_v45  ;;  %9263 = vmatprep.subr.bf16.mxu1 %v10672_v4 }
 0x4c3   : > { %v5068_v4 = vor.u32 %v5066_v3, %v11921_v18  ;;  %v10712_v18 = vld [vmem:[#allocation11 + $0x3a0] sm:$0xff]  }
 0x4c4   : > { %9874 = vmatpush3.bf16.msra.mxu0 %v10671_v45  ;;  %v5318_v45 = vld [vmem:[#allocation2 + $0x50] sm:$0xfc]  ;;  %v10733_v3 = vld [vmem:[#allocation12] sm:$0xff]  }
 0x4c5   : > { %9264 = vmatpush3.bf16.msra.mxu1 %v10673_v23  ;;  %9875 = vmatprep.subr.bf16.mxu0 %v10674_v37  ;;  %v10709_v23 = vld [vmem:[#allocation11 + $0x300] sm:$0xff]  }
 0x4c6   : > { %9265 = vmatprep.subr.bf16.mxu1 %v10675_v40  ;;  %v10710_v40 = vld [vmem:[#allocation11 + $0x3b0] sm:$0xff]  }
 0x4c8   : > { %9876 = vmatpush3.bf16.msra.mxu0 %v10674_v37  ;;  %v5324_v37 = vpack.c.bf16 %v11837_v52, %v5318_v45  ;;  %v10713_v52 = vld [vmem:[#allocation11 + $0x398] sm:$0xff]  }
 0x4c9   : > { %9266 = vmatpush3.bf16.msra.mxu1 %v10676_v42  ;;  %9877 = vmatprep.subr.bf16.mxu0 %v10677_v43 }
 0x4ca   : > { %9267 = vmatprep.subr.bf16.mxu1 %v10678_v19  ;;  %v5384_v5 = vrot.slane %v5324_v37, 1 }
 0x4cc   : > { %9878 = vmatpush3.bf16.msra.mxu0 %v10677_v43  ;;  %v10711_v43 = vld [vmem:[#allocation11 + $0x3a8] sm:$0xff]  }
 0x4cd   : > { %9268 = vmatpush3.bf16.msra.mxu1 %v10679_v46  ;;  %9879 = vmatprep.subr.bf16.mxu0 %v10680_v62 }
 0x4ce   : > { %9269 = vmatprep.subr.bf16.mxu1 %v10681_v1 }
 0x4d0   : > { %9880 = vmatpush3.bf16.msra.mxu0 %v10680_v62 }
 0x4d1   : > { %9270 = vmatpush3.bf16.msra.mxu1 %v10682_v6  ;;  %9885 = vmatprep.subr.bf16.mxu0 %v10684_v10 }
 0x4d2   : > { %9271 = vmatprep.subr.bf16.mxu1 %v10683_v14 }
 0x4d3   : > { %9882 = vmatmul.mubr.bf16.vlgmr.msra.gmra.mxu0 %v4666_v54  ;;  %v10718_v54 = vld [vmem:[#allocation12 + $0x70] sm:$0xff]  }
 0x4d4   : > { %9886 = vmatpush3.bf16.msra.mxu0 %v10684_v10  ;;  %9901 = vmatprep.mubr.bf16.mxu0 %v11929_v60  ;;  %v10693_v60 = vld [vmem:[#allocation11 + $0x368] sm:$0xff]  }
 0x4d5   : > { %9272 = vmatpush3.bf16.msra.mxu1 %v10685_v8  ;;  %9887 = vmatprep.subr.bf16.mxu0 %v10686_v16  ;;  %v10720_v8 = vld [vmem:[#allocation12 + $0x68] sm:$0xff]  }
 0x4d6   : > { %9295 = vmatprep.subr.bf16.mxu1 %v10687_v17  ;;  %v10722_v17 = vld [vmem:[#allocation12 + $0x60] sm:$0xff]  }
 0x4d8   : > { %5252 = vmatmul.mubr.bf16.vlgmr.msra.gmra.mxu1 %v5035_v21  ;;  %9888 = vmatpush3.bf16.msra.mxu0 %v10686_v16 }
 0x4d9   : > { %5259 = vmatprep.mubr.bf16.mxu1 %v5065_v41  ;;  %9296 = vmatpush3.bf16.msra.mxu1 %v10688_v55  ;;  %v10723_v41 = vld [vmem:[#allocation12 + $0x28] sm:$0xff]  }
 0x4da   : > { %9889 = vmatprep.subr.bf16.mxu0 %v10689_v50  ;;  %9297 = vmatprep.subr.bf16.mxu1 %v10690_v59 }
 0x4dc   : > { %9890 = vmatpush3.bf16.msra.mxu0 %v10689_v50  ;;  %v10724_v50 = vld [vmem:[#allocation12 + $0x58] sm:$0xff]  }
 0x4dd   : > { %9298 = vmatpush3.bf16.msra.mxu1 %v10691_v48  ;;  %9891 = vmatprep.subr.bf16.mxu0 %v10692_v22 }
 0x4de   : > { %9299 = vmatprep.subr.bf16.mxu1 %v10693_v60 }
 0x4e0   : > { %5260 = vmatmul.mubr.bf16.gmra.mxu1 %v5062_v25  ;;  %9892 = vmatpush3.bf16.msra.mxu0 %v10692_v22 }
 0x4e1   : > { %9300 = vmatpush3.bf16.msra.mxu1 %v10694_v9  ;;  %5575 = vmatprep.mubr.bf16.mxu1 %v11882_v39  ;;  %v5321_v39 = vld [vmem:[#allocation2 + $0x8] sm:$0x3] }
 0x4e2   : > { %9893 = vmatprep.subr.bf16.mxu0 %v10695_v26  ;;  %9301 = vmatprep.subr.bf16.mxu1 %v10696_v28  ;;  %v5327_v13 = vpack.c.bf16 %v5321_v39, %v11957_v49  ;;  %v10716_v49 = vld [vmem:[#allocation11 + $0x380] sm:$0xff]   ;;  %v10726_v9 = vld [vmem:[#allocation12 + $0x50] sm:$0xff]  }
 0x4e3   : > { %v10730_v39 = vld [vmem:[#allocation12 + $0x40] sm:$0xff]  }
 0x4e4   : > { %9894 = vmatpush3.bf16.msra.mxu0 %v10695_v26  ;;  %v5385_v42 = vrot.slane %v5327_v13, 1  ;;  %v10725_v26 = vld [vmem:[#allocation12 + $0x20] sm:$0xff]   ;;  %v10735_v13 = vld [vmem:[#allocation14 + $0x138] sm:$0xff]  }
 0x4e5   : > { %9302 = vmatpush3.bf16.msra.mxu1 %v10697_v38  ;;  %9895 = vmatprep.subr.bf16.mxu0 %v10698_v30 }
 0x4e6   : > { %9303 = vmatprep.subr.bf16.mxu1 %v10699_v32  ;;  %v5386_v19 = vsel %vm1839_vm4, %v5384_v5, %v5385_v42  ;;  %v10728_v32 = vld [vmem:[#allocation12 + $0x48] sm:$0xff]  }
 0x4e8   : > { %9896 = vmatpush3.bf16.msra.mxu0 %v10698_v30 }
 0x4e9   : > { %9304 = vmatpush3.bf16.msra.mxu1 %v10700_v33  ;;  %9897 = vmatprep.subr.bf16.mxu0 %v10701_v7 }
 0x4ea   : > { %9305 = vmatprep.subr.bf16.mxu1 %v10702_v11 }
 0x4ec   : > { %9898 = vmatpush3.bf16.msra.mxu0 %v10701_v7  ;;  %v10727_v7 = vld [vmem:[#allocation12 + $0x18] sm:$0xff]  }
 0x4ed   : > { %9306 = vmatpush3.bf16.msra.mxu1 %v10703_v27  ;;  %9899 = vmatprep.subr.bf16.mxu0 %v10704_v53 }
 0x4ee   : > { %9307 = vmatprep.subr.bf16.mxu1 %v10705_v57  ;;  %v10729_v57 = vld [vmem:[#allocation12 + $0x10] sm:$0xff]  }
 0x4f0   : > { %9900 = vmatpush3.bf16.msra.mxu0 %v10704_v53 }
 0x4f1   : > { %9308 = vmatpush3.bf16.msra.mxu1 %v10706_v36  ;;  %9905 = vmatprep.subr.bf16.mxu0 %v10708_v29 }
 0x4f2   : > { %9309 = vmatprep.subr.bf16.mxu1 %v10707_v2  ;;  %v11976_v2 = vld [vmem:[#allocation12 + $0xb8] sm:$0xff]  }
 0x4f3   : > { %9902 = vmatmul.mubr.bf16.vlgmr.msra.gmra.mxu0 %v5068_v4 }
 0x4f4   : > { %9906 = vmatpush3.bf16.msra.mxu0 %v10708_v29  ;;  %9921 = vmatprep.mubr.bf16.mxu0 %v11925_v56  ;;  %v10715_v56 = vld [vmem:[#allocation11 + $0x388] sm:$0xff]  }
 0x4f5   : > { %9310 = vmatpush3.bf16.msra.mxu1 %v10709_v23  ;;  %9907 = vmatprep.subr.bf16.mxu0 %v10710_v40  ;;  %v10731_v29 = vld [vmem:[#allocation12 + $0x8] sm:$0xff]  }
 0x4f6   : > { %9925 = vmatprep.subr.bf16.mxu1 %v10717_v51 }
 0x4f8   : > { %5576 = vmatmul.mubr.bf16.vlgmr.msra.gmra.mxu1 %v5386_v19  ;;  %9908 = vmatpush3.bf16.msra.mxu0 %v10710_v40 }
 0x4f9   : > { %5583 = vmatprep.mubr.bf16.mxu1 %v11875_v35  ;;  %9909 = vmatprep.subr.bf16.mxu0 %v10711_v43 }
 0x4fa   : > { %9926 = vmatpush3.bf16.msra.mxu1 %v10717_v51 }
 0x4fb   : > { %9927 = vmatprep.subr.bf16.mxu1 %v10718_v54 }
 0x4fc   : > { %9910 = vmatpush3.bf16.msra.mxu0 %v10711_v43 }
 0x4fd   : > { %9911 = vmatprep.subr.bf16.mxu0 %v10712_v18 }
 0x4fe   : > { %9928 = vmatpush3.bf16.msra.mxu1 %v10718_v54 }
 0x4ff   : > { %9929 = vmatprep.subr.bf16.mxu1 %v10720_v8 }
 0x500   : > { %5584 = vmatmul.mubr.bf16.gmra.mxu1 %v5385_v42  ;;  %9912 = vmatpush3.bf16.msra.mxu0 %v10712_v18 }
 0x501   : > { %9913 = vmatprep.subr.bf16.mxu0 %v10713_v52 }
 0x502   : > { %9930 = vmatpush3.bf16.msra.mxu1 %v10720_v8 }
 0x503   : > { %9931 = vmatprep.subr.bf16.mxu1 %v10722_v17 }
 0x504   : > { %9914 = vmatpush3.bf16.msra.mxu0 %v10713_v52 }
 0x505   : > { %9915 = vmatprep.subr.bf16.mxu0 %v10714_v44 }
 0x506   : > { %9932 = vmatpush3.bf16.msra.mxu1 %v10722_v17 }
 0x507   : > { %9933 = vmatprep.subr.bf16.mxu1 %v10724_v50 }
 0x508   : > { %9916 = vmatpush3.bf16.msra.mxu0 %v10714_v44 }
 0x509   : > { %9917 = vmatprep.subr.bf16.mxu0 %v10715_v56 }
 0x50a   : > { %9934 = vmatpush3.bf16.msra.mxu1 %v10724_v50 }
 0x50b   : > { %9935 = vmatprep.subr.bf16.mxu1 %v10726_v9 }
 0x50c   : > { %9918 = vmatpush3.bf16.msra.mxu0 %v10715_v56 }
 0x50d   : > { %9919 = vmatprep.subr.bf16.mxu0 %v10716_v49 }
 0x50e   : > { %9936 = vmatpush3.bf16.msra.mxu1 %v10726_v9 }
 0x50f   : > { %9937 = vmatprep.subr.bf16.mxu1 %v10728_v32 }
 0x510   : > { %9920 = vmatpush3.bf16.msra.mxu0 %v10716_v49 }
 0x511   : > { %9945 = vmatprep.subr.bf16.mxu0 %v10719_v15 }
 0x512   : > { %9938 = vmatpush3.bf16.msra.mxu1 %v10728_v32 }
 0x513   : > { %9922 = vmatmul.mubr.bf16.vlgmr.msra.gmra.mxu0 %v11919_v61  ;;  %9939 = vmatprep.subr.bf16.mxu1 %v10730_v39 }
 0x514   : > { %9946 = vmatpush3.bf16.msra.mxu0 %v10719_v15 }
 0x515   : > { %9947 = vmatprep.subr.bf16.mxu0 %v10721_v34 }
 0x516   : > { %9940 = vmatpush3.bf16.msra.mxu1 %v10730_v39  ;;  %v8815_v39 = vld [vmem:[%s12208_s11] ss:$0 sm:$0xff] }
 0x517   : > { %9965 = vmatprep.subr.bf16.mxu1 %v11976_v2 }
 0x518   : > { %9948 = vmatpush3.bf16.msra.mxu0 %v10721_v34 }
 0x519   : > { %9949 = vmatprep.subr.bf16.mxu0 %v10723_v41 }
 0x51c   : > { %9950 = vmatpush3.bf16.msra.mxu0 %v10723_v41 }
 0x51d   : > { %9951 = vmatprep.subr.bf16.mxu0 %v10725_v26 }
 0x520   : > { %9952 = vmatpush3.bf16.msra.mxu0 %v10725_v26 }
 0x521   : > { %9953 = vmatprep.subr.bf16.mxu0 %v10727_v7 }
 0x524   : > { %9954 = vmatpush3.bf16.msra.mxu0 %v10727_v7 }
 0x525   : > { %9955 = vmatprep.subr.bf16.mxu0 %v10729_v57 }
 0x528   : > { %9956 = vmatpush3.bf16.msra.mxu0 %v10729_v57 }
 0x529   : > { %9957 = vmatprep.subr.bf16.mxu0 %v10731_v29 }
 0x52c   : > { %9958 = vmatpush3.bf16.msra.mxu0 %v10731_v29 }
 0x52d   : > { %9959 = vmatprep.subr.bf16.mxu0 %v10733_v3 }
 0x530   : > { %9960 = vmatpush3.bf16.msra.mxu0 %v10733_v3 }
 0x531   : > { %9363 = vmatprep.subr.bf16.mxu0 %v10735_v13 }
 0x537   : > { %v9159_v35 = vpop.f32.mrf.mxu1 }
 0x539   : > { %v9160_v12 = vpop.f32.mrf.mxu1 }
 0x53a   : > { %v9161_v46 = vadd.f32 %v9160_v12, %v9159_v35 }
 0x53b   : > { %v9162_v62 = vpop.f32.mrf.mxu1 }
 0x53d   : > { %v9163_v63 = vpop.f32.mrf.mxu1 }
 0x53e   : > { %v9164_v1 = vadd.f32 %v9163_v63, %v9162_v62 }
 0x53f   : > { %v9165_v0 = vpop.f32.mrf.mxu1 }
 0x541   : > { %v9166_v6 = vpop.f32.mrf.mxu1 }
 0x542   : > { %v9167_v10 = vadd.f32 %v9166_v6, %v9165_v0 }
 0x543   : > { %v9168_v47 = vpop.f32.mrf.mxu1 }
 0x545   : > { %v9169_v14 = vpop.f32.mrf.mxu1 }
 0x553   : > { %v9843_v61 = vpop.f32.mrf.mxu0 }
 0x554   : > { %v4392_v16 = vadd.f32 %v9843_v61, %v9167_v10 }
 0x555   : > { %v4383_v58 = vpop.f32.mrf.mxu0 }
 0x556   : > { %v4384_v20 = vadd.f32 %v9161_v46, %v4383_v58 }
 0x557   : > { %v9197_v31 = vpop.f32.mrf.mxu1  ;;  %v9844_v55 = vpop.f32.mrf.mxu0 }
 0x559   : > { %v9198_v59 = vpop.f32.mrf.mxu1  ;;  %v4386_v21 = vpop.f32.mrf.mxu0 }
 0x55a   : > { %v9199_v48 = vadd.f32 %v9198_v59, %v9197_v31  ;;  %v4387_v22 = vadd.f32 %v9164_v1, %v4386_v21 }
 0x55b   : > { %v9200_v60 = vpop.f32.mrf.mxu1 }
 0x55c   : > { %v4597_v24 = vadd.f32 %v9199_v48, %v4384_v20 }
 0x55d   : > { %v9201_v25 = vpop.f32.mrf.mxu1 }
 0x55e   : > { %v9202_v28 = vadd.f32 %v9201_v25, %v9200_v60 }
 0x55f   : > { %v9203_v38 = vpop.f32.mrf.mxu1 }
 0x560   : > { %v4600_v30 = vadd.f32 %v9202_v28, %v4387_v22 }
 0x561   : > { %v9204_v33 = vpop.f32.mrf.mxu1 }
 0x562   : > { %v9205_v11 = vadd.f32 %v9204_v33, %v9203_v38 }
 0x563   : > { %v9206_v27 = vpop.f32.mrf.mxu1 }
 0x564   : > { %v4605_v53 = vadd.f32 %v9205_v11, %v4392_v16 }
 0x565   : > { %v9207_v36 = vpop.f32.mrf.mxu1 }
 0x573   : > { %v9863_v45 = vpop.f32.mrf.mxu0 }
 0x574   : > { %v4653_v4 = vadd.f32 %v9863_v45, %v4605_v53 }
 0x575   : > { %v4644_v23 = vpop.f32.mrf.mxu0 }
 0x576   : > { %v4645_v37 = vadd.f32 %v4644_v23, %v4597_v24 }
 0x577   : > { %v9864_v40 = vpop.f32.mrf.mxu0 }
 0x578   : > { %v9235_v42 = vpop.f32.mrf.mxu1 }
 0x579   : > { %v4647_v5 = vpop.f32.mrf.mxu0 }
 0x57a   : > { %v4648_v43 = vadd.f32 %v4647_v5, %v4600_v30  ;;  %v9236_v19 = vpop.f32.mrf.mxu1 }
 0x57b   : > { %v9237_v18 = vadd.f32 %v9236_v19, %v9235_v42 }
 0x57c   : > { %v9238_v52 = vpop.f32.mrf.mxu1 }
 0x57e   : > { %v9239_v44 = vpop.f32.mrf.mxu1 }
 0x57f   : > { %v9240_v56 = vadd.f32 %v9239_v44, %v9238_v52 }
 0x580   : > { %v9241_v49 = vpop.f32.mrf.mxu1 }
 0x582   : > { %v9242_v35 = vpop.f32.mrf.mxu1 }
 0x583   : > { %v9243_v12 = vadd.f32 %v9242_v35, %v9241_v49  ;;  %v5664_v49 = vld [vmem:[#allocation2 + $0x60] sm:$0x80] }
 0x584   : > { %v9244_v46 = vpop.f32.mrf.mxu1 }
 0x585   : > { %v6149_v46 = vld [vmem:[#allocation2 + $0x40] sm:$0x7f] }
 0x586   : > { %v9245_v62 = vpop.f32.mrf.mxu1 }
 0x593   : > { %v9883_v63 = vpop.f32.mrf.mxu0 }
 0x594   : > { %v4950_v1 = vadd.f32 %v9883_v63, %v9243_v12 }
 0x595   : > { %v4941_v0 = vpop.f32.mrf.mxu0 }
 0x596   : > { %v4957_v6 = vadd.f32 %v4950_v1, %v4653_v4  ;;  %v4942_v10 = vadd.f32 %v9237_v18, %v4941_v0  ;;  %v6146_v1 = vld [vmem:[#allocation2] sm:$0x80]  ;;  %v6155_v0 = vpack.c.bf16 %v6149_v46, %v6149_v46  ;;  %v10750_v46 = vld [vmem:[#allocation14 + $0x110] sm:$0xff]  }
 0x597   : > { %v9884_v47 = vpop.f32.mrf.mxu0 }
 0x598   : > { %v4955_v14 = vadd.f32 %v4942_v10, %v4645_v37  ;;  %v9273_v51 = vpop.f32.mrf.mxu1  ;;  %v5919_v47 = vld [vmem:[#allocation2 + $0x8] sm:$0x1] }
 0x599   : > { %v4944_v54 = vpop.f32.mrf.mxu0 }
 0x59a   : > { %v4945_v8 = vadd.f32 %v9240_v56, %v4944_v54  ;;  %v9274_v15 = vpop.f32.mrf.mxu1 }
 0x59b   : > { %v9275_v28 = vadd.f32 %v9274_v15, %v9273_v51 }
 0x59c   : > { %v4956_v61 = vadd.f32 %v4945_v8, %v4648_v43  ;;  %v9276_v16 = vpop.f32.mrf.mxu1 }
 0x59e   : > { %v9277_v17 = vpop.f32.mrf.mxu1 }
 0x59f   : > { %v9278_v11 = vadd.f32 %v9277_v17, %v9276_v16  ;;  %v10734_v16 = vld [vmem:[#allocation12 + $0xb0] sm:$0xff]   ;;  %v6231_v17 = vshrl.u32 %v6155_v0, 16 }
 0x5a0   : > { %v9279_v58 = vpop.f32.mrf.mxu1 }
 0x5a2   : > { %v9280_v34 = vpop.f32.mrf.mxu1 }
 0x5a3   : > { %v9281_v26 = vadd.f32 %v9280_v34, %v9279_v58  ;;  %v6234_v58 = vshll.u32 %v6155_v0, 16 }
 0x5a4   : > { %v9282_v20 = vpop.f32.mrf.mxu1 }
 0x5a6   : > { %v9283_v31 = vpop.f32.mrf.mxu1 }
 0x5a7   : > { %v11992_v31 = vld [vmem:[#allocation2 + $0x60] sm:$0xff] }
 0x5b3   : > { %v9903_v55 = vpop.f32.mrf.mxu0 }
 0x5b4   : > { %v5310_v38 = vadd.f32 %v9903_v55, %v9281_v26  ;;  %v6236_v26 = vrot.slane %v6234_v58, 4  ;;  %v10756_v58 = vld [vmem:[#allocation14 + $0x100] sm:$0xff]  }
 0x5b5   : > { %v5301_v50 = vpop.f32.mrf.mxu0 }
 0x5b6   : > { %v5302_v32 = vadd.f32 %v9275_v28, %v5301_v50  ;;  %v5317_v27 = vadd.f32 %v5310_v38, %v4957_v6 }
 0x5b7   : > { %v9904_v59 = vpop.f32.mrf.mxu0 }
 0x5b8   : > { %v9311_v21 = vpop.f32.mrf.mxu1  ;;  %v5315_v29 = vadd.f32 %v5302_v32, %v4955_v14  ;;  %v11987_v14 = vld [vmem:[%s11805_s4 + $0x8] sm:$0xff] }
 0x5b9   : > { %v5304_v30 = vpop.f32.mrf.mxu0  ;;  %v6152_v51 = vpack.c.bf16 %v11987_v14, %v6146_v1  ;;  %v10752_v1 = vld [vmem:[#allocation14 + $0xd0] sm:$0xff]  }
 0x5ba   : > { %v9312_v41 = vpop.f32.mrf.mxu1  ;;  %v5305_v3 = vadd.f32 %v9278_v11, %v5304_v30 }
 0x5bb   : > { %v9313_v53 = vadd.f32 %v9312_v41, %v9311_v21  ;;  %v6223_v59 = vshrl.u32 %v6152_v51, 16  ;;  %v6226_v21 = vshll.u32 %v6152_v51, 16 }
 0x5bc   : > { %v9314_v48 = vpop.f32.mrf.mxu1  ;;  %v5316_v5 = vadd.f32 %v5305_v3, %v4956_v61 }
 0x5be   : > { %v9315_v22 = vpop.f32.mrf.mxu1 }
 0x5bf   : > { %v9316_v23 = vadd.f32 %v9315_v22, %v9314_v48 }
 0x5c0   : > { %v9317_v60 = vpop.f32.mrf.mxu1 }
 0x5c2   : > { %v9318_v24 = vpop.f32.mrf.mxu1 }
 0x5c3   : > { %v9319_v33 = vadd.f32 %v9318_v24, %v9317_v60  ;;  %v11997_v24 = vld [vmem:[%s11805_s4] sm:$0xff] }
 0x5c4   : > { %v9320_v9 = vpop.f32.mrf.mxu1 }
 0x5c5   : > { %v10736_v9 = vld [vmem:[#allocation12 + $0xa8] sm:$0xff]  }
 0x5c6   : > { %v9321_v25 = vpop.f32.mrf.mxu1 }
 0x5c7   : > { %v6233_v25 = vrot.slane %v6231_v17, 3  ;;  %v6089_v17 = vld [vmem:[#allocation2 + $0x40] sm:$0x3f] }
 0x5d3   : > { %v9923_v7 = vpop.f32.mrf.mxu0 }
 0x5d4   : > { %v5634_v57 = vadd.f32 %v9923_v7, %v9319_v33  ;;  %v6225_v33 = vrot.slane %v6223_v59, 3  ;;  %v6228_v7 = vrot.slane %v6226_v21, 4  ;;  %v6095_v59 = vpack.c.bf16 %v6089_v17, %v6089_v17  ;;  %v10757_v21 = vld [vmem:[#allocation14 + $0xc0] sm:$0xff]   ;;  %v10783_v17 = vld [vmem:[#allocation14 + $0x1f8] sm:$0xff]  }
 0x5d5   : > { %v5625_v36 = vpop.f32.mrf.mxu0 }
 0x5d6   : > { %v5641_v13 = vadd.f32 %v5634_v57, %v5317_v27  ;;  %v5626_v45 = vadd.f32 %v9313_v53, %v5625_v36  ;;  %v10737_v57 = vld [vmem:[#allocation14 + $0xf8] sm:$0xff]  }
 0x5d7   : > { %v9924_v4 = vpop.f32.mrf.mxu0 }
 0x5d8   : > { %v5651_v37 = vadd.f32 %v8815_v39, %v5641_v13  ;;  %v5639_v40 = vadd.f32 %v5626_v45, %v5315_v29  ;;  %v10738_v13 = vld [vmem:[#allocation14 + $0x130] sm:$0xff]   ;;  %v6229_v45 = vor.u32 %v6228_v7, %v6225_v33  ;;  %v10739_v4 = vld [vmem:[#allocation12 + $0xa0] sm:$0xff]  }
 0x5d9   : > { %v5628_v42 = vpop.f32.mrf.mxu0 }
 0x5da   : > { %v5654_v43 = vmul.f32 0.2, %v5651_v37  ;;  %v5649_v19 = vadd.f32 %v8815_v39, %v5639_v40  ;;  %v5629_v18 = vadd.f32 %v9316_v23, %v5628_v42  ;;  %v10740_v40 = vld [vmem:[#allocation14 + $0xf0] sm:$0xff]   ;;  %v10742_v42 = vld [vmem:[#allocation12 + $0x98] sm:$0xff]  }
 0x5dc   : > { %v5657_v52 = vmax.f32 %v5651_v37, %v5654_v43  ;;  %v5652_v44 = vmul.f32 0.2, %v5649_v19  ;;  %v5640_v56 = vadd.f32 %v5629_v18, %v5316_v5  ;;  %v10741_v5 = vld [vmem:[#allocation14 + $0x128] sm:$0xff]   ;;  %v10744_v18 = vld [vmem:[#allocation14 + $0x120] sm:$0xff]  }
 0x5dd   : > { %v10743_v43 = vld [vmem:[#allocation14 + $0xe8] sm:$0xff]  }
 0x5de   : > { %5660 = vst [vmem:[%s930_s28 + $0x10] sm:$0xff] %v5657_v52  ;;  %5663 = vst [vmem:[#allocation2 + $0x48] sm:$0xff] %v5657_v52  ;;  %v5655_v35 = vmax.f32 %v5649_v19, %v5652_v44  ;;  %v5650_v12 = vadd.f32 %v8815_v39, %v5640_v56  ;;  %v5688_v61 = vpack.c.bf16 %v5657_v52, %v5657_v52  ;;  %v10745_v19 = vld [vmem:[#allocation12 + $0x90] sm:$0xff]   ;;  %v10748_v44 = vld [vmem:[#allocation12 + $0x88] sm:$0xff]  }
 0x5df   : > { %v11990_v20 = vpack.c.bf16 %v5919_v47, %v5657_v52  ;;  %v6237_v39 = vor.u32 %v6236_v26, %v6233_v25  ;;  %v10746_v52 = vld [vmem:[#allocation14 + $0xe0] sm:$0xff]   ;;  %v10747_v56 = vld [vmem:[#allocation14 + $0x118] sm:$0xff]   ;;  %v6495_v25 = vrot.slane %v6095_v59, 3  ;;  %v10761_v26 = vld [vmem:[#allocation14 + $0x168] sm:$0xff]  }
 0x5e0   : > { %5658 = vst [vmem:[%s930_s28] sm:$0xff] %v5655_v35  ;;  %5661 = vst [vmem:[#allocation2 + $0x50] sm:$0xff] %v5655_v35  ;;  %v5653_v62 = vmul.f32 0.2, %v5650_v12  ;;  %v5668_v63 = vpack.c.bf16 %v5655_v35, %v5664_v49  ;;  %v6148_v49 = vld [vmem:[#allocation2 + $0x10] sm:$0x7f]  ;;  %v10786_v59 = vld [vmem:[#allocation14 + $0x1f0] sm:$0xff]  }
 0x5e1   : > { %v5946_v32 = vshll.u32 %v11990_v20, 16  ;;  %v6238_v37 = vsel %vm1088_vm1, %v6229_v45, %v6237_v39  ;;  %v10766_v39 = vld [vmem:[#allocation14 + $0x28] sm:$0xff]   ;;  %v10770_v45 = vld [vmem:[#allocation14 + $0x150] sm:$0xff]  }
 0x5e2   : > { %v5656_v6 = vmax.f32 %v5650_v12, %v5653_v62  ;;  %v5802_v10 = vshrl.u32 %v5668_v63, 16  ;;  %v5805_v8 = vshll.u32 %v5668_v63, 16  ;;  %v10751_v12 = vld [vmem:[#allocation12 + $0x80] sm:$0xff]   ;;  %v6145_v62 = vld [vmem:[#allocation2 + $0x60] sm:$0x80]  ;;  %v6154_v63 = vpack.c.bf16 %v6148_v49, %v6148_v49 }
 0x5e3   : > { %v5948_v3 = vrot.slane %v5946_v32, 1  ;;  %v6151_v0 = vpack.c.bf16 %v11997_v24, %v6145_v62  ;;  %v10762_v32 = vld [vmem:[#allocation14 + $0x70] sm:$0xff]   ;;  %v10776_v49 = vld [vmem:[#allocation14 + $0x140] sm:$0xff]   ;;  %v10777_v62 = vld [vmem:[#allocation14 + $0x48] sm:$0xff]  }
 0x5e4   : > { %5659 = vst [vmem:[%s930_s28 + $0x8] sm:$0xff] %v5656_v6  ;;  %v5687_v54 = vpack.c.bf16 %v5656_v6, %v5655_v35  ;;  %v5804_v55 = vrot.slane %v5802_v10, 3  ;;  %v5807_v41 = vrot.slane %v5805_v8, 4  ;;  %v10749_v35 = vld [vmem:[#allocation14 + $0xd8] sm:$0xff]   ;;  %v5950_v10 = vshrl.u32 %v11990_v20, 16  ;;  %v10758_v20 = vld [vmem:[#allocation14 + $0x170] sm:$0xff]  }
 0x5e5   : > { %v5667_v15 = vld [vmem:[#allocation2 + $0x48] sm:$0x7f]  ;;  %v6214_v47 = vshrl.u32 %v6154_v63, 16  ;;  %v6217_v51 = vshll.u32 %v6154_v63, 16  ;;  %s10147_s28 = smul.u32 768, %s11348_s6 }
 0x5e6   : > { %v5669_v34 = vpack.c.bf16 %v5667_v15, %v5656_v6  ;;  %9941 = vmatprep.mubr.bf16.mxu1 %v5687_v54  ;;  %6073 = vst [vmem:[#allocation2 + $0x48] sm:$0xff] %v11992_v31  ;;  %v10755_v54 = vld [vmem:[#allocation14 + $0x178] sm:$0xff]   ;;  %v5952_v8 = vor.u32 %v5950_v10, %v5948_v3  ;;  %v10754_v15 = vld [vmem:[#allocation14 + $0xc8] sm:$0xff]  }
 0x5e7   : > { %9942 = vmatmul.mubr.bf16.vlgmr.msra.gmra.mxu1 %v5688_v61  ;;  %v5916_v50 = vld [vmem:[#allocation2 + $0x50] sm:$0xfe]  ;;  %v6206_v61 = vshrl.u32 %v6151_v0, 16  ;;  %v10778_v10 = vld [vmem:[#allocation14 + $0x8] sm:$0xff]  }
 0x5e8   : > { %9966 = vmatpush3.bf16.msra.mxu1 %v11976_v2  ;;  %v5810_v48 = vshrl.u32 %v5669_v34, 16  ;;  %v5813_v22 = vshll.u32 %v5669_v34, 16  ;;  %v5920_v60 = vpack.c.bf16 %v5656_v6, %v5916_v50  ;;  %6076 = vst [vmem:[#allocation2 + $0x50] sm:$0xff] %v11997_v24  ;;  %v5808_v2 = vor.u32 %v5807_v41, %v5804_v55  ;;  %v10753_v6 = vld [vmem:[#allocation14 + $0x108] sm:$0xff]  }
 0x5e9   : > { %9967 = vmatprep.subr.bf16.mxu1 %v10734_v16  ;;  %v6216_v34 = vrot.slane %v6214_v47, 3  ;;  %v6219_v55 = vrot.slane %v6217_v51, 4  ;;  %v6083_v50 = vld [vmem:[#allocation2] sm:$0xc0]  ;;  %v6208_v41 = vrot.slane %v6206_v61, 3  ;;  %v10780_v51 = vld [vmem:[#allocation14 + $0x40] sm:$0xff]  }
 0x5ea   : > { %v5812_v28 = vrot.slane %v5810_v48, 3  ;;  %v5815_v38 = vrot.slane %v5813_v22, 4  ;;  %v5941_v30 = vshll.u32 %v5920_v60, 16  ;;  %v5939_v27 = vshrl.u32 %v5920_v60, 16  ;;  %v10759_v22 = vld [vmem:[#allocation14 + $0x78] sm:$0xff]   ;;  %v10781_v61 = vld [vmem:[#allocation14] sm:$0xff]  }
 0x5eb   : > { %v6092_v60 = vpack.c.bf16 %v11987_v14, %v6083_v50 }
 0x5ec   : > { %9968 = vmatpush3.bf16.msra.mxu1 %v10734_v16  ;;  %v5816_v11 = vor.u32 %v5815_v38, %v5812_v28  ;;  %v5943_v53 = vrot.slane %v5941_v30, 1  ;;  %v6209_v16 = vshll.u32 %v6151_v0, 16  ;;  %v10760_v38 = vld [vmem:[#allocation14 + $0x38] sm:$0xff]  }
 0x5ed   : > { %9969 = vmatprep.subr.bf16.mxu1 %v10736_v9  ;;  %v6494_v30 = vrot.slane %v6092_v60, 3  ;;  %v10779_v0 = vld [vmem:[#allocation14 + $0xb8] sm:$0xff]   ;;  %v10789_v60 = vld [vmem:[#allocation14 + $0x1e8] sm:$0xff]  }
 0x5ee   : > { %v5817_v36 = vsel %vm1088_vm1, %v5808_v2, %v5816_v11  ;;  %v5944_v29 = vor.u32 %v5943_v53, %v5939_v27  ;;  %v6211_v48 = vrot.slane %v6209_v16, 4  ;;  %v10764_v2 = vld [vmem:[#allocation14 + $0x160] sm:$0xff]   ;;  %v10765_v27 = vld [vmem:[#allocation14 + $0x68] sm:$0xff]  }
 0x5ef   : > { %9961 = vmatprep.mubr.bf16.mxu0 %v5817_v36  ;;  %v6496_v7 = vsel %vm1489_vm3, %v6494_v30, %v6495_v25  ;;  %v6150_v53 = vld [vmem:[#allocation2 + $0x58] sm:$0x7f]  ;;  %v12016_v36 = vld [vmem:[#allocation2 + $0x28] sm:$0xff]  ;;  %v10790_v25 = vld [vmem:[#allocation14 + $0x1a8] sm:$0xff]  }
 0x5f0   : > { %v5949_v23 = vsel %vm1217_vm2, %v5944_v29, %v5948_v3  ;;  %9962 = vmatmul.mubr.bf16.vlgmr.msra.gmra.mxu0 %v5816_v11  ;;  %9970 = vmatpush3.bf16.msra.mxu1 %v10736_v9  ;;  %v6220_v9 = vor.u32 %v6219_v55, %v6216_v34  ;;  %v6212_v28 = vor.u32 %v6211_v48, %v6208_v41  ;;  %v10763_v11 = vld [vmem:[#allocation14 + $0x30] sm:$0xff]   ;;  %v6147_v29 = vld [vmem:[#allocation2 + $0x20] sm:$0x80]  ;;  %v10768_v3 = vld [vmem:[#allocation14 + $0x60] sm:$0xff]  }
 0x5f1   : > { %9981 = vmatprep.mubr.bf16.mxu1 %v5949_v23  ;;  %9364 = vmatpush3.bf16.msra.mxu0 %v10737_v57  ;;  %v10767_v57 = vld [vmem:[#allocation14 + $0x158] sm:$0xff]   ;;  %v10769_v23 = vld [vmem:[#allocation14 + $0x20] sm:$0xff]   ;;  %v12028_v34 = vld [vmem:[#allocation2 + $0x40] sm:$0xff] }
 0x5f2   : > { %6435 = vmatprep.mubr.bf16.mxu0 %v6238_v37  ;;  %9365 = vmatprep.subr.bf16.mxu0 %v10738_v13  ;;  %v6221_v33 = vsel %vm1088_vm1, %v6212_v28, %v6220_v9  ;;  %v6156_v13 = vpack.c.bf16 %v6150_v53, %v6150_v53  ;;  %v10771_v37 = vld [vmem:[#allocation14 + $0x58] sm:$0xff]   ;;  %v10785_v55 = vld [vmem:[#allocation14 + $0xa8] sm:$0xff]   ;;  %v6733_v41 = vpack.c.bf16 %v12028_v34, %v11987_v14  ;;  %v10788_v48 = vld [vmem:[#allocation14 + $0xa0] sm:$0xff]  }
 0x5f3   : > { %9971 = vmatprep.subr.bf16.mxu1 %v10739_v4  ;;  %v10791_v9 = vld [vmem:[#allocation14 + $0x98] sm:$0xff]   ;;  %v10794_v14 = vld [vmem:[#allocation14 + $0x90] sm:$0xff]   ;;  %v10793_v28 = vld [vmem:[#allocation14 + $0x1a0] sm:$0xff]  }
 0x5f4   : > { %9972 = vmatpush3.bf16.msra.mxu1 %v10739_v4  ;;  %v6153_v4 = vpack.c.bf16 %v12016_v36, %v6147_v29  ;;  %v6090_v30 = vld [vmem:[#allocation2 + $0x58] sm:$0x3f]  ;;  %v7018_v29 = vld [vmem:[#allocation2 + $0x30] sm:$0x1] }
 0x5f5   : > { %9366 = vmatpush3.bf16.msra.mxu0 %v10740_v40  ;;  %9973 = vmatprep.subr.bf16.mxu1 %v10742_v42  ;;  %v6248_v40 = vshrl.u32 %v6156_v13, 16  ;;  %v10800_v53 = vld [vmem:[#allocation14 + $0x80] sm:$0xff]  }
 0x5f6   : > { %9367 = vmatprep.subr.bf16.mxu0 %v10741_v5  ;;  %v10773_v5 = vld [vmem:[#allocation14 + $0x148] sm:$0xff]  }
 0x5f8   : > { %9974 = vmatpush3.bf16.msra.mxu1 %v10742_v42  ;;  %v6251_v42 = vshll.u32 %v6156_v13, 16 }
 0x5f9   : > { %9368 = vmatpush3.bf16.msra.mxu0 %v10743_v43  ;;  %9975 = vmatprep.subr.bf16.mxu1 %v10745_v19  ;;  %v6240_v43 = vshrl.u32 %v6153_v4, 16 }
 0x5fa   : > { %9369 = vmatprep.subr.bf16.mxu0 %v10744_v18  ;;  %v10772_v18 = vld [vmem:[#allocation14 + $0x18] sm:$0xff]  }
 0x5fc   : > { %9976 = vmatpush3.bf16.msra.mxu1 %v10745_v19  ;;  %v6243_v19 = vshll.u32 %v6153_v4, 16 }
 0x5fd   : > { %9370 = vmatpush3.bf16.msra.mxu0 %v10746_v52  ;;  %9977 = vmatprep.subr.bf16.mxu1 %v10748_v44  ;;  %v10774_v52 = vld [vmem:[#allocation14 + $0x50] sm:$0xff]  }
 0x5fe   : > { %9371 = vmatprep.subr.bf16.mxu0 %v10747_v56  ;;  %v6253_v56 = vrot.slane %v6251_v42, 4 }
 0x600   : > { %9978 = vmatpush3.bf16.msra.mxu1 %v10748_v44  ;;  %v6250_v44 = vrot.slane %v6248_v40, 3  ;;  %v10802_v40 = vld [vmem:[#allocation14 + $0x188] sm:$0xff]  }
 0x601   : > { %9372 = vmatpush3.bf16.msra.mxu0 %v10749_v35  ;;  %9979 = vmatprep.subr.bf16.mxu1 %v10751_v12  ;;  %v6242_v35 = vrot.slane %v6240_v43, 3 }
 0x602   : > { %9373 = vmatprep.subr.bf16.mxu0 %v10750_v46  ;;  %v10775_v46 = vld [vmem:[#allocation14 + $0x10] sm:$0xff]   ;;  %v6254_v63 = vor.u32 %v6253_v56, %v6250_v44  ;;  %v10807_v44 = vld [vmem:[#allocation14 + $0x2b8] sm:$0xff]  }
 0x604   : > { %9980 = vmatpush3.bf16.msra.mxu1 %v10751_v12  ;;  %v6245_v12 = vrot.slane %v6243_v19, 4  ;;  %v10806_v19 = vld [vmem:[#allocation14 + $0x230] sm:$0xff]  }
 0x605   : > { %9374 = vmatpush3.bf16.msra.mxu0 %v10752_v1  ;;  %9985 = vmatprep.subr.bf16.mxu1 %v11992_v31 }
 0x606   : > { %9375 = vmatprep.subr.bf16.mxu0 %v10753_v6  ;;  %v6246_v1 = vor.u32 %v6245_v12, %v6242_v35  ;;  %v6088_v6 = vld [vmem:[#allocation2 + $0x10] sm:$0x3f]  ;;  %v10809_v12 = vld [vmem:[#allocation14 + $0x228] sm:$0xff]  }
 0x607   : > { %9982 = vmatmul.mubr.bf16.vlgmr.msra.gmra.mxu1 %v5952_v8  ;;  %v6094_v8 = vpack.c.bf16 %v6088_v6, %v6088_v6 }
 0x608   : > { %9986 = vmatpush3.bf16.msra.mxu1 %v10755_v54  ;;  %10001 = vmatprep.mubr.msk.bf16.mxu1 %vm11197_vm0, %v11992_v31  ;;  %v6255_v47 = vsel %vm1088_vm1, %v6246_v1, %v6254_v63  ;;  %v6082_v54 = vld [vmem:[#allocation2 + $0x60] sm:$0xc0] }
 0x609   : > { %9376 = vmatpush3.bf16.msra.mxu0 %v10754_v15  ;;  %9987 = vmatprep.subr.bf16.mxu1 %v11992_v31  ;;  %v10782_v15 = vld [vmem:[#allocation14 + $0xb0] sm:$0xff]   ;;  %v6091_v16 = vpack.c.bf16 %v11997_v24, %v6082_v54  ;;  %v10815_v54 = vld [vmem:[#allocation14 + $0x218] sm:$0xff]  }
 0x60a   : > { %9377 = vmatprep.subr.bf16.mxu0 %v10756_v58  ;;  %v6492_v58 = vrot.slane %v6094_v8, 3  ;;  %v10816_v8 = vld [vmem:[#allocation14 + $0x2a0] sm:$0xff]  }
 0x60b   : > { %v6491_v50 = vrot.slane %v6091_v16, 3  ;;  %v10819_v16 = vld [vmem:[#allocation14 + $0x298] sm:$0xff]  }
 0x60c   : > { %9988 = vmatpush3.bf16.msra.mxu1 %v10758_v20  ;;  %v10784_v20 = vld [vmem:[#allocation14 + $0x1b8] sm:$0xff]  }
 0x60d   : > { %9378 = vmatpush3.bf16.msra.mxu0 %v10757_v21  ;;  %9989 = vmatprep.subr.bf16.mxu1 %v11992_v31  ;;  %v6493_v21 = vsel %vm1489_vm3, %v6491_v50, %v6492_v58  ;;  %v7011_v58 = vld [vmem:[#allocation2 + $0x50] sm:$0xfe]  ;;  %v10822_v50 = vld [vmem:[#allocation14 + $0x290] sm:$0xff]  }
 0x60e   : > { %9394 = vmatprep.subr.bf16.mxu0 %v10759_v22  ;;  %v10787_v22 = vld [vmem:[#allocation14 + $0x1b0] sm:$0xff]  }
 0x610   : > { %6436 = vmatmul.mubr.bf16.vlgmr.msra.gmra.mxu0 %v6221_v33  ;;  %9990 = vmatpush3.bf16.msra.mxu1 %v10761_v26  ;;  %v10792_v26 = vld [vmem:[#allocation14 + $0x1e0] sm:$0xff]   ;;  %v10796_v33 = vld [vmem:[#allocation14 + $0x198] sm:$0xff]  }
 0x611   : > { %9395 = vmatpush3.bf16.msra.mxu0 %v10760_v38  ;;  %6679 = vmatprep.mubr.bf16.mxu0 %v6496_v7  ;;  %v10795_v38 = vld [vmem:[#allocation14 + $0x1d8] sm:$0xff]   ;;  %v6084_v7 = vld [vmem:[#allocation2 + $0x20] sm:$0xc0] }
 0x612   : > { %9396 = vmatprep.subr.bf16.mxu0 %v10762_v32  ;;  %9991 = vmatprep.subr.bf16.mxu1 %v11992_v31  ;;  %v10797_v32 = vld [vmem:[#allocation14 + $0x88] sm:$0xff]  }
 0x614   : > { %9992 = vmatpush3.bf16.msra.mxu1 %v10764_v2  ;;  %v10798_v2 = vld [vmem:[#allocation14 + $0x1d0] sm:$0xff]  }
 0x615   : > { %9397 = vmatpush3.bf16.msra.mxu0 %v10763_v11  ;;  %9993 = vmatprep.subr.bf16.mxu1 %v11992_v31  ;;  %v6096_v11 = vpack.c.bf16 %v6090_v30, %v6090_v30  ;;  %v10828_v30 = vld [vmem:[#allocation14 + $0x280] sm:$0xff]  }
 0x616   : > { %9398 = vmatprep.subr.bf16.mxu0 %v10765_v27  ;;  %v7012_v27 = vld [vmem:[#allocation2 + $0x68] sm:$0xfe] }
 0x617   : > { %v6498_v13 = vrot.slane %v6096_v11, 3 }
 0x618   : > { %9994 = vmatpush3.bf16.msra.mxu1 %v10767_v57  ;;  %v6093_v57 = vpack.c.bf16 %v12016_v36, %v6084_v7  ;;  %v7342_v7 = vld [vmem:[#allocation2 + $0x68] sm:$0xfc] }
 0x619   : > { %9399 = vmatpush3.bf16.msra.mxu0 %v10766_v39  ;;  %9995 = vmatprep.subr.bf16.mxu1 %v11992_v31  ;;  %v10799_v39 = vld [vmem:[#allocation14 + $0x190] sm:$0xff]  }
 0x61a   : > { %9400 = vmatprep.subr.bf16.mxu0 %v10768_v3  ;;  %v10801_v3 = vld [vmem:[#allocation14 + $0x1c8] sm:$0xff]   ;;  %v6497_v4 = vrot.slane %v6093_v57, 3  ;;  %v7348_v57 = vpack.c.bf16 %v12028_v34, %v7342_v7  ;;  %v10860_v7 = vld [vmem:[#allocation14 + $0x380] sm:$0xff]  }
 0x61c   : > { %9996 = vmatpush3.bf16.msra.mxu1 %v10770_v45  ;;  %v7021_v45 = vpack.c.bf16 %v12028_v34, %v7012_v27  ;;  %v6499_v42 = vsel %vm1489_vm3, %v6497_v4, %v6498_v13  ;;  %v10829_v27 = vld [vmem:[#allocation14 + $0x240] sm:$0xff]   ;;  %v10833_v13 = vld [vmem:[#allocation14 + $0x2e8] sm:$0xff]   ;;  %v7410_v4 = vrot.slane %v7348_v57, 1  ;;  %v10835_v34 = vld [vmem:[#allocation14 + $0x330] sm:$0xff]  }
 0x61d   : > { %9401 = vmatpush3.bf16.msra.mxu0 %v10769_v23  ;;  %9997 = vmatprep.subr.bf16.mxu1 %v11992_v31  ;;  %v10803_v23 = vld [vmem:[#allocation14 + $0x238] sm:$0xff]  }
 0x61e   : > { %9402 = vmatprep.subr.bf16.mxu0 %v10771_v37  ;;  %v7024_v37 = vpack.c.bf16 %v7018_v29, %v7018_v29  ;;  %v7089_v43 = vshll.u32 %v7021_v45, 16 }
 0x620   : > { %9998 = vmatpush3.bf16.msra.mxu1 %v10773_v5  ;;  %v10804_v5 = vld [vmem:[#allocation14 + $0x1c0] sm:$0xff]   ;;  %v7091_v56 = vrot.slane %v7089_v43, 1  ;;  %v10839_v43 = vld [vmem:[#allocation14 + $0x2d8] sm:$0xff]  }
 0x621   : > { %9403 = vmatpush3.bf16.msra.mxu0 %v10772_v18  ;;  %9999 = vmatprep.subr.bf16.mxu1 %v11992_v31  ;;  %v7094_v18 = vshll.u32 %v7024_v37, 16 }
 0x622   : > { %9404 = vmatprep.subr.bf16.mxu0 %v10774_v52  ;;  %v10805_v52 = vld [vmem:[#allocation14 + $0x180] sm:$0xff]  }
 0x623   : > { %v7096_v35 = vrot.slane %v7094_v18, 1  ;;  %v10840_v18 = vld [vmem:[#allocation14 + $0x360] sm:$0xff]  }
 0x624   : > { %10000 = vmatpush3.bf16.msra.mxu1 %v10776_v49  ;;  %v7087_v49 = vshrl.u32 %v7021_v45, 16  ;;  %v10832_v45 = vld [vmem:[#allocation14 + $0x338] sm:$0xff]  }
 0x625   : > { %9405 = vmatpush3.bf16.msra.mxu0 %v10775_v46  ;;  %10005 = vmatprep.subr.bf16.mxu1 %v11992_v31  ;;  %v10808_v46 = vld [vmem:[#allocation14 + $0x278] sm:$0xff]  }
 0x626   : > { %9406 = vmatprep.subr.bf16.mxu0 %v10777_v62  ;;  %v10892_v62 = vld [vmem:[%s11805_s4 + $0x18] sm:$0xff]  ;;  %v7092_v1 = vor.u32 %v7091_v56, %v7087_v49  ;;  %v10842_v56 = vld [vmem:[#allocation14 + $0x2d0] sm:$0xff]   ;;  %s11199_s4 = smov [#allocation17]  }
 0x627   : > { %10002 = vmatmul.mubr.bf16.vlgmr.msra.gmra.mxu1 %v6255_v47  ;;  %v6732_v63 = vpack.c.bf16 %v10892_v62, %v11997_v24  ;;  %v10811_v47 = vld [vmem:[#allocation14 + $0x270] sm:$0xff]   ;;  %v10814_v24 = vld [vmem:[#allocation14 + $0x268] sm:$0xff]   ;;  %s11106_s7 = sshll.u32 %s11199_s4, 4  ;;  %s11107_s7 = int_to_ptr.vmem [resolvable:$false] %s11106_s7 }
 0x628   : > { %10006 = vmatpush3.bf16.msra.mxu1 %v10779_v0  ;;  %10021 = vmatprep.mubr.msk.bf16.mxu1 %vm11197_vm0, %v11992_v31  ;;  %v10810_v0 = vld [vmem:[#allocation14 + $0x2b0] sm:$0xff]   ;;  %v7097_v6 = vsel %vm1217_vm2, %v7092_v1, %v7096_v35  ;;  %v10841_v35 = vld [vmem:[#allocation14 + $0x320] sm:$0xff]   ;;  %v10845_v62 = vld [vmem:[#allocation14 + $0x2c8] sm:$0xff]   ;;  %s11108_s29 = scalar_lea.vmem %s11107_s7, 1536  ;;  %p11109_p7 = scmp.lt.s32.totalorder %s12140_s0, %s11107_s7 }
 0x629   : > { %9407 = vmatpush3.bf16.msra.mxu0 %v10778_v10  ;;  %10007 = vmatprep.subr.bf16.mxu1 %v11992_v31  ;;  %v10812_v10 = vld [vmem:[#allocation14 + $0x220] sm:$0xff]   ;;  %v10844_v1 = vld [vmem:[#allocation14 + $0x318] sm:$0xff]   ;;  %p11110_p8 = scmp.lt.s32.totalorder %s11108_s29, %s11102_s1 }
 0x62a   : > { %9408 = vmatprep.subr.bf16.mxu0 %v10780_v51  ;;  %v10813_v51 = vld [vmem:[#allocation14 + $0x2a8] sm:$0xff]  }
 0x62b   : > { %p11111_p0 = por %p11110_p8, %p11109_p7 }
 0x62c   : > { %10008 = vmatpush3.bf16.msra.mxu1 %v10782_v15  ;;  %v10818_v15 = vld [vmem:[#allocation14 + $0x210] sm:$0xff]  }
 0x62d   : > { %9409 = vmatpush3.bf16.msra.mxu0 %v10781_v61  ;;  %10009 = vmatprep.subr.bf16.mxu1 %v11992_v31  ;;  %v10817_v61 = vld [vmem:[#allocation14 + $0x260] sm:$0xff]   ;;  %p11112_p12 = pnand %p11111_p0, %p11105_p3 }
 0x62e   : > { %9425 = vmatprep.subr.bf16.mxu0 %v10783_v17  ;;  %v10821_v17 = vld [vmem:[#allocation14 + $0x208] sm:$0xff]  }
 0x630   : > { %6680 = vmatmul.mubr.bf16.vlgmr.msra.gmra.mxu0 %v6493_v21  ;;  %10010 = vmatpush3.bf16.msra.mxu1 %v10785_v55  ;;  %v10820_v55 = vld [vmem:[#allocation14 + $0x258] sm:$0xff]   ;;  %v10824_v21 = vld [vmem:[#allocation14 + $0x200] sm:$0xff]  }
 0x631   : > { %9426 = vmatpush3.bf16.msra.mxu0 %v10784_v20  ;;  %6959 = vmatprep.mubr.bf16.mxu0 %v6733_v41  ;;  %v12054_v20 = vld [vmem:[#allocation2 + $0x10] sm:$0xff]  ;;  %v7017_v41 = vld [vmem:[#allocation2 + $0x48] sm:$0x1] }
 0x632   : > { %9427 = vmatprep.subr.bf16.mxu0 %v10786_v59  ;;  %10011 = vmatprep.subr.bf16.mxu1 %v11992_v31  ;;  %v7020_v59 = vpack.c.bf16 %v12054_v20, %v7011_v58  ;;  %v10850_v58 = vld [vmem:[#allocation14 + $0x308] sm:$0xff]  }
 0x634   : > { %10012 = vmatpush3.bf16.msra.mxu1 %v10788_v48  ;;  %v10823_v48 = vld [vmem:[#allocation14 + $0x250] sm:$0xff]  }
 0x635   : > { %9428 = vmatpush3.bf16.msra.mxu0 %v10787_v22  ;;  %10013 = vmatprep.subr.bf16.mxu1 %v11992_v31  ;;  %v10825_v22 = vld [vmem:[#allocation14 + $0x288] sm:$0xff]  }
 0x636   : > { %9429 = vmatprep.subr.bf16.mxu0 %v10789_v60  ;;  %v12058_v60 = vld [vmem:[#allocation2 + $0x58] sm:$0xff] }
 0x638   : > { %10014 = vmatpush3.bf16.msra.mxu1 %v10791_v9  ;;  %v7023_v9 = vpack.c.bf16 %v7017_v41, %v7017_v41  ;;  %v10854_v41 = vld [vmem:[#allocation14 + $0x3b0] sm:$0xff]  }
 0x639   : > { %9430 = vmatpush3.bf16.msra.mxu0 %v10790_v25  ;;  %10015 = vmatprep.subr.bf16.mxu1 %v11992_v31  ;;  %v7077_v25 = vshll.u32 %v7020_v59, 16 }
 0x63a   : > { %9431 = vmatprep.subr.bf16.mxu0 %v10792_v26  ;;  %v10827_v26 = vld [vmem:[#allocation14 + $0x2f8] sm:$0xff]  }
 0x63c   : > { %10016 = vmatpush3.bf16.msra.mxu1 %v10794_v14  ;;  %v6734_v14 = vpack.c.bf16 %v12058_v60, %v12016_v36  ;;  %v7075_v36 = vshrl.u32 %v7020_v59, 16 }
 0x63d   : > { %9432 = vmatpush3.bf16.msra.mxu0 %v10793_v28  ;;  %10017 = vmatprep.subr.bf16.mxu1 %v11992_v31  ;;  %v10826_v28 = vld [vmem:[#allocation14 + $0x248] sm:$0xff]  }
 0x63e   : > { %9433 = vmatprep.subr.bf16.mxu0 %v10795_v38  ;;  %v7345_v38 = vld [vmem:[#allocation2 + $0x30] sm:$0x3] }
 0x63f   : > { %v7351_v11 = vpack.c.bf16 %v7345_v38, %v7345_v38  ;;  %v7346_v38 = vld [vmem:[#allocation2 + $0x38] sm:$0x3] }
 0x640   : > { %10018 = vmatpush3.bf16.msra.mxu1 %v10797_v32  ;;  %v7079_v32 = vrot.slane %v7077_v25, 1  ;;  %v10855_v25 = vld [vmem:[#allocation14 + $0x3a8] sm:$0xff]  }
 0x641   : > { %9434 = vmatpush3.bf16.msra.mxu0 %v10796_v33  ;;  %10019 = vmatprep.subr.bf16.mxu1 %v11992_v31  ;;  %v7082_v33 = vshll.u32 %v7023_v9, 16 }
 0x642   : > { %9435 = vmatprep.subr.bf16.mxu0 %v10798_v2  ;;  %v10830_v2 = vld [vmem:[#allocation14 + $0x2f0] sm:$0xff]  }
 0x643   : > { %v7084_v29 = vrot.slane %v7082_v33, 1  ;;  %v7343_v33 = vld [vmem:[#allocation2 + $0x28] sm:$0xfc] }
 0x644   : > { %10020 = vmatpush3.bf16.msra.mxu1 %v10800_v53  ;;  %v10831_v53 = vld [vmem:[#allocation14 + $0x378] sm:$0xff]  }
 0x645   : > { %9436 = vmatpush3.bf16.msra.mxu0 %v10799_v39  ;;  %10025 = vmatprep.subr.bf16.mxu1 %v11992_v31  ;;  %v7080_v39 = vor.u32 %v7079_v32, %v7075_v36  ;;  %v7352_v32 = vpack.c.bf16 %v7346_v38, %v7346_v38 }
 0x646   : > { %9437 = vmatprep.subr.bf16.mxu0 %v10801_v3  ;;  %v7411_v3 = vrot.slane %v7351_v11, 1 }
 0x647   : > { %10022 = vmatmul.mubr.bf16.vlgmr.msra.gmra.mxu1 %v6499_v42  ;;  %v7085_v37 = vsel %vm1217_vm2, %v7080_v39, %v7084_v29  ;;  %v10836_v42 = vld [vmem:[#allocation14 + $0x2e0] sm:$0xff]   ;;  %v7414_v11 = vrot.slane %v7352_v32, 1 }
 0x648   : > { %10026 = vmatpush3.bf16.msra.mxu1 %v10803_v23  ;;  %10041 = vmatprep.mubr.msk.bf16.mxu1 %vm11197_vm0, %v11992_v31  ;;  %v10834_v23 = vld [vmem:[#allocation14 + $0x370] sm:$0xff]  }
 0x649   : > { %9438 = vmatpush3.bf16.msra.mxu0 %v10802_v40  ;;  %10027 = vmatprep.subr.bf16.mxu1 %v11992_v31  ;;  %v7412_v40 = vsel %vm1839_vm4, %v7410_v4, %v7411_v3 }
 0x64a   : > { %9439 = vmatprep.subr.bf16.mxu0 %v10804_v5  ;;  %v10837_v5 = vld [vmem:[#allocation14 + $0x368] sm:$0xff]  }
 0x64c   : > { %10028 = vmatpush3.bf16.msra.mxu1 %v10806_v19  ;;  %v10838_v19 = vld [vmem:[#allocation14 + $0x328] sm:$0xff]  }
 0x64d   : > { %9440 = vmatpush3.bf16.msra.mxu0 %v10805_v52  ;;  %10029 = vmatprep.subr.bf16.mxu1 %v11992_v31  ;;  %v7013_v52 = vld [vmem:[#allocation2 + $0x28] sm:$0xfe] }
 0x64e   : > { %9456 = vmatprep.subr.bf16.mxu0 %v10807_v44  ;;  %v7019_v44 = vld [vmem:[#allocation2 + $0x38] sm:$0x1]  ;;  %v7022_v49 = vpack.c.bf16 %v12058_v60, %v7013_v52 }
 0x650   : > { %6960 = vmatmul.mubr.bf16.vlgmr.msra.gmra.mxu0 %v6732_v63  ;;  %10030 = vmatpush3.bf16.msra.mxu1 %v10809_v12  ;;  %v10843_v12 = vld [vmem:[#allocation14 + $0x358] sm:$0xff]   ;;  %v7101_v63 = vshll.u32 %v7022_v49, 16 }
 0x651   : > { %9457 = vmatpush3.bf16.msra.mxu0 %v10808_v46  ;;  %7289 = vmatprep.mubr.bf16.mxu0 %v7097_v6  ;;  %v7025_v46 = vpack.c.bf16 %v7019_v44, %v7019_v44 }
 0x652   : > { %9458 = vmatprep.subr.bf16.mxu0 %v10810_v0  ;;  %10031 = vmatprep.subr.bf16.mxu1 %v11992_v31  ;;  %v10846_v0 = vld [vmem:[#allocation14 + $0x350] sm:$0xff]  }
 0x653   : > { %v7106_v6 = vshll.u32 %v7025_v46, 16 }
 0x654   : > { %10032 = vmatpush3.bf16.msra.mxu1 %v10812_v10  ;;  %v10848_v10 = vld [vmem:[#allocation14 + $0x2c0] sm:$0xff]  }
 0x655   : > { %9459 = vmatpush3.bf16.msra.mxu0 %v10811_v47  ;;  %10033 = vmatprep.subr.bf16.mxu1 %v11992_v31  ;;  %v7103_v47 = vrot.slane %v7101_v63, 1 }
 0x656   : > { %9460 = vmatprep.subr.bf16.mxu0 %v10813_v51  ;;  %v10847_v51 = vld [vmem:[#allocation14 + $0x310] sm:$0xff]  }
 0x658   : > { %10034 = vmatpush3.bf16.msra.mxu1 %v10815_v54  ;;  %v10849_v54 = vld [vmem:[#allocation14 + $0x348] sm:$0xff]  }
 0x659   : > { %9461 = vmatpush3.bf16.msra.mxu0 %v10814_v24  ;;  %10035 = vmatprep.subr.bf16.mxu1 %v11992_v31  ;;  %v7099_v24 = vshrl.u32 %v7022_v49, 16 }
 0x65a   : > { %9462 = vmatprep.subr.bf16.mxu0 %v10816_v8  ;;  %v7108_v8 = vrot.slane %v7106_v6, 1  ;;  %v10862_v6 = vld [vmem:[#allocation15 + $0x70] sm:$0xff]  }
 0x65c   : > { %10036 = vmatpush3.bf16.msra.mxu1 %v10818_v15  ;;  %v7104_v15 = vor.u32 %v7103_v47, %v7099_v24 }
 0x65d   : > { %9463 = vmatpush3.bf16.msra.mxu0 %v10817_v61  ;;  %10037 = vmatprep.subr.bf16.mxu1 %v11992_v31  ;;  %v10851_v61 = vld [vmem:[#allocation14 + $0x3b8] sm:$0xff]  }
 0x65e   : > { %9464 = vmatprep.subr.bf16.mxu0 %v10819_v16  ;;  %v7341_v16 = vld [vmem:[#allocation2 + $0x50] sm:$0xfc] }
 0x65f   : > { %v7347_v59 = vpack.c.bf16 %v12054_v20, %v7341_v16  ;;  %v10865_v16 = vld [vmem:[#allocation15 + $0x60] sm:$0xff]  }
 0x660   : > { %10038 = vmatpush3.bf16.msra.mxu1 %v10821_v17  ;;  %v7344_v17 = vld [vmem:[#allocation2 + $0x48] sm:$0x3] }
 0x661   : > { %9465 = vmatpush3.bf16.msra.mxu0 %v10820_v55  ;;  %10039 = vmatprep.subr.bf16.mxu1 %v11992_v31  ;;  %v7109_v55 = vsel %vm1217_vm2, %v7104_v15, %v7108_v8  ;;  %v12106_v8 = vld [vmem:[#allocation2 + $0x60] sm:$0xff] }
 0x662   : > { %9466 = vmatprep.subr.bf16.mxu0 %v10822_v50  ;;  %v10852_v50 = vld [vmem:[#allocation14 + $0x340] sm:$0xff]  }
 0x664   : > { %10040 = vmatpush3.bf16.msra.mxu1 %v10824_v21  ;;  %v7350_v21 = vpack.c.bf16 %v7344_v17, %v7344_v17 }
 0x665   : > { %9467 = vmatpush3.bf16.msra.mxu0 %v10823_v48  ;;  %10045 = vmatprep.subr.bf16.mxu1 %v11992_v31  ;;  %v10853_v48 = vld [vmem:[#allocation14 + $0x300] sm:$0xff]  }
 0x666   : > { %9468 = vmatprep.subr.bf16.mxu0 %v10825_v22  ;;  %v7407_v22 = vrot.slane %v7347_v59, 1  ;;  %v7408_v9 = vrot.slane %v7350_v21, 1  ;;  %v10869_v59 = vld [vmem:[#allocation15 + $0x50] sm:$0xff]  }
 0x667   : > { %10042 = vmatmul.mubr.bf16.vlgmr.msra.gmra.mxu1 %v6734_v14  ;;  %v10857_v14 = vld [vmem:[#allocation14 + $0x398] sm:$0xff]  }
 0x668   : > { %10046 = vmatpush3.bf16.msra.mxu1 %v10827_v26  ;;  %10061 = vmatprep.mubr.msk.bf16.mxu1 %vm11197_vm0, %v11992_v31  ;;  %v7409_v20 = vsel %vm1839_vm4, %v7407_v22, %v7408_v9  ;;  %v10856_v26 = vld [vmem:[#allocation14 + $0x3a0] sm:$0xff]  }
 0x669   : > { %9469 = vmatpush3.bf16.msra.mxu0 %v10826_v28  ;;  %10047 = vmatprep.subr.bf16.mxu1 %v11992_v31  ;;  %v10858_v28 = vld [vmem:[#allocation14 + $0x390] sm:$0xff]   ;;  %v10870_v9 = vld [vmem:[#allocation15 + $0x20] sm:$0xff]  }
 0x66a   : > { %9470 = vmatprep.subr.bf16.mxu0 %v10828_v30  ;;  %v10859_v30 = vld [vmem:[#allocation14 + $0x388] sm:$0xff]  }
 0x66c   : > { %10048 = vmatpush3.bf16.msra.mxu1 %v10830_v2  ;;  %v7349_v2 = vpack.c.bf16 %v12058_v60, %v7343_v33 }
 0x66d   : > { %9471 = vmatpush3.bf16.msra.mxu0 %v10829_v27  ;;  %10049 = vmatprep.subr.bf16.mxu1 %v11992_v31 }
 0x66e   : > { %9487 = vmatprep.subr.bf16.mxu0 %v10831_v53  ;;  %v7413_v27 = vrot.slane %v7349_v2, 1 }
 0x670   : > { %7290 = vmatmul.mubr.bf16.vlgmr.msra.gmra.mxu0 %v7085_v37  ;;  %10050 = vmatpush3.bf16.msra.mxu1 %v10833_v13  ;;  %v7415_v36 = vsel %vm1839_vm4, %v7413_v27, %v7414_v11  ;;  %v10875_v27 = vld [vmem:[#allocation15 + $0x8] sm:$0xff]  }
 0x671   : > { %9488 = vmatpush3.bf16.msra.mxu0 %v10832_v45  ;;  %7595 = vmatprep.mubr.bf16.mxu0 %v7412_v40 }
 0x672   : > { %9489 = vmatprep.subr.bf16.mxu0 %v10834_v23  ;;  %10051 = vmatprep.subr.bf16.mxu1 %v11992_v31  ;;  %v8840_v23 = vld [vmem:[%s12210_s13] ss:$0 sm:$0xff] }
 0x674   : > { %10052 = vmatpush3.bf16.msra.mxu1 %v10836_v42 }
 0x675   : > { %9490 = vmatpush3.bf16.msra.mxu0 %v10835_v34  ;;  %10053 = vmatprep.subr.bf16.mxu1 %v11992_v31 }
 0x676   : > { %9491 = vmatprep.subr.bf16.mxu0 %v10837_v5 }
 0x678   : > { %10054 = vmatpush3.bf16.msra.mxu1 %v10839_v43 }
 0x679   : > { %9492 = vmatpush3.bf16.msra.mxu0 %v10838_v19  ;;  %10055 = vmatprep.subr.bf16.mxu1 %v11992_v31 }
 0x67a   : > { %9493 = vmatprep.subr.bf16.mxu0 %v10840_v18 }
 0x67c   : > { %10056 = vmatpush3.bf16.msra.mxu1 %v10842_v56 }
 0x67d   : > { %9494 = vmatpush3.bf16.msra.mxu0 %v10841_v35  ;;  %10057 = vmatprep.subr.bf16.mxu1 %v11992_v31 }
 0x67e   : > { %9495 = vmatprep.subr.bf16.mxu0 %v10843_v12 }
 0x680   : > { %10058 = vmatpush3.bf16.msra.mxu1 %v10845_v62 }
 0x681   : > { %9496 = vmatpush3.bf16.msra.mxu0 %v10844_v1  ;;  %10059 = vmatprep.subr.bf16.mxu1 %v11992_v31 }
 0x682   : > { %9497 = vmatprep.subr.bf16.mxu0 %v10846_v0  ;;  %v10861_v0 = vld [vmem:[#allocation15 + $0x78] sm:$0xff]  }
 0x684   : > { %10060 = vmatpush3.bf16.msra.mxu1 %v10848_v10 }
 0x685   : > { %9498 = vmatpush3.bf16.msra.mxu0 %v10847_v51  ;;  %10065 = vmatprep.subr.bf16.mxu1 %v11992_v31 }
 0x686   : > { %9499 = vmatprep.subr.bf16.mxu0 %v10849_v54  ;;  %v10863_v54 = vld [vmem:[#allocation15 + $0x68] sm:$0xff]  }
 0x687   : > { %10062 = vmatmul.mubr.bf16.vlgmr.msra.gmra.mxu1 %v7109_v55  ;;  %v10867_v55 = vld [vmem:[#allocation15 + $0x58] sm:$0xff]  }
 0x688   : > { %10066 = vmatpush3.bf16.msra.mxu1 %v10851_v61  ;;  %10081 = vmatprep.mubr.msk.bf16.mxu1 %vm11197_vm0, %v11992_v31 }
 0x689   : > { %9500 = vmatpush3.bf16.msra.mxu0 %v10850_v58  ;;  %10067 = vmatprep.subr.bf16.mxu1 %v11992_v31  ;;  %v10864_v58 = vld [vmem:[#allocation15 + $0x38] sm:$0xff]  }
 0x68a   : > { %9501 = vmatprep.subr.bf16.mxu0 %v10852_v50  ;;  %v10866_v50 = vld [vmem:[#allocation15 + $0x30] sm:$0xff]  }
 0x68c   : > { %10068 = vmatpush3.bf16.msra.mxu1 %v10854_v41  ;;  %v10868_v41 = vld [vmem:[#allocation15 + $0x28] sm:$0xff]  }
 0x68d   : > { %9502 = vmatpush3.bf16.msra.mxu0 %v10853_v48  ;;  %10069 = vmatprep.subr.bf16.mxu1 %v11992_v31  ;;  %v10871_v48 = vld [vmem:[#allocation15 + $0x48] sm:$0xff]  }
 0x68e   : > { %10085 = vmatprep.subr.bf16.mxu0 %v11992_v31 }
 0x690   : > { %7596 = vmatmul.mubr.bf16.vlgmr.msra.gmra.mxu0 %v7409_v20  ;;  %10070 = vmatpush3.bf16.msra.mxu1 %v10855_v25  ;;  %v10873_v25 = vld [vmem:[#allocation15 + $0x40] sm:$0xff]  }
 0x691   : > { %10071 = vmatprep.subr.bf16.mxu1 %v11992_v31  ;;  %10101 = vmatprep.mubr.msk.bf16.mxu0 %vm11197_vm0, %v11992_v31 }
 0x692   : > { %10086 = vmatpush3.bf16.msra.mxu0 %v10861_v0 }
 0x693   : > { %10087 = vmatprep.subr.bf16.mxu0 %v11992_v31 }
 0x694   : > { %10072 = vmatpush3.bf16.msra.mxu1 %v10856_v26  ;;  %v10872_v26 = vld [vmem:[#allocation15 + $0x18] sm:$0xff]  }
 0x695   : > { %10073 = vmatprep.subr.bf16.mxu1 %v11992_v31 }
 0x696   : > { %10088 = vmatpush3.bf16.msra.mxu0 %v10862_v6 }
 0x697   : > { %10089 = vmatprep.subr.bf16.mxu0 %v11992_v31 }
 0x698   : > { %10074 = vmatpush3.bf16.msra.mxu1 %v10857_v14 }
 0x699   : > { %10075 = vmatprep.subr.bf16.mxu1 %v11992_v31 }
 0x69a   : > { %10090 = vmatpush3.bf16.msra.mxu0 %v10863_v54 }
 0x69b   : > { %10091 = vmatprep.subr.bf16.mxu0 %v12106_v8 }
 0x69c   : > { %10076 = vmatpush3.bf16.msra.mxu1 %v10858_v28 }
 0x69d   : > { %10077 = vmatprep.subr.bf16.mxu1 %v11992_v31 }
 0x69e   : > { %10092 = vmatpush3.bf16.msra.mxu0 %v10865_v16 }
 0x69f   : > { %10093 = vmatprep.subr.bf16.mxu0 %v12106_v8 }
 0x6a0   : > { %10078 = vmatpush3.bf16.msra.mxu1 %v10859_v30  ;;  %v10874_v30 = vld [vmem:[#allocation15 + $0x10] sm:$0xff]  }
 0x6a1   : > { %10079 = vmatprep.subr.bf16.mxu1 %v11992_v31 }
 0x6a2   : > { %10094 = vmatpush3.bf16.msra.mxu0 %v10867_v55  ;;  %v8961_v55 = vld [vmem:[%s12212_s15] ss:$0 sm:$0xff] }
 0x6a3   : > { %10095 = vmatprep.subr.bf16.mxu0 %v12106_v8 }
 0x6a4   : > { %10080 = vmatpush3.bf16.msra.mxu1 %v10860_v7 }
 0x6a5   : > { %10105 = vmatprep.subr.bf16.mxu1 %v11992_v31 }
 0x6a6   : > { %10096 = vmatpush3.bf16.msra.mxu0 %v10869_v59 }
 0x6a7   : > { %10082 = vmatmul.mubr.bf16.vlgmr.msra.gmra.mxu1 %v7415_v36  ;;  %v9943_v53 = vpop.f32.mrf.mxu1  ;;  %10097 = vmatprep.subr.bf16.mxu0 %v12106_v8 }
 0x6a8   : > { %10121 = vmatprep.mubr.msk.bf16.mxu1 %vm11197_vm0, %v11992_v31  ;;  %10106 = vmatpush3.bf16.msra.mxu1 %v10864_v58 }
 0x6a9   : > { %v5787_v57 = vpop.f32.mrf.mxu1  ;;  %10107 = vmatprep.subr.bf16.mxu1 %v12106_v8 }
 0x6aa   : > { %10098 = vmatpush3.bf16.msra.mxu0 %v10871_v48 }
 0x6ab   : > { %v9944_v39 = vpop.f32.mrf.mxu1  ;;  %10099 = vmatprep.subr.bf16.mxu0 %v12106_v8 }
 0x6ac   : > { %10108 = vmatpush3.bf16.msra.mxu1 %v10866_v50 }
 0x6ad   : > { %v5790_v13 = vpop.f32.mrf.mxu1  ;;  %10109 = vmatprep.subr.bf16.mxu1 %v12106_v8 }
 0x6ae   : > { %10100 = vmatpush3.bf16.msra.mxu0 %v10873_v25 }
 0x6af   : > { %10125 = vmatprep.subr.bf16.mxu0 %v12106_v8 }
 0x6b0   : > { %v9963_v29 = vpop.f32.mrf.mxu0  ;;  %10110 = vmatpush3.bf16.msra.mxu1 %v10868_v41 }
 0x6b1   : > { %v5911_v45 = vadd.f32 %v9963_v29, %v9943_v53  ;;  %10111 = vmatprep.subr.bf16.mxu1 %v12106_v8 }
 0x6b2   : > { %v5902_v3 = vpop.f32.mrf.mxu0 }
 0x6b3   : > { %v5903_v37 = vadd.f32 %v5902_v3, %v5787_v57  ;;  %v10877_v3 = vld [vmem:[#allocation15] sm:$0xff]  }
 0x6b4   : > { %v9964_v60 = vpop.f32.mrf.mxu0  ;;  %10112 = vmatpush3.bf16.msra.mxu1 %v10870_v9 }
 0x6b5   : > { %10113 = vmatprep.subr.bf16.mxu1 %v12106_v8 }
 0x6b6   : > { %v5905_v42 = vpop.f32.mrf.mxu0 }
 0x6b7   : > { %v5906_v18 = vadd.f32 %v5905_v42, %v5790_v13 }
 0x6b8   : > { %10114 = vmatpush3.bf16.msra.mxu1 %v10872_v26 }
 0x6b9   : > { %10115 = vmatprep.subr.bf16.mxu1 %v12106_v8 }
 0x6bc   : > { %10116 = vmatpush3.bf16.msra.mxu1 %v10874_v30 }
 0x6bd   : > { %10117 = vmatprep.subr.bf16.mxu1 %v12106_v8 }
 0x6c0   : > { %10118 = vmatpush3.bf16.msra.mxu1 %v10875_v27 }
 0x6c1   : > { %10119 = vmatprep.subr.bf16.mxu1 %v12106_v8 }
 0x6c4   : > { %10120 = vmatpush3.bf16.msra.mxu1 %v10877_v3 }
 0x6c7   : > { %v9983_v4 = vpop.f32.mrf.mxu1 }
 0x6c8   : > { %v6053_v40 = vadd.f32 %v9983_v4, %v5911_v45 }
 0x6c9   : > { %v6037_v34 = vpop.f32.mrf.mxu1 }
 0x6ca   : > { %v6063_v5 = vadd.f32 %v8840_v23, %v6053_v40  ;;  %v6051_v43 = vadd.f32 %v6037_v34, %v5903_v37 }
 0x6cb   : > { %v9984_v19 = vpop.f32.mrf.mxu1 }
 0x6cc   : > { %v6066_v52 = vmul.f32 0.2, %v6063_v5  ;;  %v6061_v44 = vadd.f32 %v8840_v23, %v6051_v43 }
 0x6cd   : > { %v6040_v56 = vpop.f32.mrf.mxu1 }
 0x6ce   : > { %v6069_v49 = vmax.f32 %v6063_v5, %v6066_v52  ;;  %v6064_v35 = vmul.f32 0.2, %v6061_v44  ;;  %v6052_v12 = vadd.f32 %v6040_v56, %v5906_v18 }
 0x6d0   : > { %6072 = vst [vmem:[%s935_s2 + $0x10] sm:$0xff] %v6069_v49  ;;  %v6067_v46 = vmax.f32 %v6061_v44, %v6064_v35  ;;  %v6062_v62 = vadd.f32 %v8840_v23, %v6052_v12  ;;  %v9379_v47 = vpop.f32.mrf.mxu0 }
 0x6d2   : > { %6070 = vst [vmem:[%s935_s2] sm:$0xff] %v6067_v46  ;;  %v6065_v63 = vmul.f32 0.2, %v6062_v62  ;;  %v9380_v15 = vpop.f32.mrf.mxu0 }
 0x6d3   : > { %v9381_v14 = vadd.f32 %v9380_v15, %v9379_v47 }
 0x6d4   : > { %v6068_v1 = vmax.f32 %v6062_v62, %v6065_v63  ;;  %v9382_v17 = vpop.f32.mrf.mxu0 }
 0x6d6   : > { %6071 = vst [vmem:[%s935_s2 + $0x8] sm:$0xff] %v6068_v1  ;;  %v9383_v31 = vpop.f32.mrf.mxu0  ;;  %s12146_s2 = scalar_lea.hbm %s12280_s5, %s10147_s28 }
 0x6d7   : > { %v9384_v33 = vadd.f32 %v9383_v31, %v9382_v17 }
 0x6e7   : > { %v6478_v10 = vpop.f32.mrf.mxu1 }
 0x6e8   : > { %v6479_v32 = vadd.f32 %v9381_v14, %v6478_v10 }
 0x6e9   : > { %v10003_v51 = vpop.f32.mrf.mxu1 }
 0x6eb   : > { %v6481_v24 = vpop.f32.mrf.mxu1 }
 0x6ec   : > { %v6482_v36 = vadd.f32 %v9384_v33, %v6481_v24  ;;  %v10876_v33 = vld [vmem:[#allocation15 + $0xb8] sm:$0xff]  }
 0x6ed   : > { %v10004_v61 = vpop.f32.mrf.mxu1 }
 0x6f0   : > { %v9410_v21 = vpop.f32.mrf.mxu0 }
 0x6f2   : > { %v9411_v22 = vpop.f32.mrf.mxu0 }
 0x6f3   : > { %v9412_v28 = vadd.f32 %v9411_v22, %v9410_v21 }
 0x6f4   : > { %v9413_v20 = vpop.f32.mrf.mxu0 }
 0x6f5   : > { %v6682_v2 = vadd.f32 %v9412_v28, %v6479_v32  ;;  %v7664_v32 = vld [vmem:[#allocation2 + $0x60] sm:$0x80] }
 0x6f6   : > { %v9414_v38 = vpop.f32.mrf.mxu0 }
 0x6f7   : > { %v9415_v7 = vadd.f32 %v9414_v38, %v9413_v20 }
 0x6f9   : > { %v6685_v39 = vadd.f32 %v9415_v7, %v6482_v36 }
 0x707   : > { %v6722_v11 = vpop.f32.mrf.mxu1 }
 0x708   : > { %v6723_v53 = vadd.f32 %v6722_v11, %v6682_v2  ;;  %v10878_v11 = vld [vmem:[#allocation15 + $0xb0] sm:$0xff]  }
 0x709   : > { %v10023_v57 = vpop.f32.mrf.mxu1 }
 0x70a   : > { %v10879_v57 = vld [vmem:[#allocation15 + $0xa8] sm:$0xff]  }
 0x70b   : > { %v6725_v29 = vpop.f32.mrf.mxu1 }
 0x70c   : > { %v6726_v60 = vadd.f32 %v6725_v29, %v6685_v39 }
 0x70d   : > { %v10024_v13 = vpop.f32.mrf.mxu1 }
 0x710   : > { %v9441_v40 = vpop.f32.mrf.mxu0 }
 0x712   : > { %v9442_v42 = vpop.f32.mrf.mxu0 }
 0x713   : > { %v9443_v62 = vadd.f32 %v9442_v42, %v9441_v40 }
 0x714   : > { %v9444_v34 = vpop.f32.mrf.mxu0 }
 0x716   : > { %v9445_v19 = vpop.f32.mrf.mxu0 }
 0x717   : > { %v9446_v6 = vadd.f32 %v9445_v19, %v9444_v34  ;;  %v10881_v34 = vld [vmem:[#allocation15 + $0x98] sm:$0xff]   ;;  %v7901_v19 = vld [vmem:[#allocation2 + $0x48] sm:$0x1] }
 0x727   : > { %v7002_v45 = vpop.f32.mrf.mxu1 }
 0x728   : > { %v7003_v63 = vadd.f32 %v9443_v62, %v7002_v45  ;;  %v10880_v45 = vld [vmem:[#allocation15 + $0xa0] sm:$0xff]  }
 0x729   : > { %v10043_v4 = vpop.f32.mrf.mxu1 }
 0x72a   : > { %v7009_v47 = vadd.f32 %v7003_v63, %v6723_v53 }
 0x72b   : > { %v7005_v23 = vpop.f32.mrf.mxu1 }
 0x72c   : > { %v7006_v51 = vadd.f32 %v9446_v6, %v7005_v23 }
 0x72d   : > { %v10044_v37 = vpop.f32.mrf.mxu1 }
 0x72e   : > { %v7010_v50 = vadd.f32 %v7006_v51, %v6726_v60 }
 0x730   : > { %v9472_v52 = vpop.f32.mrf.mxu0 }
 0x732   : > { %v9473_v56 = vpop.f32.mrf.mxu0 }
 0x733   : > { %v9474_v1 = vadd.f32 %v9473_v56, %v9472_v52  ;;  %v7903_v52 = vpack.c.bf16 %v7901_v19, %v7901_v19  ;;  %v10883_v56 = vld [vmem:[#allocation15 + $0x88] sm:$0xff]  }
 0x734   : > { %v9475_v49 = vpop.f32.mrf.mxu0 }
 0x736   : > { %v9476_v35 = vpop.f32.mrf.mxu0 }
 0x737   : > { %v9477_v54 = vadd.f32 %v9476_v35, %v9475_v49  ;;  %v7928_v35 = vshll.u32 %v7903_v52, 16 }
 0x739   : > { %v7930_v63 = vrot.slane %v7928_v35, 1 }
 0x747   : > { %v7332_v5 = vpop.f32.mrf.mxu1 }
 0x748   : > { %v7333_v10 = vadd.f32 %v9474_v1, %v7332_v5 }
 0x749   : > { %v10063_v43 = vpop.f32.mrf.mxu1 }
 0x74a   : > { %v7339_v16 = vadd.f32 %v7333_v10, %v7009_v47 }
 0x74b   : > { %v7335_v18 = vpop.f32.mrf.mxu1 }
 0x74c   : > { %v7336_v17 = vadd.f32 %v9477_v54, %v7335_v18  ;;  %v10882_v18 = vld [vmem:[#allocation15 + $0x90] sm:$0xff]  }
 0x74d   : > { %v10064_v44 = vpop.f32.mrf.mxu1 }
 0x74e   : > { %v7340_v48 = vadd.f32 %v7336_v17, %v7010_v50 }
 0x750   : > { %v9503_v12 = vpop.f32.mrf.mxu0 }
 0x752   : > { %v9504_v46 = vpop.f32.mrf.mxu0 }
 0x753   : > { %v9505_v24 = vadd.f32 %v9504_v46, %v9503_v12  ;;  %v10884_v12 = vld [vmem:[#allocation15 + $0x80] sm:$0xff]  }
 0x754   : > { %v9506_v0 = vpop.f32.mrf.mxu0 }
 0x756   : > { %v9507_v15 = vpop.f32.mrf.mxu0 }
 0x757   : > { %v9508_v59 = vadd.f32 %v9507_v15, %v9506_v0 }
 0x767   : > { %v7638_v61 = vpop.f32.mrf.mxu1 }
 0x768   : > { %v7639_v58 = vadd.f32 %v9505_v24, %v7638_v61 }
 0x769   : > { %v10083_v31 = vpop.f32.mrf.mxu1 }
 0x76a   : > { %v7645_v21 = vadd.f32 %v7639_v58, %v7339_v16 }
 0x76b   : > { %v7641_v41 = vpop.f32.mrf.mxu1 }
 0x76c   : > { %v7654_v22 = vadd.f32 %v8961_v55, %v7645_v21  ;;  %v7642_v9 = vadd.f32 %v9508_v59, %v7641_v41 }
 0x76d   : > { %v10084_v25 = vpop.f32.mrf.mxu1 }
 0x76e   : > { %v7656_v20 = vmul.f32 0.2, %v7654_v22  ;;  %v7646_v26 = vadd.f32 %v7642_v9, %v7340_v48 }
 0x770   : > { %v7658_v14 = vmax.f32 %v7654_v22, %v7656_v20  ;;  %v7655_v28 = vadd.f32 %v8961_v55, %v7646_v26 }
 0x772   : > { %7660 = vst [vmem:[%s940_s27] sm:$0xff] %v7658_v14  ;;  %7662 = vst [vmem:[#allocation2 + $0x50] sm:$0xff] %v7658_v14  ;;  %v7657_v38 = vmul.f32 0.2, %v7655_v28  ;;  %v7667_v2 = vpack.c.bf16 %v7658_v14, %v7664_v32 }
 0x774   : > { %v7659_v30 = vmax.f32 %v7655_v28, %v7657_v38  ;;  %v7793_v27 = vshrl.u32 %v7667_v2, 16  ;;  %v7796_v36 = vshll.u32 %v7667_v2, 16 }
 0x776   : > { %7661 = vst [vmem:[%s940_s27 + $0x8] sm:$0xff] %v7659_v30  ;;  %7663 = vst [vmem:[#allocation2 + $0x10] sm:$0xff] %v7659_v30  ;;  %v7686_v7 = vpack.c.bf16 %v7659_v30, %v7658_v14  ;;  %v7795_v29 = vrot.slane %v7793_v27, 3  ;;  %v7798_v3 = vrot.slane %v7796_v36, 4 }
 0x778   : > { %10102 = vmatmul.mubr.bf16.vlgmr.msra.gmra.mxu0 %v7686_v7  ;;  %v7799_v37 = vor.u32 %v7798_v3, %v7795_v29 }
 0x779   : > { %10126 = vmatpush3.bf16.msra.mxu0 %v10876_v33  ;;  %10141 = vmatprep.mubr.msk.bf16.mxu0 %vm11197_vm0, %v12106_v8  ;;  %v7899_v42 = vld [vmem:[#allocation2 + $0x50] sm:$0xfe] }
 0x77a   : > { %10127 = vmatprep.subr.bf16.mxu0 %v12106_v8  ;;  %v7902_v43 = vpack.c.bf16 %v7659_v30, %v7899_v42 }
 0x77c   : > { %v7923_v44 = vshll.u32 %v7902_v43, 16  ;;  %v7921_v46 = vshrl.u32 %v7902_v43, 16 }
 0x77d   : > { %10128 = vmatpush3.bf16.msra.mxu0 %v10878_v11  ;;  %v7666_v53 = vld [vmem:[#allocation2 + $0x10] sm:$0x7f] }
 0x77e   : > { %v7668_v39 = vpack.c.bf16 %v7666_v53, %v7666_v53  ;;  %10129 = vmatprep.subr.bf16.mxu0 %v12106_v8  ;;  %v7925_v49 = vrot.slane %v7923_v44, 1 }
 0x780   : > { %v7801_v60 = vshrl.u32 %v7668_v39, 16  ;;  %v7804_v13 = vshll.u32 %v7668_v39, 16  ;;  %v7926_v62 = vor.u32 %v7925_v49, %v7921_v46 }
 0x781   : > { %10130 = vmatpush3.bf16.msra.mxu0 %v10879_v57 }
 0x782   : > { %v7803_v4 = vrot.slane %v7801_v60, 3  ;;  %v7806_v23 = vrot.slane %v7804_v13, 4  ;;  %10131 = vmatprep.subr.bf16.mxu0 %v12106_v8  ;;  %v7931_v1 = vsel %vm1217_vm2, %v7926_v62, %v7930_v63 }
 0x784   : > { %v7807_v40 = vor.u32 %v7806_v23, %v7803_v4 }
 0x785   : > { %10132 = vmatpush3.bf16.msra.mxu0 %v10880_v45 }
 0x786   : > { %v7808_v5 = vsel %vm1088_vm1, %v7799_v37, %v7807_v40  ;;  %10133 = vmatprep.subr.bf16.mxu0 %v12106_v8 }
 0x787   : > { %10122 = vmatmul.mubr.bf16.vlgmr.msra.gmra.mxu1 %v7808_v5 }
 0x789   : > { %10134 = vmatpush3.bf16.msra.mxu0 %v10881_v34 }
 0x78a   : > { %10135 = vmatprep.subr.bf16.mxu0 %v12106_v8 }
 0x78d   : > { %10136 = vmatpush3.bf16.msra.mxu0 %v10882_v18 }
 0x78e   : > { %10137 = vmatprep.subr.bf16.mxu0 %v12106_v8 }
 0x791   : > { %10138 = vmatpush3.bf16.msra.mxu0 %v10883_v56 }
 0x792   : > { %10139 = vmatprep.subr.bf16.mxu0 %v12106_v8 }
 0x795   : > { %10140 = vmatpush3.bf16.msra.mxu0 %v10884_v12 }
 0x798   : > { %10142 = vmatmul.mubr.bf16.vlgmr.msra.gmra.mxu0 %v7931_v1 }
 0x799   : > { %11115 = shalt.err (!%p11112_p12)
}
 0x79a   : > { %s11116_s6 = scalar_lea.hbm %s12146_s2, 768  ;;  %s11120_s28 = scalar_lea.hbm %s12281_s17, 1536 }
 0x79b   : > { %p11117_p10 = scmp.ne.s32.totalorder %s12146_s2, %s11116_s6  ;;  %p11121_p2 = scmp.lt.s32.totalorder %s12146_s2, %s12281_s17 }
 0x79c   : > { %p11122_p9 = scmp.lt.s32.totalorder %s11120_s28, %s11116_s6 }
 0x79d   : > { %p11118_p11 = pnand %p11117_p10, %p11365_p5 }
 0x79e   : > { %p11123_p4 = por %p11122_p9, %p11121_p2 }
 0x79f   : > { %p11119_p1 = pneg %p11118_p11 }
 0x7a1   : > { %p11124_p13 = pnand %p11123_p4, %p11119_p1 }
 0x7a3   : > { %11127 = shalt.err (!%p11124_p13)
}
 0x7a4   : > { %s11200_s5 = smov 384   ;;  %s11201_s1 = smov 24  }
 0x7a5   : > { %10180 = dma.vmem_to_hbm [thread:$0]  (%p11365_p5), %s12140_s0, 768, %s12146_s2, %s12150_s20, %s11200_s5, %s11200_s5, %s11201_s1  }
 0x7a6   : > { %s12282_s29 = sld [smem:[#allocation39_spill]] }
 0x7a7   : > { %s12283_s2 = sld [smem:[#allocation41_spill]] }
 0x7ac   : > { %v8986_v16 = vld [vmem:[%s12282_s29] ss:$0 sm:$0xff] }
 0x7ad   : > { %s945_s20 = scalar_lea.vmem %s12283_s2, %s11518_s8 }
 0x838   : > { %v7785_v8 = vpop.f32.mrf.mxu0 }
 0x83a   : > { %v10103_v0 = vpop.f32.mrf.mxu0 }
 0x83c   : > { %v7788_v6 = vpop.f32.mrf.mxu0 }
 0x83e   : > { %v10104_v10 = vpop.f32.mrf.mxu0 }
 0x847   : > { %v7892_v47 = vpop.f32.mrf.mxu1 }
 0x848   : > { %v7893_v15 = vadd.f32 %v7892_v47, %v7785_v8 }
 0x849   : > { %v10123_v51 = vpop.f32.mrf.mxu1 }
 0x84b   : > { %v7895_v54 = vpop.f32.mrf.mxu1 }
 0x84c   : > { %v7896_v55 = vadd.f32 %v7895_v54, %v7788_v6 }
 0x84d   : > { %v10124_v24 = vpop.f32.mrf.mxu1 }
 0x858   : > { %v8015_v61 = vpop.f32.mrf.mxu0 }
 0x859   : > { %v8022_v17 = vadd.f32 %v8015_v61, %v7893_v15 }
 0x85a   : > { %v10143_v58 = vpop.f32.mrf.mxu0 }
 0x85b   : > { %v8031_v31 = vadd.f32 %v8986_v16, %v8022_v17 }
 0x85c   : > { %v8018_v50 = vpop.f32.mrf.mxu0 }
 0x85d   : > { %v8033_v59 = vmul.f32 0.2, %v8031_v31  ;;  %v8023_v21 = vadd.f32 %v8018_v50, %v7896_v55 }
 0x85e   : > { %v10144_v41 = vpop.f32.mrf.mxu0 }
 0x85f   : > { %v8035_v48 = vmax.f32 %v8031_v31, %v8033_v59  ;;  %v8032_v22 = vadd.f32 %v8986_v16, %v8023_v21 }
 0x861   : > { %8037 = vst [vmem:[%s945_s20] sm:$0xff] %v8035_v48  ;;  %v8034_v9 = vmul.f32 0.2, %v8032_v22 }
 0x863   : > { %v8036_v25 = vmax.f32 %v8032_v22, %v8034_v9 }
 0x865   : > { %8038 = vst [vmem:[%s945_s20 + $0x8] sm:$0xff] %v8036_v25 }
 0x866 PF: > { %s12284_s6 = sld [smem:[#allocation26_spill]] }
 0x867   : > { %s12285_s25 = sld [smem:[#allocation24_spill]] }
 0x86c   : > { %p10227_p5 = scmp.ge.s32.totalorder %s12284_s6, 2 }
 0x86d   : > { %s8132_s28 = sand.u32 1, %s12285_s25  }
 0x86e   : > { %p10208_p3 = pnand %p10227_p5, %p11369_p6  ;;  %s8133_s30 = scalar_lea.sflag [#allocation5], %s8132_s28 }
 0x870   : > { %p10209_p7 = pneg %p10208_p3 }
 0x872   : > { %11165 = dma.done.wait (%p10209_p7), %s8133_s30, 768  }
 0x873   : > { %11167 = vsyncadd (%p10209_p7), %s8133_s30, 4294966528  ;;  %s12287_s28 = sld [smem:[#allocation27_spill]]  ;;  %s12290_s5 = smov %s11174_s26 }
 0x874   : > { %s12288_s8 = sld [smem:[#allocation25_spill]] }
 0x875   : > { %s12289_s27 = sld [smem:[#allocation28_spill]] }
 0x879   : > { %p40_p8 = scmp.ge.s32.totalorder %s12287_s28, 4  }
 0x87a   : > { %s12291_s26 = smov %s12288_s8 }
 0x87b   :  { %42 = sbr.rel (!%p40_p8) target bundleno = 21 (0x15), region = 235 }
 0x880   :  { %8170 = vsyncpa [#allocation4], 1 }
 0x881   :  { %8172 = vsyncpa [#allocation4 + $0x1], 1 }
 0x882   :  { %8173 = vsyncpa [#allocation7], 1 }
 0x883   :  { %8174 = vsyncpa [#allocation10], 1 }
 0x884   :  { %8175 = vsyncpa [#allocation13], 1 }
 0x885   :  { %8176 = vsyncpa [#allocation16], 1 }
 0x886   :  { %8177 = vsyncpa [#allocation5], 1 }
 0x887   :  { %8179 = vsyncpa [#allocation5 + $0x1], 1 }

</bundles_post_ra>
